<compile_context>
chip_gen: v7x
topology: tpu7x:2x2x1
jax: 0.10.0
libtpu: 0.0.40
codegen_flags: <defaults>
</compile_context>

<pallas_src>
import jax
import jax.numpy as jnp
from jax.experimental import pallas as pl
from jax.experimental.pallas import tpu as pltpu

EPS = 1e-5


def _conv_stats_kernel(xp_ref, w_ref, y_ref, stats_ref, col_ref):
    """Pass 1: 3x3 conv as one K=9*Cin MXU matmul + per-tile centered BN stats.

    xp_ref   : (TN, H+2, W+2, Cin) bf16   padded NHWC activation tile
    w_ref    : (9*Cin, CoutP)      bf16   tap-major weight matrix
    y_ref    : (TM, CoutP)         bf16   conv output tile, TM = TN*H*W
    stats_ref: (1, 8, CoutP)       f32    row 0 = sum(y), row 1 = sum((y - tile_mean)^2)
    col_ref  : (TM, 9*Cin)         bf16   VMEM im2col scratch
    """
    tn, hp, wp, cin = xp_ref.shape
    h, w = hp - 2, wp - 2
    tm, coutp = y_ref.shape

    # Stage the 9 shifted windows once into the im2col scratch.  Each write is
    # only (TM, Cin) -- far cheaper than the old per-tap (TM, CoutP)
    # accumulate-into-output traffic.
    for t in range(9):
        ky, kx = divmod(t, 3)
        col_ref[:, t * cin:(t + 1) * cin] = (
            xp_ref[:, ky:ky + h, kx:kx + w, :].reshape(tm, cin))

    # One fused matmul: bf16 operands, f32 accumulation, single result.
    acc = jnp.dot(col_ref[...], w_ref[...],
                  preferred_element_type=jnp.float32)          # (TM, CoutP) f32

    # Per-tile centered BatchNorm statistics in f32 (Chan-combined on host).
    s = jnp.sum(acc, axis=0, keepdims=True)                    # (1, CoutP)
    d = acc - s * (1.0 / tm)
    m2 = jnp.sum(d * d, axis=0, keepdims=True)                 # (1, CoutP)
    stats_ref[:, 0:1, :] = s.reshape(1, 1, coutp)
    stats_ref[:, 1:2, :] = m2.reshape(1, 1, coutp)

    # Single lane-dense bf16 store of the conv output.
    y_ref[...] = acc.astype(y_ref.dtype)


def _bn_relu_kernel(y_ref, scale_ref, shift_ref, out_ref):
    """Pass 2: out = relu(y * scale + shift).  Purely HBM-bandwidth bound."""
    y = y_ref[...].astype(jnp.float32)
    out_ref[...] = jnp.maximum(y * scale_ref[...] + shift_ref[...], 0.0)


def _pick_batch_tile(N, H, W, Cin, CoutP):
    """Largest batch tile that (a) divides N, (b) keeps the (TM, CoutP) row
    tile sublane-aligned, (c) keeps >= 2 grid steps when N > 1 (pipelining and
    v7x two-TensorCore split), and (d) fits a conservative ~8 MiB per-step
    VMEM budget (within v5e 16 MiB / v7x 32 MiB default scoped VMEM, counting
    double-buffered BlockSpec operands and lane padding)."""
    rows = H * W
    lane = 128
    cin_lanes = -(-Cin // lane) * lane
    k_lanes = -(-(9 * Cin) // lane) * lane
    per_image = (
        (H + 2) * (W + 2) * cin_lanes * 2 * 2   # bf16 xp tile, double-buffered
        + rows * k_lanes * 2                    # bf16 im2col scratch
        + rows * CoutP * 4                      # f32 matmul accumulator value
        + rows * CoutP * (2 * 2 + 4 * 2)        # bf16 y x2 / f32 out x2
    )
    budget = 8 << 20
    cap = max(1, budget // max(per_image, 1))
    best = None
    for cand in range(1, N + 1):
        if N % cand or (cand * rows) % 8:
            continue
        if cand <= cap and (N == 1 or N // cand >= 2):
            best = cand
    if best is None:
        best = N                                 # single full-array tile fallback
    return best


def conv_block_forward(x_nchw, weight, bias, gamma, beta, *, batch_tile=None):
    """ConvBlock forward.  x_nchw: (N, Cin, H, W); weight: (Cout, Cin, 3, 3)."""
    N, Cin, H, W = x_nchw.shape
    Cout = weight.shape[0]
    CoutP = -(-Cout // 128) * 128                # lane-dense output channels
    M = N * H * W
    K = 9 * Cin

    # Conv bias cancels exactly under training-mode BatchNorm
    # (shift = beta - mean*scale absorbs it), so it is never applied.
    del bias

    if batch_tile is None:
        batch_tile = _pick_batch_tile(N, H, W, Cin, CoutP)
    assert N % batch_tile == 0
    num_tiles = N // batch_tile
    TM = batch_tile * H * W
    assert (TM % 8 == 0) or (num_tiles == 1)

    # Layout glue: NHWC + halo pad, bf16 operands (half the DMA bytes and
    # bf16-native MXU rate).
    x_nhwc = jnp.transpose(x_nchw, (0, 2, 3, 1))
    xp = jnp.pad(x_nhwc, ((0, 0), (1, 1), (1, 1), (0, 0))).astype(jnp.bfloat16)
    # Tap-major weight matrix: row (ky*3 + kx)*Cin + ci, column co.
    w_mat = jnp.transpose(weight, (2, 3, 1, 0)).reshape(K, Cout)
    w_mat = jnp.pad(w_mat, ((0, 0), (0, CoutP - Cout))).astype(jnp.bfloat16)

    # --- pass 1: fused-K conv matmul + per-tile centered BN statistics ---
    y, stats = pl.pallas_call(
        _conv_stats_kernel,
        out_shape=(
            jax.ShapeDtypeStruct((M, CoutP), jnp.bfloat16),
            jax.ShapeDtypeStruct((num_tiles, 8, CoutP), jnp.float32),
        ),
        grid=(num_tiles,),
        in_specs=[
            pl.BlockSpec((batch_tile, H + 2, W + 2, Cin),
                         lambda i: (i, 0, 0, 0)),
            pl.BlockSpec((K, CoutP), lambda i: (0, 0)),
        ],
        out_specs=(
            pl.BlockSpec((TM, CoutP), lambda i: (i, 0)),
            pl.BlockSpec((1, 8, CoutP), lambda i: (i, 0, 0)),
        ),
        scratch_shapes=[pltpu.VMEM((TM, K), jnp.bfloat16)],
        compiler_params=pltpu.CompilerParams(
            dimension_semantics=("parallel",)),
    )(xp, w_mat)

    # --- cross-tile Chan/Welford combine + BN constants (tiny, plain JAX) ---
    m = jnp.float32(M)
    tile_sum = stats[:, 0, :]                    # (num_tiles, CoutP)
    tile_m2 = stats[:, 1, :]
    mean = jnp.sum(tile_sum, axis=0) / m
    tile_mean = tile_sum / jnp.float32(TM)
    m2 = jnp.sum(tile_m2, axis=0) + jnp.float32(TM) * jnp.sum(
        jnp.square(tile_mean - mean), axis=0)
    var = m2 / m
    gamma_p = jnp.pad(gamma.astype(jnp.float32), (0, CoutP - Cout))
    beta_p = jnp.pad(beta.astype(jnp.float32), (0, CoutP - Cout))
    scale_v = gamma_p * jax.lax.rsqrt(var + EPS)
    shift_v = beta_p - mean * scale_v
    scale = scale_v.reshape(1, CoutP)
    shift = shift_v.reshape(1, CoutP)

    # --- pass 2: normalize + affine + ReLU (lane-dense, memory-bound) ---
    out_p = pl.pallas_call(
        _bn_relu_kernel,
        out_shape=jax.ShapeDtypeStruct((M, CoutP), jnp.float32),
        grid=(num_tiles,),
        in_specs=[
            pl.BlockSpec((TM, CoutP), lambda i: (i, 0)),
            pl.BlockSpec((1, CoutP), lambda i: (0, 0)),
            pl.BlockSpec((1, CoutP), lambda i: (0, 0)),
        ],
        out_specs=pl.BlockSpec((TM, CoutP), lambda i: (i, 0)),
        compiler_params=pltpu.CompilerParams(
            dimension_semantics=("parallel",)),
    )(y, scale, shift)

    out = out_p[:, :Cout].reshape(N, H, W, Cout)
    # PyTorch-facing NCHW layout; in an NHWC pipeline this transpose disappears.
    return jnp.transpose(out, (0, 3, 1, 2))


def reference(x, weight, bias, gamma, beta):
    """Pure-JAX f32 reference matching PyTorch ConvBlock forward (training BN)."""
    y = jax.lax.conv_general_dilated(
        x, weight, window_strides=(1, 1), padding=((1, 1), (1, 1)),
        dimension_numbers=("NCHW", "OIHW", "NCHW"))
    y = y + bias.reshape(1, -1, 1, 1)
    mean = y.mean(axis=(0, 2, 3), keepdims=True)
    var = ((y - mean) ** 2).mean(axis=(0, 2, 3), keepdims=True)
    y = (y - mean) / jnp.sqrt(var + EPS)
    y = y * gamma.reshape(1, -1, 1, 1) + beta.reshape(1, -1, 1, 1)
    return jnp.maximum(y, 0.0)


if __name__ == "__main__":
    key = jax.random.PRNGKey(0)
    k_x, k_w, k_b = jax.random.split(key, 3)

    N, Cin, H, W = 2, 4, 16, 16
    Cout = 8

    x = jax.random.normal(k_x, (N, Cin, H, W), dtype=jnp.float32)
    weight = 0.1 * jax.random.normal(k_w, (Cout, Cin, 3, 3), dtype=jnp.float32)
    bias = 0.05 * jax.random.normal(k_b, (Cout,), dtype=jnp.float32)
    # BatchNorm2d default init: weight (gamma) = 1, bias (beta) = 0
    gamma = jnp.ones((Cout,), dtype=jnp.float32)
    beta = jnp.zeros((Cout,), dtype=jnp.float32)

    # N=2 -> batch_tile=1, 2-tile grid: exercises the pipeline, the parallel
    # axis, and the cross-tile Chan-combined BN statistics.
    out = conv_block_forward(x, weight, bias, gamma, beta)
    out = jax.block_until_ready(out)

    ref = reference(x, weight, bias, gamma, beta)
    assert out.shape == (N, Cout, H, W)
    # bf16 matmul operands + bf16 intermediate y -> looser tolerance vs f32 ref.
    max_err = float(jnp.max(jnp.abs(out - ref)))
    mean_err = float(jnp.mean(jnp.abs(out - ref)))
    assert max_err < 1e-1 and mean_err < 2e-2, (
        f"mismatch vs reference: max {max_err}, mean {mean_err}")

    print("KERNEL_OK")
</pallas_src>

<mosaic_0001>
module attributes {stable_mosaic.version = 11 : i64} {
  func.func @_conv_stats_kernel(%arg0: i32, %arg1: memref<1x18x18x4xbf16, #tpu.memory_space<vmem>>, %arg2: memref<36x128xbf16, #tpu.memory_space<vmem>>, %arg3: memref<256x128xbf16, #tpu.memory_space<vmem>>, %arg4: memref<1x8x128xf32, #tpu.memory_space<vmem>>, %arg5: memref<256x36xbf16, #tpu.memory_space<vmem>>) attributes {dimension_semantics = [#tpu.dimension_semantics<parallel>], iteration_bounds = array<i64: 2>, scalar_prefetch = 0 : i64, scratch_operands = 1 : i64, tpu.core_type = #tpu.core_type<tc>, window_params = [{transform_indices = @transform_0, window_bounds = array<i64: 1, 18, 18, 4>}, {pipeline_mode = #tpu.pipeline_mode<synchronous>, transform_indices = @transform_1, window_bounds = array<i64: 36, 128>}, {transform_indices = @transform_2, window_bounds = array<i64: 256, 128>}, {transform_indices = @transform_3, window_bounds = array<i64: 1, 8, 128>}]} {
    %c0 = arith.constant 0 : index
    %c0_0 = arith.constant 0 : index
    %c0_1 = arith.constant 0 : index
    %c0_2 = arith.constant 0 : index
    %0 = vector.load %arg1[%c0, %c0_0, %c0_1, %c0_2] : memref<1x18x18x4xbf16, #tpu.memory_space<vmem>>, vector<1x16x16x4xbf16>
    %1 = vector.shape_cast %0 : vector<1x16x16x4xbf16> to vector<256x4xbf16>
    %c0_3 = arith.constant 0 : index
    %c0_4 = arith.constant 0 : index
    %2 = vector.load %arg5[%c0_3, %c0_4] : memref<256x36xbf16, #tpu.memory_space<vmem>>, vector<256x4xbf16>
    tpu.vector_store %arg5[%c0_3, %c0_4], %1 {strides = array<i32>} : memref<256x36xbf16, #tpu.memory_space<vmem>>, vector<256x4xbf16>,
    %c0_5 = arith.constant 0 : index
    %c0_6 = arith.constant 0 : index
    %c1 = arith.constant 1 : index
    %c0_7 = arith.constant 0 : index
    %3 = vector.load %arg1[%c0_5, %c0_6, %c1, %c0_7] : memref<1x18x18x4xbf16, #tpu.memory_space<vmem>>, vector<1x16x16x4xbf16>
    %4 = vector.shape_cast %3 : vector<1x16x16x4xbf16> to vector<256x4xbf16>
    %c0_8 = arith.constant 0 : index
    %c4 = arith.constant 4 : index
    %5 = vector.load %arg5[%c0_8, %c4] : memref<256x36xbf16, #tpu.memory_space<vmem>>, vector<256x4xbf16>
    tpu.vector_store %arg5[%c0_8, %c4], %4 {strides = array<i32>} : memref<256x36xbf16, #tpu.memory_space<vmem>>, vector<256x4xbf16>,
    %c0_9 = arith.constant 0 : index
    %c0_10 = arith.constant 0 : index
    %c2 = arith.constant 2 : index
    %c0_11 = arith.constant 0 : index
    %6 = vector.load %arg1[%c0_9, %c0_10, %c2, %c0_11] : memref<1x18x18x4xbf16, #tpu.memory_space<vmem>>, vector<1x16x16x4xbf16>
    %7 = vector.shape_cast %6 : vector<1x16x16x4xbf16> to vector<256x4xbf16>
    %c0_12 = arith.constant 0 : index
    %c8 = arith.constant 8 : index
    %8 = vector.load %arg5[%c0_12, %c8] : memref<256x36xbf16, #tpu.memory_space<vmem>>, vector<256x4xbf16>
    tpu.vector_store %arg5[%c0_12, %c8], %7 {strides = array<i32>} : memref<256x36xbf16, #tpu.memory_space<vmem>>, vector<256x4xbf16>,
    %c0_13 = arith.constant 0 : index
    %c1_14 = arith.constant 1 : index
    %c0_15 = arith.constant 0 : index
    %c0_16 = arith.constant 0 : index
    %9 = vector.load %arg1[%c0_13, %c1_14, %c0_15, %c0_16] : memref<1x18x18x4xbf16, #tpu.memory_space<vmem>>, vector<1x16x16x4xbf16>
    %10 = vector.shape_cast %9 : vector<1x16x16x4xbf16> to vector<256x4xbf16>
    %c0_17 = arith.constant 0 : index
    %c12 = arith.constant 12 : index
    %11 = vector.load %arg5[%c0_17, %c12] : memref<256x36xbf16, #tpu.memory_space<vmem>>, vector<256x4xbf16>
    tpu.vector_store %arg5[%c0_17, %c12], %10 {strides = array<i32>} : memref<256x36xbf16, #tpu.memory_space<vmem>>, vector<256x4xbf16>,
    %c0_18 = arith.constant 0 : index
    %c1_19 = arith.constant 1 : index
    %c1_20 = arith.constant 1 : index
    %c0_21 = arith.constant 0 : index
    %12 = vector.load %arg1[%c0_18, %c1_19, %c1_20, %c0_21] : memref<1x18x18x4xbf16, #tpu.memory_space<vmem>>, vector<1x16x16x4xbf16>
    %13 = vector.shape_cast %12 : vector<1x16x16x4xbf16> to vector<256x4xbf16>
    %c0_22 = arith.constant 0 : index
    %c16 = arith.constant 16 : index
    %14 = vector.load %arg5[%c0_22, %c16] : memref<256x36xbf16, #tpu.memory_space<vmem>>, vector<256x4xbf16>
    tpu.vector_store %arg5[%c0_22, %c16], %13 {strides = array<i32>} : memref<256x36xbf16, #tpu.memory_space<vmem>>, vector<256x4xbf16>,
    %c0_23 = arith.constant 0 : index
    %c1_24 = arith.constant 1 : index
    %c2_25 = arith.constant 2 : index
    %c0_26 = arith.constant 0 : index
    %15 = vector.load %arg1[%c0_23, %c1_24, %c2_25, %c0_26] : memref<1x18x18x4xbf16, #tpu.memory_space<vmem>>, vector<1x16x16x4xbf16>
    %16 = vector.shape_cast %15 : vector<1x16x16x4xbf16> to vector<256x4xbf16>
    %c0_27 = arith.constant 0 : index
    %c20 = arith.constant 20 : index
    %17 = vector.load %arg5[%c0_27, %c20] : memref<256x36xbf16, #tpu.memory_space<vmem>>, vector<256x4xbf16>
    tpu.vector_store %arg5[%c0_27, %c20], %16 {strides = array<i32>} : memref<256x36xbf16, #tpu.memory_space<vmem>>, vector<256x4xbf16>,
    %c0_28 = arith.constant 0 : index
    %c2_29 = arith.constant 2 : index
    %c0_30 = arith.constant 0 : index
    %c0_31 = arith.constant 0 : index
    %18 = vector.load %arg1[%c0_28, %c2_29, %c0_30, %c0_31] : memref<1x18x18x4xbf16, #tpu.memory_space<vmem>>, vector<1x16x16x4xbf16>
    %19 = vector.shape_cast %18 : vector<1x16x16x4xbf16> to vector<256x4xbf16>
    %c0_32 = arith.constant 0 : index
    %c24 = arith.constant 24 : index
    %20 = vector.load %arg5[%c0_32, %c24] : memref<256x36xbf16, #tpu.memory_space<vmem>>, vector<256x4xbf16>
    tpu.vector_store %arg5[%c0_32, %c24], %19 {strides = array<i32>} : memref<256x36xbf16, #tpu.memory_space<vmem>>, vector<256x4xbf16>,
    %c0_33 = arith.constant 0 : index
    %c2_34 = arith.constant 2 : index
    %c1_35 = arith.constant 1 : index
    %c0_36 = arith.constant 0 : index
    %21 = vector.load %arg1[%c0_33, %c2_34, %c1_35, %c0_36] : memref<1x18x18x4xbf16, #tpu.memory_space<vmem>>, vector<1x16x16x4xbf16>
    %22 = vector.shape_cast %21 : vector<1x16x16x4xbf16> to vector<256x4xbf16>
    %c0_37 = arith.constant 0 : index
    %c28 = arith.constant 28 : index
    %23 = vector.load %arg5[%c0_37, %c28] : memref<256x36xbf16, #tpu.memory_space<vmem>>, vector<256x4xbf16>
    tpu.vector_store %arg5[%c0_37, %c28], %22 {strides = array<i32>} : memref<256x36xbf16, #tpu.memory_space<vmem>>, vector<256x4xbf16>,
    %c0_38 = arith.constant 0 : index
    %c2_39 = arith.constant 2 : index
    %c2_40 = arith.constant 2 : index
    %c0_41 = arith.constant 0 : index
    %24 = vector.load %arg1[%c0_38, %c2_39, %c2_40, %c0_41] : memref<1x18x18x4xbf16, #tpu.memory_space<vmem>>, vector<1x16x16x4xbf16>
    %25 = vector.shape_cast %24 : vector<1x16x16x4xbf16> to vector<256x4xbf16>
    %c0_42 = arith.constant 0 : index
    %c32 = arith.constant 32 : index
    %26 = vector.load %arg5[%c0_42, %c32] : memref<256x36xbf16, #tpu.memory_space<vmem>>, vector<256x4xbf16>
    tpu.vector_store %arg5[%c0_42, %c32], %25 {strides = array<i32>} : memref<256x36xbf16, #tpu.memory_space<vmem>>, vector<256x4xbf16>,
    %c0_43 = arith.constant 0 : index
    %c0_44 = arith.constant 0 : index
    %27 = vector.load %arg5[%c0_43, %c0_44] : memref<256x36xbf16, #tpu.memory_space<vmem>>, vector<256x36xbf16>
    %c0_45 = arith.constant 0 : index
    %c0_46 = arith.constant 0 : index
    %28 = vector.load %arg2[%c0_45, %c0_46] : memref<36x128xbf16, #tpu.memory_space<vmem>>, vector<36x128xbf16>
    %cst = arith.constant dense<0.000000e+00> : vector<256x128xf32>
    %29 = tpu.matmul %27, %28, %cst {dimension_numbers = #tpu.dot_dimension_numbers<[1], [0], [0], [1], [0, 0, 1, 1], [], []>} : vector<256x36xbf16>, vector<36x128xbf16>, vector<256x128xf32> -> vector<256x128xf32>
    %cst_47 = arith.constant dense<0.000000e+00> : vector<128xf32>
    %30 = vector.multi_reduction <add>, %29, %cst_47 [0] : vector<256x128xf32> to vector<128xf32>
    %31 = vector.shape_cast %30 : vector<128xf32> to vector<1x128xf32>
    %cst_48 = arith.constant 3.906250e-03 : f32
    %32 = vector.broadcast %cst_48 : f32 to vector<1x128xf32>
    %33 = arith.mulf %31, %32 : vector<1x128xf32>
    %34 = vector.broadcast %33 : vector<1x128xf32> to vector<256x128xf32>
    %35 = arith.subf %29, %34 : vector<256x128xf32>
    %36 = arith.mulf %35, %35 : vector<256x128xf32>
    %cst_49 = arith.constant dense<0.000000e+00> : vector<128xf32>
    %37 = vector.multi_reduction <add>, %36, %cst_49 [0] : vector<256x128xf32> to vector<128xf32>
    %38 = vector.shape_cast %37 : vector<128xf32> to vector<1x128xf32>
    %39 = vector.shape_cast %31 : vector<1x128xf32> to vector<1x1x128xf32>
    %c0_50 = arith.constant 0 : index
    %c0_51 = arith.constant 0 : index
    %c0_52 = arith.constant 0 : index
    %40 = vector.load %arg4[%c0_50, %c0_51, %c0_52] : memref<1x8x128xf32, #tpu.memory_space<vmem>>, vector<1x1x128xf32>
    tpu.vector_store %arg4[%c0_50, %c0_51, %c0_52], %39 {strides = array<i32>} : memref<1x8x128xf32, #tpu.memory_space<vmem>>, vector<1x1x128xf32>,
    %41 = vector.shape_cast %38 : vector<1x128xf32> to vector<1x1x128xf32>
    %c0_53 = arith.constant 0 : index
    %c1_54 = arith.constant 1 : index
    %c0_55 = arith.constant 0 : index
    %42 = vector.load %arg4[%c0_53, %c1_54, %c0_55] : memref<1x8x128xf32, #tpu.memory_space<vmem>>, vector<1x1x128xf32>
    tpu.vector_store %arg4[%c0_53, %c1_54, %c0_55], %41 {strides = array<i32>} : memref<1x8x128xf32, #tpu.memory_space<vmem>>, vector<1x1x128xf32>,
    %43 = arith.truncf %29 : vector<256x128xf32> to vector<256x128xbf16>
    %c0_56 = arith.constant 0 : index
    %c0_57 = arith.constant 0 : index
    %44 = vector.load %arg3[%c0_56, %c0_57] : memref<256x128xbf16, #tpu.memory_space<vmem>>, vector<256x128xbf16>
    tpu.vector_store %arg3[%c0_56, %c0_57], %43 {strides = array<i32>} : memref<256x128xbf16, #tpu.memory_space<vmem>>, vector<256x128xbf16>,
    return
  }
  func.func @transform_0(%arg0: i32) -> (i32, i32, i32, i32) {
    %c0_i32 = arith.constant 0 : i32
    %c0_i32_0 = arith.constant 0 : i32
    %c0_i32_1 = arith.constant 0 : i32
    %c0_i32_2 = arith.constant 0 : i32
    return %arg0, %c0_i32, %c0_i32_0, %c0_i32_1 : i32, i32, i32, i32
  }
  func.func @transform_1(%arg0: i32) -> (i32, i32) {
    %c0_i32 = arith.constant 0 : i32
    %c0_i32_0 = arith.constant 0 : i32
    %c0_i32_1 = arith.constant 0 : i32
    return %c0_i32, %c0_i32_0 : i32, i32
  }
  func.func @transform_2(%arg0: i32) -> (i32, i32) {
    %c0_i32 = arith.constant 0 : i32
    %c0_i32_0 = arith.constant 0 : i32
    return %arg0, %c0_i32 : i32, i32
  }
  func.func @transform_3(%arg0: i32) -> (i32, i32, i32) {
    %c0_i32 = arith.constant 0 : i32
    %c0_i32_0 = arith.constant 0 : i32
    %c0_i32_1 = arith.constant 0 : i32
    return %arg0, %c0_i32, %c0_i32_0 : i32, i32, i32
  }
}

</mosaic_0001>

<bundles_post_ra>
// kernel: tpu_custom_call.1
= control target key start
LH: loop header
LB: loop body
LE: loop exit
PB: predicated region body
PF: predicated region fallthrough
CT: control target
= control target key end

     0   :  { %9 = vsyncpa [#allocation4], 0  ;;  %s6296_s0 = inlined_call_operand.vmem [shape: bf16[2,18,18,4], index: 0, kind: input, shape index: {}]   ;;  %s6297_s1 = inlined_call_operand.vmem [shape: bf16[36,128], index: 1, kind: input, shape index: {}]   ;;  %s6298_s2 = inlined_call_operand.hbm [shape: bf16[512,128], index: 2, kind: output, shape index: {0}]   ;;  %s6299_s3 = inlined_call_operand.hbm [shape: f32[2,8,128], index: 3, kind: output, shape index: {1}]  }
   0x1   :  { %11 = vsyncpa [#allocation4 + $0x1], 0 }
   0x2   :  { %12 = vsyncpa [#allocation6], 0 }
   0x3   :  { %14 = vsyncpa [#allocation6 + $0x1], 0  ;;  %s4902_s12 = smov 0   ;;  %s4904_s13 = smov 0  }
   0x4   :  { %s4906_s14 = smov 0   ;;  %s4908_s15 = smov 0  }
   0x5 LB: > { %s4923_s16 = sadd.s32 4294967295, %s4869_s15   ;;  %s3964_s17 = sadd.s32 4294967294, %s4869_s15   ;;  %s4869_s15 = sphi %s4908_s15, %s6309_s15   ;;  %s4865_s14 = sphi %s4906_s14, %s6308_s14   ;;  %s4861_s13 = sphi %s4904_s13, %s6307_s13   ;;  %s4857_s12 = sphi %s4902_s12, %s6306_s12  }
   0x6   : > { %s4927_s18 = sadd.s32 1, %s4869_s15   ;;  %s74_s19 = sadd.s32 1, %s4865_s14 }
   0x7   : > { %s71_s20 = ssub.s32 %s4869_s15, %s4927_s18  ;;  %p84_p0 = scmp.ne.s32.totalorder %s4865_s14, %s4861_s13 }
   0x8   : > { %p72_p1 = scmp.eq.s32.totalorder %s71_s20, 0  ;;  %p85_p2 = scmp.eq.s32.totalorder %s4923_s16, 1 }
   0x9   : > { %p90_p3 = scmp.ne.s32.totalorder %s4861_s13, %s4857_s12  ;;  %p91_p4 = scmp.eq.s32.totalorder %s3964_s17, 1 }
   0xa   : > { %s4938_s21 = scalar_select %p72_p1, %s4865_s14, %s74_s19  }
   0xb   : > { %p4940_p5 = por %p85_p2, %p84_p0  ;;  %p4944_p6 = por %p91_p4, %p90_p3 }
   0xc   : > { %p3967_p7 = scmp.ge.s32.totalorder %s4869_s15, 1  ;;  %p146_p8 = scmp.lt.s32.totalorder %s4869_s15, 3 }
   0xe   : > { %p147_p9 = pnand %p3967_p7, %p146_p8 }
   0xf   : > { %p175_p10 = scmp.lt.s32.totalorder (!%p147_p9), %s4923_s16, 1  ;;  %vm971_vm0 = vcmask (!%p147_p9), 1042432   ;;  %vm972_vm1 = vcmask (!%p147_p9), 1046532   ;;  %s4871_s29 = smov (!%p147_p9), 12   ;;  %vm375_vm3 = vsmask.f32 (!%p147_p9), 3328 }
  0x10   : > { %150 = sbr.rel (%p147_p9) target bundleno = 793 (0x319), region = 28  ;;  %vm4957_vm2 = vmor (!%p147_p9), %vm971_vm0, %vm972_vm1  ;;  %vm376_vm4 = vsmask.f32 (!%p147_p9), 7440  ;;  %s4872_s30 = smov (!%p147_p9), 20   ;;  %vm310_vm6 = vcmask (!%p147_p9), 31744   ;;  %vm858_vm7 = vcmask (!%p147_p9), 64544  }
  0x11   : > { %s4873_s4 = smov (!%p147_p9), 8   ;;  %vm4998_vm5 = vmor (!%p147_p9), %vm375_vm3, %vm376_vm4  ;;  %s4874_s5 = smov (!%p147_p9), 4   ;;  %vm1182_vm8 = vcmask (!%p147_p9), 97344   ;;  %vm1360_vm9 = vcmask (!%p147_p9), 130144   ;;  %vm1905_vm10 = vcmask (!%p147_p9), 162944   ;;  %vm2226_vm11 = vcmask (!%p147_p9), 195744  }
  0x12   : > { %s4875_s6 = smov (!%p147_p9), 16   ;;  %s4876_s7 = smov (!%p147_p9), 24   ;;  %vm2404_vm12 = vcmask (!%p147_p9), 228544   ;;  %vm2949_vm13 = vcmask (!%p147_p9), 261344   ;;  %vm3270_vm14 = vcmask (!%p147_p9), 294144   ;;  %vm3372_vm15 = vcmask (!%p147_p9), 1041408  }
  0x13   : > { %s4877_s8 = smov (!%p147_p9), 28   ;;  %s4878_s9 = smov (!%p147_p9), 32   ;;  %vm3323_vm0 = vcmask (!%p147_p9), 293888  }
  0x17   : > { %s176_s24 = scalar_select %p175_p10, %s4923_s16, 1 }
  0x19   : > { %s4670_s25 = smul.u32 216, %s176_s24 }
  0x1b   : > { %s4955_s28 = scalar_lea.vmem %s6296_s0, %s4670_s25  ;;  %s6010_s25 = sand.u32 1, %s4861_s13  }
  0x1c   : > { %v4724_v1 = vld [vmem:[%s4955_s28 + $0x18] sm:$0xff]   ;;  %v4725_v2 = vld [vmem:[%s4955_s28 + $0xc] sm:$0xff]   ;;  %v4149_v5 = vld [vmem:[%s4955_s28 + $0x14] sm:$0x1]  ;;  %s3968_s26 = sshll.u32 %s6010_s25, 7 }
  0x1d   : > { %1314 = vrot.lane.b32.xlu1 %v4724_v1, %s4871_s29  ;;  %v4147_v3 = vld [vmem:[%s4955_s28 + $0xc] sm:$0xe]  ;;  %v4148_v4 = vld [vmem:[%s4955_s28 + $0x10] sm:$0xf]  ;;  %1312 = vrot.lane.b32.xlu0 %v4725_v2, %s4871_s29  ;;  %v2023_v8 = vrot.slane %v4149_v5, 5  ;;  %s6032_s27 = scalar_lea.vmem [#allocation3], %s3968_s26 }
  0x1e   : > { %v4195_v6 = vrot.slane %v4147_v3, 9  ;;  %v2020_v7 = vrot.slane %v4148_v4, 5  ;;  %v875_v9 = vld [vmem:[%s4955_s28] sm:$0xe]  ;;  %v876_v10 = vld [vmem:[%s4955_s28 + $0x4] sm:$0xf] }
  0x1f   : > { %v877_v11 = vld [vmem:[%s4955_s28 + $0x8] sm:$0x1]  ;;  %v4003_v12 = vrot.slane %v875_v9, 9  ;;  %v976_v15 = vrot.slane %v876_v10, 5  ;;  %v878_v17 = vld [vmem:[%s4955_s28 + $0xc] sm:$0xe] }
  0x20   : > { %v2021_v13 = vsel %vm4957_vm2, %v4195_v6, %v2020_v7  ;;  %v2022_v14 = vrot.slane %v2020_v7, 4  ;;  %v979_v16 = vrot.slane %v877_v11, 5  ;;  %v879_v18 = vld [vmem:[%s4955_s28 + $0x10] sm:$0xf]  ;;  %v880_v19 = vld [vmem:[%s4955_s28 + $0x14] sm:$0x1] }
  0x21   : > { %v4004_v20 = vrot.slane %v878_v17, 9  ;;  %v977_v22 = vsel %vm4957_vm2, %v4003_v12, %v976_v15  ;;  %v978_v23 = vrot.slane %v976_v15, 4  ;;  %v983_v24 = vrot.slane %v879_v18, 5  ;;  %v327_v25 = vld [vmem:[%s4955_s28] sm:$0xf] }
  0x22   : > { %v2024_v21 = vsel %vm4957_vm2, %v2022_v14, %v2023_v8  ;;  %v328_v26 = vld [vmem:[%s4955_s28 + $0x4] sm:$0xf]  ;;  %v986_v28 = vrot.slane %v880_v19, 5  ;;  %v329_v29 = vld [vmem:[%s4955_s28 + $0x8] sm:$0x1]  ;;  %v379_v30 = vshrl.u32 %v327_v25, 16 }
  0x23   : > { %v4211_v27 = vcombine.low %v2021_v13, %v2024_v21  ;;  %v382_v31 = vshll.u32 %v327_v25, 16  ;;  %v980_v32 = vsel %vm4957_vm2, %v978_v23, %v979_v16  ;;  %v984_v33 = vsel %vm4957_vm2, %v4004_v20, %v983_v24  ;;  %v4150_v36 = vld [vmem:[%s4955_s28 + $0x18] sm:$0xe]  ;;  %v4151_v37 = vld [vmem:[%s4955_s28 + $0x1c] sm:$0xf] }
  0x24   : > { %v985_v34 = vrot.slane %v983_v24, 4  ;;  %v388_v35 = vshll.u32 %v328_v26, 16  ;;  %v4019_v38 = vcombine.low %v977_v22, %v980_v32  ;;  %v381_v39 = vrot.slane %v379_v30, 4  ;;  %v4152_v42 = vld [vmem:[%s4955_s28 + $0x20] sm:$0x1] }
  0x25   : > { %2178 = vrot.lane.b32.xlu0 %v4211_v27, %s4872_s30  ;;  %v384_v40 = vrot.slane %v382_v31, 5  ;;  %v392_v41 = vshrl.u32 %v328_v26, 16  ;;  %v398_v45 = vshll.u32 %v329_v29, 16  ;;  %v4196_v46 = vrot.slane %v4150_v36, 9  ;;  %v330_v47 = vld [vmem:[%s4955_s28 + $0xc] sm:$0xf] }
  0x26   : > { %v987_v43 = vsel %vm4957_vm2, %v985_v34, %v986_v28  ;;  %v390_v44 = vrot.slane %v388_v35, 5  ;;  %1134 = vrot.lane.b32.xlu1 %v4019_v38, %s4873_s4  ;;  %v2027_v51 = vrot.slane %v4151_v37, 5  ;;  %v331_v52 = vld [vmem:[%s4955_s28 + $0x10] sm:$0xf]  ;;  %v2030_v55 = vrot.slane %v4152_v42, 5 }
  0x27   : > { %v4020_v48 = vcombine.low %v984_v33, %v987_v43  ;;  %v385_v49 = vor.u32 %v384_v40, %v381_v39  ;;  %v394_v50 = vrot.slane %v392_v41, 4  ;;  %v400_v54 = vrot.slane %v398_v45, 5  ;;  %v332_v56 = vld [vmem:[%s4955_s28 + $0x14] sm:$0x1]  ;;  %v4086_v63 = vld [vmem:[%s4955_s28 + $0x18] sm:$0xf] }
  0x28   : > { %v403_v57 = vshrl.u32 %v330_v47, 16  ;;  %v406_v58 = vshll.u32 %v330_v47, 16  ;;  %v2028_v61 = vsel %vm4957_vm2, %v4196_v46, %v2027_v51  ;;  %v2029_v62 = vrot.slane %v2027_v51, 4  ;;  %v4087_v5 = vld [vmem:[%s4955_s28 + $0x1c] sm:$0xf] }
  0x29   : > { %v386_v59 = vrot.slane %v385_v49, 4  ;;  %v395_v60 = vor.u32 %v394_v50, %v390_v44  ;;  %v412_v3 = vshll.u32 %v331_v52, 16  ;;  %v416_v4 = vshrl.u32 %v331_v52, 16  ;;  %v4088_v10 = vld [vmem:[%s4955_s28 + $0x20] sm:$0x1] }
  0x2a   : > { %v405_v1 = vrot.slane %v403_v57, 4  ;;  %v408_v2 = vrot.slane %v406_v58, 5  ;;  %1136 = vrot.lane.b32.xlu1 %v4020_v48, %s4873_s4  ;;  %v2031_v8 = vsel %vm4957_vm2, %v2029_v62, %v2030_v55  ;;  %v422_v9 = vshll.u32 %v332_v56, 16  ;;  %v4083_v11 = vld [vmem:[%s4955_s28 + $0xc] sm:$0xf] }
  0x2b   : > { %v391_v6 = vsel %vm4998_vm5, %v386_v59, %v390_v44  ;;  %v396_v7 = vrot.slane %v395_v60, 4  ;;  %v4212_v12 = vcombine.low %v2028_v61, %v2031_v8  ;;  %v414_v14 = vrot.slane %v412_v3, 5  ;;  %v4084_v28 = vld [vmem:[%s4955_s28 + $0x10] sm:$0xf]  ;;  %v4085_v32 = vld [vmem:[%s4955_s28 + $0x14] sm:$0x1] }
  0x2c   : > { %v409_v13 = vor.u32 %v408_v2, %v405_v1  ;;  %v418_v15 = vrot.slane %v416_v4, 4  ;;  %v424_v17 = vrot.slane %v422_v9, 5  ;;  %v1450_v18 = vshrl.u32 %v4086_v63, 16  ;;  %v4275_v38 = vld [vmem:[%s4955_s28 + $0x18] sm:$0xf] }
  0x2d   : > { %v401_v16 = vsel %vm4998_vm5, %v396_v7, %v400_v54  ;;  %v1453_v19 = vshll.u32 %v4086_v63, 16  ;;  %v1459_v23 = vshll.u32 %v4087_v5, 16  ;;  %v1463_v26 = vshrl.u32 %v4087_v5, 16  ;;  %v4276_v47 = vld [vmem:[%s4955_s28 + $0x1c] sm:$0xf] }
  0x2e   : > { %v3987_v20 = vcombine.low %v391_v6, %v401_v16  ;;  %v410_v21 = vrot.slane %v409_v13, 4  ;;  %v419_v22 = vor.u32 %v418_v15, %v414_v14  ;;  %2180 = vrot.lane.b32.xlu1 %v4212_v12, %s4872_s30  ;;  %v1452_v24 = vrot.slane %v1450_v18, 4  ;;  %v4277_v56 = vld [vmem:[%s4955_s28 + $0x20] sm:$0x1]  ;;  %v4278_v62 = vld [vmem:[%s4955_s28 + $0x24] sm:$0xf] }
  0x2f   : > { %v1455_v25 = vrot.slane %v1453_v19, 5  ;;  %v1469_v27 = vshll.u32 %v4088_v10, 16  ;;  %v1461_v31 = vrot.slane %v1459_v23, 5  ;;  %v1426_v33 = vshrl.u32 %v4083_v11, 16  ;;  %v4279_v4 = vld [vmem:[%s4955_s28 + $0x28] sm:$0xf] }
  0x30   : > { %810 = vrot.lane.b32.xlu0 %v3987_v20, %s4874_s5  ;;  %v415_v29 = vsel %vm4998_vm5, %v410_v21, %v414_v14  ;;  %v420_v30 = vrot.slane %v419_v22, 4  ;;  %v1465_v35 = vrot.slane %v1463_v26, 4  ;;  %v1429_v37 = vshll.u32 %v4083_v11, 16  ;;  %v4280_v12 = vld [vmem:[%s4955_s28 + $0x2c] sm:$0x1]  ;;  %v4727_v16 = vld [vmem:[%s4955_s28 + $0x24] sm:$0xff]  }
  0x31   : > { %v1456_v34 = vor.u32 %v1455_v25, %v1452_v24  ;;  %v1471_v36 = vrot.slane %v1469_v27, 5  ;;  %v1428_v40 = vrot.slane %v1426_v33, 4  ;;  %v1435_v41 = vshll.u32 %v4084_v28, 16  ;;  %v4339_v14 = vld [vmem:[%s4955_s28 + $0x18] sm:$0xe] }
  0x32   : > { %v425_v39 = vsel %vm4998_vm5, %v420_v30, %v424_v17  ;;  %v1439_v42 = vshrl.u32 %v4084_v28, 16  ;;  %v1466_v45 = vor.u32 %v1465_v35, %v1461_v31  ;;  %v1431_v46 = vrot.slane %v1429_v37, 5  ;;  %v4340_v20 = vld [vmem:[%s4955_s28 + $0x1c] sm:$0xf]  ;;  %v4341_v25 = vld [vmem:[%s4955_s28 + $0x20] sm:$0x1] }
  0x33   : > { %v3988_v43 = vcombine.low %v415_v29, %v425_v39  ;;  %v1457_v44 = vrot.slane %v1456_v34, 4  ;;  %v1437_v48 = vrot.slane %v1435_v41, 5  ;;  %v1445_v50 = vshll.u32 %v4085_v32, 16  ;;  %v333_v30 = vld [vmem:[%s4955_s28 + $0x18] sm:$0xf] }
  0x34   : > { %v1441_v49 = vrot.slane %v1439_v42, 4  ;;  %v2470_v51 = vshrl.u32 %v4275_v38, 16  ;;  %v1467_v54 = vrot.slane %v1466_v45, 4  ;;  %v1432_v55 = vor.u32 %v1431_v46, %v1428_v40  ;;  %v335_v41 = vld [vmem:[%s4955_s28 + $0x20] sm:$0x1] }
  0x35   : > { %812 = vrot.lane.b32.xlu0 %v3988_v43, %s4874_s5  ;;  %v1462_v52 = vsel %vm4998_vm5, %v1457_v44, %v1461_v31  ;;  %v2473_v57 = vshll.u32 %v4275_v38, 16  ;;  %v1447_v59 = vrot.slane %v1445_v50, 5  ;;  %v2479_v61 = vshll.u32 %v4276_v47, 16  ;;  %v4726_v31 = vld [vmem:[%s4955_s28 + $0x18] sm:$0xff]   ;;  %v4342_v42 = vld [vmem:[%s4955_s28 + $0x24] sm:$0xe] }
  0x36   : > { %v1442_v58 = vor.u32 %v1441_v49, %v1437_v48  ;;  %v2472_v60 = vrot.slane %v2470_v51, 4  ;;  %v1472_v63 = vsel %vm4998_vm5, %v1467_v54, %v1471_v36  ;;  %v1433_v1 = vrot.slane %v1432_v55, 4  ;;  %v334_v36 = vld [vmem:[%s4955_s28 + $0x1c] sm:$0xf]  ;;  %v336_v54 = vld [vmem:[%s4955_s28 + $0x24] sm:$0xf] }
  0x37   : > { %v2475_v2 = vrot.slane %v2473_v57, 5  ;;  %v2483_v3 = vshrl.u32 %v4276_v47, 16  ;;  %v4132_v5 = vcombine.low %v1462_v52, %v1472_v63  ;;  %v2481_v7 = vrot.slane %v2479_v61, 5  ;;  %v4343_v47 = vld [vmem:[%s4955_s28 + $0x28] sm:$0xf] }
  0x38   : > { %v1443_v6 = vrot.slane %v1442_v58, 4  ;;  %v2489_v8 = vshll.u32 %v4277_v56, 16  ;;  %v1438_v9 = vsel %vm4998_vm5, %v1433_v1, %v1437_v48  ;;  %v2494_v13 = vshrl.u32 %v4278_v62, 16  ;;  %v4344_v48 = vld [vmem:[%s4955_s28 + $0x2c] sm:$0x1] }
  0x39   : > { %v2476_v10 = vor.u32 %v2475_v2, %v2472_v60  ;;  %v2485_v11 = vrot.slane %v2483_v3, 4  ;;  %1859 = vrot.lane.b32.xlu1 %v4132_v5, %s4875_s6  ;;  %v2497_v18 = vshll.u32 %v4278_v62, 16  ;;  %v2503_v19 = vshll.u32 %v4279_v4, 16 }
  0x3a   : > { %v1448_v15 = vsel %vm4998_vm5, %v1443_v6, %v1447_v59  ;;  %v2491_v17 = vrot.slane %v2489_v8, 5  ;;  %v2496_v24 = vrot.slane %v2494_v13, 4  ;;  %v2507_v28 = vshrl.u32 %v4279_v4, 16  ;;  %v337_v8 = vld [vmem:[%s4955_s28 + $0x28] sm:$0xf] }
  0x3b   : > { %v4131_v21 = vcombine.low %v1438_v9, %v1448_v15  ;;  %v2477_v22 = vrot.slane %v2476_v10, 4  ;;  %v2486_v23 = vor.u32 %v2485_v11, %v2481_v7  ;;  %v2499_v26 = vrot.slane %v2497_v18, 5 }
  0x3c   : > { %v2505_v27 = vrot.slane %v2503_v19, 5  ;;  %v2513_v29 = vshll.u32 %v4280_v12, 16  ;;  %v4387_v34 = vrot.slane %v4339_v14, 9  ;;  %v3064_v35 = vrot.slane %v4340_v20, 5  ;;  %v338_v12 = vld [vmem:[%s4955_s28 + $0x2c] sm:$0x1] }
  0x3d   : > { %1857 = vrot.lane.b32.xlu0 %v4131_v21, %s4875_s6  ;;  %v2482_v32 = vsel %vm4998_vm5, %v2477_v22, %v2481_v7  ;;  %v2487_v33 = vrot.slane %v2486_v23, 4  ;;  %2358 = vrot.lane.b32.xlu1 %v4727_v16, %s4876_s7  ;;  %v2500_v37 = vor.u32 %v2499_v26, %v2496_v24  ;;  %v2509_v38 = vrot.slane %v2507_v28, 4  ;;  %v881_v14 = vld [vmem:[%s4955_s28 + $0x18] sm:$0xe]  ;;  %v882_v19 = vld [vmem:[%s4955_s28 + $0x1c] sm:$0xf] }
  0x3e   : > { %v2515_v39 = vrot.slane %v2513_v29, 5  ;;  %v3067_v40 = vrot.slane %v4341_v25, 5  ;;  %v3065_v44 = vsel %vm4957_vm2, %v4387_v34, %v3064_v35  ;;  %v3066_v45 = vrot.slane %v3064_v35, 4  ;;  %v883_v24 = vld [vmem:[%s4955_s28 + $0x20] sm:$0x1] }
  0x3f   : > { %v2492_v43 = vsel %vm4998_vm5, %v2487_v33, %v2491_v17  ;;  %v427_v46 = vshrl.u32 %v333_v30, 16  ;;  %v2501_v50 = vrot.slane %v2500_v37, 4  ;;  %v2510_v51 = vor.u32 %v2509_v38, %v2505_v27  ;;  %v884_v29 = vld [vmem:[%s4955_s28 + $0x24] sm:$0xe]  ;;  %v886_v35 = vld [vmem:[%s4955_s28 + $0x2c] sm:$0x1] }
  0x40   : > { %v4323_v49 = vcombine.low %v2482_v32, %v2492_v43  ;;  %v430_v52 = vshll.u32 %v333_v30, 16  ;;  %v3068_v55 = vsel %vm4957_vm2, %v3066_v45, %v3067_v40  ;;  %v436_v57 = vshll.u32 %v334_v36, 16  ;;  %v885_v30 = vld [vmem:[%s4955_s28 + $0x28] sm:$0xf] }
  0x41   : > { %2356 = vrot.lane.b32.xlu0 %v4726_v31, %s4876_s7  ;;  %v429_v56 = vrot.slane %v427_v46, 4  ;;  %v440_v58 = vshrl.u32 %v334_v36, 16  ;;  %v2506_v59 = vsel %vm4998_vm5, %v2501_v50, %v2505_v27  ;;  %v2511_v60 = vrot.slane %v2510_v51, 4  ;;  %v4089_v36 = vld [vmem:[%s4955_s28 + $0x24] sm:$0xf] }
  0x42   : > { %v4403_v61 = vcombine.low %v3065_v44, %v3068_v55  ;;  %v432_v62 = vrot.slane %v430_v52, 5  ;;  %v438_v63 = vrot.slane %v436_v57, 5  ;;  %v446_v2 = vshll.u32 %v335_v41, 16  ;;  %v4090_v41 = vld [vmem:[%s4955_s28 + $0x28] sm:$0xf]  ;;  %v4744_v55 = vld [vmem:[%s6297_s1] sm:$0xff]  }
  0x43   : > { %v442_v1 = vrot.slane %v440_v58, 4  ;;  %v4388_v3 = vrot.slane %v4342_v42, 9  ;;  %v2516_v4 = vsel %vm4998_vm5, %v2511_v60, %v2515_v39  ;;  %v3071_v6 = vrot.slane %v4343_v47, 5  ;;  %4624 = vmatprep.subr.bf16.mxu0 %v4744_v55  ;;  %4662 = vmatprep.subr.bf16.mxu1 %v4744_v55 }
  0x44   : > { %v433_v5 = vor.u32 %v432_v62, %v429_v56  ;;  %v3074_v7 = vrot.slane %v4344_v48, 5  ;;  %v4324_v9 = vcombine.low %v2506_v59, %v2516_v4  ;;  %v448_v11 = vrot.slane %v446_v2, 5  ;;  %v4091_v59 = vld [vmem:[%s4955_s28 + $0x2c] sm:$0x1]  ;;  %v4092_v2 = vld [vmem:[%s4955_s28 + $0x30] sm:$0xf]  ;;  %4625 = vmatpush3.bf16.msra.mxu0 %v4744_v55  ;;  %4665 = vmatpush3.bf16.msra.mxu1 %v4744_v55 }
  0x45   : > { %2901 = vrot.lane.b32.xlu0 %v4323_v49, %s4877_s8  ;;  %v443_v10 = vor.u32 %v442_v1, %v438_v63  ;;  %v451_v13 = vshrl.u32 %v336_v54, 16  ;;  %v3072_v16 = vsel %vm4957_vm2, %v4388_v3, %v3071_v6  ;;  %v3073_v17 = vrot.slane %v3071_v6, 4  ;;  %v4093_v3 = vld [vmem:[%s4955_s28 + $0x34] sm:$0xf] }
  0x46   : > { %v434_v15 = vrot.slane %v433_v5, 4  ;;  %v454_v18 = vshll.u32 %v336_v54, 16  ;;  %2903 = vrot.lane.b32.xlu1 %v4324_v9, %s4877_s8  ;;  %v460_v22 = vshll.u32 %v337_v8, 16  ;;  %v464_v23 = vshrl.u32 %v337_v8, 16  ;;  %v4094_v9 = vld [vmem:[%s4955_s28 + $0x38] sm:$0x1] }
  0x47   : > { %v444_v20 = vrot.slane %v443_v10, 4  ;;  %v453_v21 = vrot.slane %v451_v13, 4  ;;  %v3075_v26 = vsel %vm4957_vm2, %v3073_v17, %v3074_v7  ;;  %v470_v28 = vshll.u32 %v338_v12, 16  ;;  %v4728_v7 = vld [vmem:[%s4955_s28 + $0x24] sm:$0xff]  }
  0x48   : > { %v439_v25 = vsel %vm4998_vm5, %v434_v15, %v438_v63  ;;  %v456_v27 = vrot.slane %v454_v18, 5  ;;  %v4404_v32 = vcombine.low %v3072_v16, %v3075_v26  ;;  %v462_v33 = vrot.slane %v460_v22, 5  ;;  %v4153_v10 = vld [vmem:[%s4955_s28 + $0x24] sm:$0xe]  ;;  %v4154_v15 = vld [vmem:[%s4955_s28 + $0x28] sm:$0xf] }
  0x49   : > { %3222 = vrot.lane.b32.xlu0 %v4403_v61, %s4878_s9  ;;  %v449_v31 = vsel %vm4998_vm5, %v444_v20, %v448_v11  ;;  %v466_v34 = vrot.slane %v464_v23, 4  ;;  %v472_v39 = vrot.slane %v470_v28, 5  ;;  %v4005_v40 = vrot.slane %v881_v14, 9  ;;  %v4155_v16 = vld [vmem:[%s4955_s28 + $0x2c] sm:$0x1] }
  0x4a   : > { %v3989_v37 = vcombine.low %v439_v25, %v449_v31  ;;  %v457_v38 = vor.u32 %v456_v27, %v453_v21  ;;  %v990_v43 = vrot.slane %v882_v19, 5  ;;  %v993_v44 = vrot.slane %v883_v24, 5  ;;  %v4156_v21 = vld [vmem:[%s4955_s28 + $0x30] sm:$0xe]  ;;  %v4157_v26 = vld [vmem:[%s4955_s28 + $0x34] sm:$0xf] }
  0x4b   : > { %v467_v42 = vor.u32 %v466_v34, %v462_v33  ;;  %v4006_v45 = vrot.slane %v884_v29, 9  ;;  %v997_v47 = vrot.slane %v885_v30, 5  ;;  %v1000_v48 = vrot.slane %v886_v35, 5  ;;  %v4158_v31 = vld [vmem:[%s4955_s28 + $0x38] sm:$0x1] }
  0x4c   : > { %814 = vrot.lane.b32.xlu1 %v3989_v37, %s4874_s5  ;;  %v458_v46 = vrot.slane %v457_v38, 4  ;;  %v1474_v49 = vshrl.u32 %v4089_v36, 16  ;;  %v991_v51 = vsel %vm4957_vm2, %v4005_v40, %v990_v43  ;;  %v992_v52 = vrot.slane %v990_v43, 4  ;;  %v4729_v37 = vld [vmem:[%s4955_s28 + $0x30] sm:$0xff]  }
  0x4d   : > { %3224 = vrot.lane.b32.xlu0 %v4404_v32, %s4878_s9  ;;  %v468_v50 = vrot.slane %v467_v42, 4  ;;  %v1477_v54 = vshll.u32 %v4089_v36, 16  ;;  %v998_v57 = vsel %vm4957_vm2, %v4006_v45, %v997_v47  ;;  %v999_v58 = vrot.slane %v997_v47, 4  ;;  %v4746_v32 = vld [vmem:[%s6297_s1 + $0x8] sm:$0xff]  }
  0x4e   : > { %v463_v56 = vsel %vm4998_vm5, %v458_v46, %v462_v33  ;;  %v1476_v60 = vrot.slane %v1474_v49, 4  ;;  %v994_v62 = vsel %vm4957_vm2, %v992_v52, %v993_v44  ;;  %v1483_v1 = vshll.u32 %v4090_v41, 16  ;;  %v4281_v46 = vld [vmem:[%s4955_s28 + $0x30] sm:$0xf]  ;;  %4626 = vmatprep.subr.bf16.mxu0 %v4746_v32  ;;  %4663 = vmatprep.subr.bf16.mxu1 %v4746_v32 }
  0x4f   : > { %v473_v61 = vsel %vm4998_vm5, %v468_v50, %v472_v39  ;;  %v1479_v63 = vrot.slane %v1477_v54, 5  ;;  %v4021_v5 = vcombine.low %v991_v51, %v994_v62  ;;  %v1001_v6 = vsel %vm4957_vm2, %v999_v58, %v1000_v48  ;;  %v4282_v51 = vld [vmem:[%s4955_s28 + $0x34] sm:$0xf]  ;;  %4627 = vmatpush3.bf16.msra.mxu0 %v4746_v32  ;;  %4666 = vmatpush3.bf16.msra.mxu1 %v4746_v32  ;;  %v4284_v62 = vld [vmem:[%s4955_s28 + $0x3c] sm:$0xf] }
  0x50   : > { %v3990_v4 = vcombine.low %v463_v56, %v473_v61  ;;  %v1487_v8 = vshrl.u32 %v4090_v41, 16  ;;  %v4022_v11 = vcombine.low %v998_v57, %v1001_v6  ;;  %v1485_v13 = vrot.slane %v1483_v1, 5 }
  0x51   : > { %v1480_v12 = vor.u32 %v1479_v63, %v1476_v60  ;;  %v1493_v14 = vshll.u32 %v4091_v59, 16  ;;  %1138 = vrot.lane.b32.xlu0 %v4021_v5, %s4873_s4  ;;  %v1498_v18 = vshrl.u32 %v4092_v2, 16  ;;  %v1501_v19 = vshll.u32 %v4092_v2, 16  ;;  %v4283_v59 = vld [vmem:[%s4955_s28 + $0x38] sm:$0x1] }
  0x52   : > { %816 = vrot.lane.b32.xlu1 %v3990_v4, %s4874_s5  ;;  %v1489_v17 = vrot.slane %v1487_v8, 4  ;;  %v1507_v20 = vshll.u32 %v4093_v3, 16  ;;  %v1511_v24 = vshrl.u32 %v4093_v3, 16  ;;  %v1517_v25 = vshll.u32 %v4094_v9, 16  ;;  %v4285_v4 = vld [vmem:[%s4955_s28 + $0x40] sm:$0xf] }
  0x53   : > { %v1481_v22 = vrot.slane %v1480_v12, 4  ;;  %v1495_v23 = vrot.slane %v1493_v14, 5  ;;  %v1500_v28 = vrot.slane %v1498_v18, 4  ;;  %v1503_v29 = vrot.slane %v1501_v19, 5  ;;  %v4286_v5 = vld [vmem:[%s4955_s28 + $0x44] sm:$0x1] }
  0x54   : > { %v1490_v27 = vor.u32 %v1489_v17, %v1485_v13  ;;  %v1509_v30 = vrot.slane %v1507_v20, 5  ;;  %v1513_v34 = vrot.slane %v1511_v24, 4  ;;  %v1519_v35 = vrot.slane %v1517_v25, 5  ;;  %v4730_v17 = vld [vmem:[%s4955_s28 + $0x30] sm:$0xff]  }
  0x55   : > { %v1486_v33 = vsel %vm4998_vm5, %v1481_v22, %v1485_v13  ;;  %v4197_v36 = vrot.slane %v4153_v10, 9  ;;  %1316 = vrot.lane.b32.xlu0 %v4728_v7, %s4871_s29  ;;  %v1504_v39 = vor.u32 %v1503_v29, %v1500_v28  ;;  %v2034_v40 = vrot.slane %v4154_v15, 5  ;;  %v4345_v10 = vld [vmem:[%s4955_s28 + $0x30] sm:$0xe] }
  0x56   : > { %1140 = vrot.lane.b32.xlu1 %v4022_v11, %s4873_s4  ;;  %v1491_v38 = vrot.slane %v1490_v27, 4  ;;  %v2037_v41 = vrot.slane %v4155_v16, 5  ;;  %v1514_v42 = vor.u32 %v1513_v34, %v1509_v30  ;;  %v4198_v43 = vrot.slane %v4156_v21, 9  ;;  %v4346_v11 = vld [vmem:[%s4955_s28 + $0x34] sm:$0xf] }
  0x57   : > { %v2041_v44 = vrot.slane %v4157_v26, 5  ;;  %v2044_v45 = vrot.slane %v4158_v31, 5  ;;  %v1505_v48 = vrot.slane %v1504_v39, 4  ;;  %v2035_v49 = vsel %vm4957_vm2, %v4197_v36, %v2034_v40  ;;  %v4347_v16 = vld [vmem:[%s4955_s28 + $0x38] sm:$0x1]  ;;  %v4731_v36 = vld [vmem:[%s4955_s28 + $0x3c] sm:$0xff]  }
  0x58   : > { %v1496_v47 = vsel %vm4998_vm5, %v1491_v38, %v1495_v23  ;;  %v2036_v50 = vrot.slane %v2034_v40, 4  ;;  %v1515_v54 = vrot.slane %v1514_v42, 4  ;;  %v2518_v60 = vshrl.u32 %v4281_v46, 16  ;;  %v339_v22 = vld [vmem:[%s4955_s28 + $0x30] sm:$0xf] }
  0x59   : > { %v4133_v52 = vcombine.low %v1486_v33, %v1496_v47  ;;  %v2042_v55 = vsel %vm4957_vm2, %v4198_v43, %v2041_v44  ;;  %v2043_v56 = vrot.slane %v2041_v44, 4  ;;  %v1510_v57 = vsel %vm4998_vm5, %v1505_v48, %v1509_v30  ;;  %v341_v44 = vld [vmem:[%s4955_s28 + $0x38] sm:$0x1] }
  0x5a   : > { %1318 = vrot.lane.b32.xlu1 %v4729_v37, %s4871_s29  ;;  %v2038_v58 = vsel %vm4957_vm2, %v2036_v50, %v2037_v41  ;;  %v2521_v61 = vshll.u32 %v4281_v46, 16  ;;  %v1520_v63 = vsel %vm4998_vm5, %v1515_v54, %v1519_v35  ;;  %v2527_v3 = vshll.u32 %v4282_v51, 16  ;;  %v340_v35 = vld [vmem:[%s4955_s28 + $0x34] sm:$0xf]  ;;  %v4348_v50 = vld [vmem:[%s4955_s28 + $0x3c] sm:$0xe] }
  0x5b   : > { %1861 = vrot.lane.b32.xlu0 %v4133_v52, %s4875_s6  ;;  %v4213_v1 = vcombine.low %v2035_v49, %v2038_v58  ;;  %v2045_v2 = vsel %vm4957_vm2, %v2043_v56, %v2044_v45  ;;  %v4134_v6 = vcombine.low %v1510_v57, %v1520_v63  ;;  %v2520_v8 = vrot.slane %v2518_v60, 4  ;;  %v4349_v56 = vld [vmem:[%s4955_s28 + $0x40] sm:$0xf]  ;;  %v4350_v57 = vld [vmem:[%s4955_s28 + $0x44] sm:$0x1] }
  0x5c   : > { %v4214_v7 = vcombine.low %v2042_v55, %v2045_v2  ;;  %v2523_v9 = vrot.slane %v2521_v61, 5  ;;  %v2529_v12 = vrot.slane %v2527_v3, 5  ;;  %v2531_v13 = vshrl.u32 %v4282_v51, 16 }
  0x5d   : > { %v2537_v14 = vshll.u32 %v4283_v59, 16  ;;  %v2542_v15 = vshrl.u32 %v4284_v62, 16  ;;  %v2545_v19 = vshll.u32 %v4284_v62, 16  ;;  %v2551_v20 = vshll.u32 %v4285_v4, 16  ;;  %v342_v62 = vld [vmem:[%s4955_s28 + $0x3c] sm:$0xf] }
  0x5e   : > { %1863 = vrot.lane.b32.xlu1 %v4134_v6, %s4875_s6  ;;  %v2524_v18 = vor.u32 %v2523_v9, %v2520_v8  ;;  %v2555_v21 = vshrl.u32 %v4285_v4, 16  ;;  %v2533_v23 = vrot.slane %v2531_v13, 4  ;;  %v2561_v26 = vshll.u32 %v4286_v5, 16  ;;  %v343_v4 = vld [vmem:[%s4955_s28 + $0x40] sm:$0xf] }
  0x5f   : > { %2182 = vrot.lane.b32.xlu0 %v4213_v1, %s4872_s30  ;;  %v2539_v24 = vrot.slane %v2537_v14, 5  ;;  %v2544_v25 = vrot.slane %v2542_v15, 4  ;;  %v2547_v28 = vrot.slane %v2545_v19, 5  ;;  %v2553_v29 = vrot.slane %v2551_v20, 5  ;;  %v344_v9 = vld [vmem:[%s4955_s28 + $0x44] sm:$0x1] }
  0x60   : > { %v2525_v27 = vrot.slane %v2524_v18, 4  ;;  %v2557_v30 = vrot.slane %v2555_v21, 4  ;;  %v2534_v31 = vor.u32 %v2533_v23, %v2529_v12  ;;  %v2563_v32 = vrot.slane %v2561_v26, 5  ;;  %v887_v14 = vld [vmem:[%s4955_s28 + $0x30] sm:$0xe] }
  0x61   : > { %v4389_v33 = vrot.slane %v4345_v10, 9  ;;  %v3078_v34 = vrot.slane %v4346_v11, 5  ;;  %v2548_v38 = vor.u32 %v2547_v28, %v2544_v25  ;;  %v3081_v40 = vrot.slane %v4347_v16, 5  ;;  %v888_v19 = vld [vmem:[%s4955_s28 + $0x34] sm:$0xf] }
  0x62   : > { %2184 = vrot.lane.b32.xlu1 %v4214_v7, %s4872_s30  ;;  %v2530_v37 = vsel %vm4998_vm5, %v2525_v27, %v2529_v12  ;;  %v2558_v39 = vor.u32 %v2557_v30, %v2553_v29  ;;  %v2535_v41 = vrot.slane %v2534_v31, 4  ;;  %v475_v45 = vshrl.u32 %v339_v22, 16  ;;  %v889_v20 = vld [vmem:[%s4955_s28 + $0x38] sm:$0x1] }
  0x63   : > { %2360 = vrot.lane.b32.xlu0 %v4730_v17, %s4876_s7  ;;  %v3079_v42 = vsel %vm4957_vm2, %v4389_v33, %v3078_v34  ;;  %v3080_v43 = vrot.slane %v3078_v34, 4  ;;  %v2549_v46 = vrot.slane %v2548_v38, 4  ;;  %v478_v48 = vshll.u32 %v339_v22, 16  ;;  %v891_v34 = vld [vmem:[%s4955_s28 + $0x40] sm:$0xf] }
  0x64   : > { %v2559_v47 = vrot.slane %v2558_v39, 4  ;;  %v484_v49 = vshll.u32 %v340_v35, 16  ;;  %v2540_v51 = vsel %vm4998_vm5, %v2535_v41, %v2539_v24  ;;  %v477_v54 = vrot.slane %v475_v45, 4 }
  0x65   : > { %v3082_v52 = vsel %vm4957_vm2, %v3080_v43, %v3081_v40  ;;  %v488_v55 = vshrl.u32 %v340_v35, 16  ;;  %v4325_v58 = vcombine.low %v2530_v37, %v2540_v51  ;;  %v2554_v59 = vsel %vm4998_vm5, %v2549_v46, %v2553_v29  ;;  %v890_v29 = vld [vmem:[%s4955_s28 + $0x3c] sm:$0xe]  ;;  %v892_v35 = vld [vmem:[%s4955_s28 + $0x44] sm:$0x1] }
  0x66   : > { %2362 = vrot.lane.b32.xlu1 %v4731_v36, %s4876_s7  ;;  %v2564_v60 = vsel %vm4998_vm5, %v2559_v47, %v2563_v32  ;;  %v4405_v61 = vcombine.low %v3079_v42, %v3082_v52  ;;  %v480_v1 = vrot.slane %v478_v48, 5  ;;  %v486_v2 = vrot.slane %v484_v49, 5  ;;  %v4095_v36 = vld [vmem:[%s4955_s28 + $0x3c] sm:$0xf]  ;;  %v4096_v48 = vld [vmem:[%s4955_s28 + $0x40] sm:$0xf] }
  0x67   : > { %v4326_v63 = vcombine.low %v2554_v59, %v2564_v60  ;;  %v490_v3 = vrot.slane %v488_v55, 4  ;;  %2905 = vrot.lane.b32.xlu0 %v4325_v58, %s4877_s8  ;;  %v494_v5 = vshll.u32 %v341_v44, 16  ;;  %v4390_v6 = vrot.slane %v4348_v50, 9  ;;  %v4098_v60 = vld [vmem:[%s4955_s28 + $0x48] sm:$0xf] }
  0x68   : > { %v3085_v7 = vrot.slane %v4349_v56, 5  ;;  %v3088_v8 = vrot.slane %v4350_v57, 5  ;;  %v481_v10 = vor.u32 %v480_v1, %v477_v54  ;;  %v499_v12 = vshrl.u32 %v342_v62, 16  ;;  %v4097_v54 = vld [vmem:[%s4955_s28 + $0x44] sm:$0x1] }
  0x69   : > { %v491_v11 = vor.u32 %v490_v3, %v486_v2  ;;  %v502_v13 = vshll.u32 %v342_v62, 16  ;;  %v496_v15 = vrot.slane %v494_v5, 5  ;;  %v508_v18 = vshll.u32 %v343_v4, 16 }
  0x6a   : > { %2907 = vrot.lane.b32.xlu1 %v4326_v63, %s4877_s8  ;;  %v3086_v16 = vsel %vm4957_vm2, %v4390_v6, %v3085_v7  ;;  %v3087_v17 = vrot.slane %v3085_v7, 4  ;;  %v482_v21 = vrot.slane %v481_v10, 4  ;;  %v501_v23 = vrot.slane %v499_v12, 4  ;;  %v4100_v7 = vld [vmem:[%s4955_s28 + $0x50] sm:$0x1] }
  0x6b   : > { %v492_v22 = vrot.slane %v491_v11, 4  ;;  %v504_v24 = vrot.slane %v502_v13, 5  ;;  %3226 = vrot.lane.b32.xlu0 %v4405_v61, %s4878_s9  ;;  %v510_v26 = vrot.slane %v508_v18, 5  ;;  %v512_v27 = vshrl.u32 %v343_v4, 16  ;;  %v4732_v11 = vld [vmem:[%s4955_s28 + $0x3c] sm:$0xff]  }
  0x6c   : > { %v3089_v25 = vsel %vm4957_vm2, %v3087_v17, %v3088_v8  ;;  %v518_v28 = vshll.u32 %v344_v9, 16  ;;  %v487_v30 = vsel %vm4998_vm5, %v482_v21, %v486_v2  ;;  %v4007_v40 = vrot.slane %v887_v14, 9  ;;  %v4099_v2 = vld [vmem:[%s4955_s28 + $0x4c] sm:$0xf]  ;;  %v4159_v8 = vld [vmem:[%s4955_s28 + $0x3c] sm:$0xe] }
  0x6d   : > { %v497_v31 = vsel %vm4998_vm5, %v492_v22, %v496_v15  ;;  %v4406_v32 = vcombine.low %v3086_v16, %v3089_v25  ;;  %v505_v33 = vor.u32 %v504_v24, %v501_v23  ;;  %v514_v38 = vrot.slane %v512_v27, 4  ;;  %v4160_v14 = vld [vmem:[%s4955_s28 + $0x40] sm:$0xf]  ;;  %v4161_v15 = vld [vmem:[%s4955_s28 + $0x44] sm:$0x1] }
  0x6e   : > { %v3991_v37 = vcombine.low %v487_v30, %v497_v31  ;;  %v520_v39 = vrot.slane %v518_v28, 5  ;;  %v1004_v42 = vrot.slane %v888_v19, 5  ;;  %v1007_v43 = vrot.slane %v889_v20, 5  ;;  %v4162_v20 = vld [vmem:[%s4955_s28 + $0x48] sm:$0xe] }
  0x6f   : > { %v506_v41 = vrot.slane %v505_v33, 4  ;;  %v4008_v44 = vrot.slane %v890_v29, 9  ;;  %3228 = vrot.lane.b32.xlu0 %v4406_v32, %s4878_s9  ;;  %v515_v45 = vor.u32 %v514_v38, %v510_v26  ;;  %v1011_v46 = vrot.slane %v891_v34, 5  ;;  %v4163_v25 = vld [vmem:[%s4955_s28 + $0x4c] sm:$0xf] }
  0x70   : > { %818 = vrot.lane.b32.xlu1 %v3991_v37, %s4874_s5  ;;  %v1014_v47 = vrot.slane %v892_v35, 5  ;;  %v1522_v49 = vshrl.u32 %v4095_v36, 16  ;;  %v1005_v51 = vsel %vm4957_vm2, %v4007_v40, %v1004_v42  ;;  %v1006_v52 = vrot.slane %v1004_v42, 4  ;;  %v4164_v30 = vld [vmem:[%s4955_s28 + $0x50] sm:$0x1] }
  0x71   : > { %v511_v50 = vsel %vm4998_vm5, %v506_v41, %v510_v26  ;;  %v1525_v55 = vshll.u32 %v4095_v36, 16  ;;  %v516_v56 = vrot.slane %v515_v45, 4  ;;  %v1012_v57 = vsel %vm4957_vm2, %v4008_v44, %v1011_v46  ;;  %v4287_v44 = vld [vmem:[%s4955_s28 + $0x48] sm:$0xf] }
  0x72   : > { %v1013_v58 = vrot.slane %v1011_v46, 4  ;;  %v1524_v59 = vrot.slane %v1522_v49, 4  ;;  %v1008_v61 = vsel %vm4957_vm2, %v1006_v52, %v1007_v43  ;;  %v1531_v63 = vshll.u32 %v4096_v48, 16  ;;  %v4288_v49 = vld [vmem:[%s4955_s28 + $0x4c] sm:$0xf] }
  0x73   : > { %v1527_v62 = vrot.slane %v1525_v55, 5  ;;  %v1535_v1 = vshrl.u32 %v4096_v48, 16  ;;  %v521_v3 = vsel %vm4998_vm5, %v516_v56, %v520_v39  ;;  %v4023_v4 = vcombine.low %v1005_v51, %v1008_v61  ;;  %v4733_v39 = vld [vmem:[%s4955_s28 + $0x48] sm:$0xff]   ;;  %v4290_v56 = vld [vmem:[%s4955_s28 + $0x54] sm:$0xf] }
  0x74   : > { %v1015_v5 = vsel %vm4957_vm2, %v1013_v58, %v1014_v47  ;;  %v1541_v6 = vshll.u32 %v4097_v54, 16  ;;  %v3992_v9 = vcombine.low %v511_v50, %v521_v3  ;;  %v1533_v13 = vrot.slane %v1531_v63, 5  ;;  %v4289_v50 = vld [vmem:[%s4955_s28 + $0x50] sm:$0x1] }
  0x75   : > { %v4024_v10 = vcombine.low %v1012_v57, %v1015_v5  ;;  %v1528_v12 = vor.u32 %v1527_v62, %v1524_v59  ;;  %1142 = vrot.lane.b32.xlu0 %v4023_v4, %s4873_s4  ;;  %v1537_v16 = vrot.slane %v1535_v1, 4  ;;  %v1546_v18 = vshrl.u32 %v4098_v60, 16 }
  0x76   : > { %v1543_v17 = vrot.slane %v1541_v6, 5  ;;  %v1549_v19 = vshll.u32 %v4098_v60, 16  ;;  %820 = vrot.lane.b32.xlu1 %v3992_v9, %s4874_s5  ;;  %v1555_v22 = vshll.u32 %v4099_v2, 16  ;;  %v1559_v23 = vshrl.u32 %v4099_v2, 16  ;;  %v4291_v2 = vld [vmem:[%s4955_s28 + $0x58] sm:$0xf] }
  0x77   : > { %v1529_v21 = vrot.slane %v1528_v12, 4  ;;  %v1565_v24 = vshll.u32 %v4100_v7, 16  ;;  %v1538_v26 = vor.u32 %v1537_v16, %v1533_v13  ;;  %v1548_v27 = vrot.slane %v1546_v18, 4  ;;  %v4292_v7 = vld [vmem:[%s4955_s28 + $0x5c] sm:$0x1] }
  0x78   : > { %v1551_v28 = vrot.slane %v1549_v19, 5  ;;  %v4199_v29 = vrot.slane %v4159_v8, 9  ;;  %v1557_v32 = vrot.slane %v1555_v22, 5  ;;  %v1561_v33 = vrot.slane %v1559_v23, 4  ;;  %v4351_v12 = vld [vmem:[%s4955_s28 + $0x48] sm:$0xe] }
  0x79   : > { %v1534_v31 = vsel %vm4998_vm5, %v1529_v21, %v1533_v13  ;;  %v1567_v34 = vrot.slane %v1565_v24, 5  ;;  %1320 = vrot.lane.b32.xlu0 %v4732_v11, %s4871_s29  ;;  %v1539_v35 = vrot.slane %v1538_v26, 4  ;;  %v2048_v37 = vrot.slane %v4160_v14, 5  ;;  %v4734_v13 = vld [vmem:[%s4955_s28 + $0x48] sm:$0xff]   ;;  %v4353_v23 = vld [vmem:[%s4955_s28 + $0x50] sm:$0x1] }
  0x7a   : > { %v1552_v36 = vor.u32 %v1551_v28, %v1548_v27  ;;  %v2051_v38 = vrot.slane %v4161_v15, 5  ;;  %1144 = vrot.lane.b32.xlu1 %v4024_v10, %s4873_s4  ;;  %v1562_v40 = vor.u32 %v1561_v33, %v1557_v32  ;;  %v4200_v41 = vrot.slane %v4162_v20, 9  ;;  %v4352_v18 = vld [vmem:[%s4955_s28 + $0x4c] sm:$0xf]  ;;  %v345_v28 = vld [vmem:[%s4955_s28 + $0x48] sm:$0xf] }
  0x7b   : > { %v2055_v42 = vrot.slane %v4163_v25, 5  ;;  %v2058_v43 = vrot.slane %v4164_v30, 5  ;;  %v1544_v45 = vsel %vm4998_vm5, %v1539_v35, %v1543_v17  ;;  %v2049_v47 = vsel %vm4957_vm2, %v4199_v29, %v2048_v37  ;;  %v346_v33 = vld [vmem:[%s4955_s28 + $0x4c] sm:$0xf] }
  0x7c   : > { %v1553_v46 = vrot.slane %v1552_v36, 4  ;;  %v2050_v48 = vrot.slane %v2048_v37, 4  ;;  %v4135_v51 = vcombine.low %v1534_v31, %v1544_v45  ;;  %v1563_v52 = vrot.slane %v1562_v40, 4  ;;  %v4355_v45 = vld [vmem:[%s4955_s28 + $0x58] sm:$0xf] }
  0x7d   : > { %v2056_v54 = vsel %vm4957_vm2, %v4200_v41, %v2055_v42  ;;  %v2057_v55 = vrot.slane %v2055_v42, 4  ;;  %v2566_v59 = vshrl.u32 %v4287_v44, 16  ;;  %v2569_v60 = vshll.u32 %v4287_v44, 16  ;;  %v347_v42 = vld [vmem:[%s4955_s28 + $0x50] sm:$0x1] }
  0x7e   : > { %v1558_v57 = vsel %vm4998_vm5, %v1553_v46, %v1557_v32  ;;  %v2052_v58 = vsel %vm4957_vm2, %v2050_v48, %v2051_v38  ;;  %1322 = vrot.lane.b32.xlu1 %v4733_v39, %s4871_s29  ;;  %1865 = vrot.lane.b32.xlu0 %v4135_v51, %s4875_s6  ;;  %v1568_v61 = vsel %vm4998_vm5, %v1563_v52, %v1567_v34  ;;  %v2575_v1 = vshll.u32 %v4288_v49, 16  ;;  %v4735_v38 = vld [vmem:[%s4955_s28 + $0x54] sm:$0xff]  }
  0x7f   : > { %v4215_v62 = vcombine.low %v2049_v47, %v2052_v58  ;;  %v2059_v63 = vsel %vm4957_vm2, %v2057_v55, %v2058_v43  ;;  %v4136_v3 = vcombine.low %v1558_v57, %v1568_v61  ;;  %v2568_v5 = vrot.slane %v2566_v59, 4  ;;  %v4354_v44 = vld [vmem:[%s4955_s28 + $0x54] sm:$0xe] }
  0x80   : > { %v4216_v4 = vcombine.low %v2056_v54, %v2059_v63  ;;  %v2571_v6 = vrot.slane %v2569_v60, 5  ;;  %v2577_v8 = vrot.slane %v2575_v1, 5  ;;  %v2579_v9 = vshrl.u32 %v4288_v49, 16  ;;  %v348_v60 = vld [vmem:[%s4955_s28 + $0x54] sm:$0xf] }
  0x81   : > { %v2585_v10 = vshll.u32 %v4289_v50, 16  ;;  %v2590_v11 = vshrl.u32 %v4290_v56, 16  ;;  %v2593_v15 = vshll.u32 %v4290_v56, 16  ;;  %v2599_v16 = vshll.u32 %v4291_v2, 16  ;;  %v4356_v50 = vld [vmem:[%s4955_s28 + $0x5c] sm:$0x1] }
  0x82   : > { %v2572_v14 = vor.u32 %v2571_v6, %v2568_v5  ;;  %v2603_v17 = vshrl.u32 %v4291_v2, 16  ;;  %1867 = vrot.lane.b32.xlu1 %v4136_v3, %s4875_s6  ;;  %2186 = vrot.lane.b32.xlu0 %v4215_v62, %s4872_s30  ;;  %v2581_v19 = vrot.slane %v2579_v9, 4  ;;  %v2609_v22 = vshll.u32 %v4292_v7, 16  ;;  %v349_v2 = vld [vmem:[%s4955_s28 + $0x58] sm:$0xf] }
  0x83   : > { %v2587_v20 = vrot.slane %v2585_v10, 5  ;;  %v2592_v21 = vrot.slane %v2590_v11, 4  ;;  %v2595_v25 = vrot.slane %v2593_v15, 5  ;;  %v2601_v26 = vrot.slane %v2599_v16, 5  ;;  %v350_v9 = vld [vmem:[%s4955_s28 + $0x5c] sm:$0x1] }
  0x84   : > { %v2573_v24 = vrot.slane %v2572_v14, 4  ;;  %v2605_v27 = vrot.slane %v2603_v17, 4  ;;  %v2582_v29 = vor.u32 %v2581_v19, %v2577_v8  ;;  %v2611_v30 = vrot.slane %v2609_v22, 5  ;;  %v894_v17 = vld [vmem:[%s4955_s28 + $0x4c] sm:$0xf] }
  0x85   : > { %v4391_v31 = vrot.slane %v4351_v12, 9  ;;  %v3092_v32 = vrot.slane %v4352_v18, 5  ;;  %v2596_v35 = vor.u32 %v2595_v25, %v2592_v21  ;;  %v3095_v37 = vrot.slane %v4353_v23, 5  ;;  %v893_v12 = vld [vmem:[%s4955_s28 + $0x48] sm:$0xe] }
  0x86   : > { %v2578_v34 = vsel %vm4998_vm5, %v2573_v24, %v2577_v8  ;;  %v2606_v36 = vor.u32 %v2605_v27, %v2601_v26  ;;  %2188 = vrot.lane.b32.xlu1 %v4216_v4, %s4872_s30  ;;  %2364 = vrot.lane.b32.xlu0 %v4734_v13, %s4876_s7  ;;  %v2583_v39 = vrot.slane %v2582_v29, 4  ;;  %v523_v43 = vshrl.u32 %v345_v28, 16  ;;  %v895_v18 = vld [vmem:[%s4955_s28 + $0x50] sm:$0x1]  ;;  %v896_v19 = vld [vmem:[%s4955_s28 + $0x54] sm:$0xe] }
  0x87   : > { %v3093_v40 = vsel %vm4957_vm2, %v4391_v31, %v3092_v32  ;;  %v3094_v41 = vrot.slane %v3092_v32, 4  ;;  %v2597_v46 = vrot.slane %v2596_v35, 4  ;;  %v526_v48 = vshll.u32 %v345_v28, 16  ;;  %v897_v32 = vld [vmem:[%s4955_s28 + $0x58] sm:$0xf] }
  0x88   : > { %v2607_v47 = vrot.slane %v2606_v36, 4  ;;  %v532_v49 = vshll.u32 %v346_v33, 16  ;;  %v2588_v51 = vsel %vm4998_vm5, %v2583_v39, %v2587_v20  ;;  %v525_v54 = vrot.slane %v523_v43, 4  ;;  %v4102_v43 = vld [vmem:[%s4955_s28 + $0x58] sm:$0xf] }
  0x89   : > { %v3096_v52 = vsel %vm4957_vm2, %v3094_v41, %v3095_v37  ;;  %v536_v55 = vshrl.u32 %v346_v33, 16  ;;  %v4327_v56 = vcombine.low %v2578_v34, %v2588_v51  ;;  %v2602_v57 = vsel %vm4998_vm5, %v2597_v46, %v2601_v26  ;;  %v898_v33 = vld [vmem:[%s4955_s28 + $0x5c] sm:$0x1]  ;;  %v4101_v34 = vld [vmem:[%s4955_s28 + $0x54] sm:$0xf] }
  0x8a   : > { %v2612_v58 = vsel %vm4998_vm5, %v2607_v47, %v2611_v30  ;;  %v4407_v59 = vcombine.low %v3093_v40, %v3096_v52  ;;  %2366 = vrot.lane.b32.xlu1 %v4735_v38, %s4876_s7  ;;  %v528_v62 = vrot.slane %v526_v48, 5  ;;  %v534_v63 = vrot.slane %v532_v49, 5  ;;  %v4103_v47 = vld [vmem:[%s4955_s28 + $0x5c] sm:$0x1] }
  0x8b   : > { %v4328_v61 = vcombine.low %v2602_v57, %v2612_v58  ;;  %v538_v1 = vrot.slane %v536_v55, 4  ;;  %2909 = vrot.lane.b32.xlu0 %v4327_v56, %s4877_s8  ;;  %v542_v3 = vshll.u32 %v347_v42, 16  ;;  %v4392_v4 = vrot.slane %v4354_v44, 9 }
  0x8c   : > { %v3099_v5 = vrot.slane %v4355_v45, 5  ;;  %v3102_v6 = vrot.slane %v4356_v50, 5  ;;  %v529_v7 = vor.u32 %v528_v62, %v525_v54  ;;  %v547_v10 = vshrl.u32 %v348_v60, 16 }
  0x8d   : > { %v539_v8 = vor.u32 %v538_v1, %v534_v63  ;;  %v550_v11 = vshll.u32 %v348_v60, 16  ;;  %v544_v13 = vrot.slane %v542_v3, 5  ;;  %v556_v16 = vshll.u32 %v349_v2, 16 }
  0x8e   : > { %v3100_v14 = vsel %vm4957_vm2, %v4392_v4, %v3099_v5  ;;  %v3101_v15 = vrot.slane %v3099_v5, 4  ;;  %2911 = vrot.lane.b32.xlu1 %v4328_v61, %s4877_s8  ;;  %v530_v20 = vrot.slane %v529_v7, 4  ;;  %v549_v22 = vrot.slane %v547_v10, 4  ;;  %v4106_v7 = vld [vmem:[%s4955_s28 + $0x68] sm:$0x1] }
  0x8f   : > { %v540_v21 = vrot.slane %v539_v8, 4  ;;  %v552_v23 = vrot.slane %v550_v11, 5  ;;  %3230 = vrot.lane.b32.xlu0 %v4407_v59, %s4878_s9  ;;  %v558_v25 = vrot.slane %v556_v16, 5  ;;  %v560_v26 = vshrl.u32 %v349_v2, 16  ;;  %v5309_v54 = vpop.permute.xlu1 %1314  ;;  %v4104_v59 = vld [vmem:[%s4955_s28 + $0x60] sm:$0xf]  ;;  %v5314_v60 = vpop.permute.xlu0 %1312 }
  0x90   : > { %v3103_v24 = vsel %vm4957_vm2, %v3101_v15, %v3102_v6  ;;  %v566_v27 = vshll.u32 %v350_v9, 16  ;;  %v535_v28 = vsel %vm4998_vm5, %v530_v20, %v534_v63  ;;  %v4009_v38 = vrot.slane %v893_v12, 9  ;;  %v4105_v2 = vld [vmem:[%s4955_s28 + $0x64] sm:$0xf]  ;;  %v4165_v8 = vld [vmem:[%s4955_s28 + $0x54] sm:$0xe] }
  0x91   : > { %v545_v29 = vsel %vm4998_vm5, %v540_v21, %v544_v13  ;;  %v4408_v30 = vcombine.low %v3100_v14, %v3103_v24  ;;  %v553_v31 = vor.u32 %v552_v23, %v549_v22  ;;  %v562_v36 = vrot.slane %v560_v26, 4  ;;  %v4736_v11 = vld [vmem:[%s4955_s28 + $0x54] sm:$0xff]   ;;  %v4167_v15 = vld [vmem:[%s4955_s28 + $0x5c] sm:$0x1]  ;;  %v4168_v20 = vld [vmem:[%s4955_s28 + $0x60] sm:$0xe] }
  0x92   : > { %v3993_v35 = vcombine.low %v535_v28, %v545_v29  ;;  %v568_v37 = vrot.slane %v566_v27, 5  ;;  %v1018_v40 = vrot.slane %v894_v17, 5  ;;  %v1021_v41 = vrot.slane %v895_v18, 5  ;;  %v4166_v14 = vld [vmem:[%s4955_s28 + $0x58] sm:$0xf] }
  0x93   : > { %v554_v39 = vrot.slane %v553_v31, 4  ;;  %v4010_v42 = vrot.slane %v896_v19, 9  ;;  %3232 = vrot.lane.b32.xlu0 %v4408_v30, %s4878_s9  ;;  %v563_v44 = vor.u32 %v562_v36, %v558_v25  ;;  %v1025_v45 = vrot.slane %v897_v32, 5  ;;  %v4170_v31 = vld [vmem:[%s4955_s28 + $0x68] sm:$0x1] }
  0x94   : > { %822 = vrot.lane.b32.xlu1 %v3993_v35, %s4874_s5  ;;  %v1028_v46 = vrot.slane %v898_v33, 5  ;;  %v1570_v48 = vshrl.u32 %v4101_v34, 16  ;;  %v1019_v50 = vsel %vm4957_vm2, %v4009_v38, %v1018_v40  ;;  %v1020_v51 = vrot.slane %v1018_v40, 4 }
  0x95   : > { %v559_v49 = vsel %vm4998_vm5, %v554_v39, %v558_v25  ;;  %v1573_v52 = vshll.u32 %v4101_v34, 16  ;;  %v564_v55 = vrot.slane %v563_v44, 4  ;;  %v1026_v56 = vsel %vm4957_vm2, %v4010_v42, %v1025_v45  ;;  %v4169_v25 = vld [vmem:[%s4955_s28 + $0x64] sm:$0xf] }
  0x96   : > { %v1027_v57 = vrot.slane %v1025_v45, 4  ;;  %v1572_v58 = vrot.slane %v1570_v48, 4  ;;  %v1022_v61 = vsel %vm4957_vm2, %v1020_v51, %v1021_v41  ;;  %v1579_v63 = vshll.u32 %v4102_v43, 16  ;;  %v4293_v41 = vld [vmem:[%s4955_s28 + $0x60] sm:$0xf] }
  0x97   : > { %v1575_v62 = vrot.slane %v1573_v52, 5  ;;  %v1583_v1 = vshrl.u32 %v4102_v43, 16  ;;  %v569_v3 = vsel %vm4998_vm5, %v564_v55, %v568_v37  ;;  %v4025_v4 = vcombine.low %v1019_v50, %v1022_v61  ;;  %v5335_v32 = vpop.permute.xlu0 %2178  ;;  %v4737_v42 = vld [vmem:[%s4955_s28 + $0x60] sm:$0xff]  }
  0x98   : > { %v1029_v5 = vsel %vm4957_vm2, %v1027_v57, %v1028_v46  ;;  %v1589_v6 = vshll.u32 %v4103_v47, 16  ;;  %v3994_v9 = vcombine.low %v559_v49, %v569_v3  ;;  %v1581_v13 = vrot.slane %v1579_v63, 5  ;;  %v5332_v26 = vpop.permute.xlu1 %1134  ;;  %v4294_v47 = vld [vmem:[%s4955_s28 + $0x64] sm:$0xf] }
  0x99   : > { %v4026_v10 = vcombine.low %v1026_v56, %v1029_v5  ;;  %v1576_v12 = vor.u32 %v1575_v62, %v1572_v58  ;;  %1146 = vrot.lane.b32.xlu0 %v4025_v4, %s4873_s4  ;;  %v1585_v16 = vrot.slane %v1583_v1, 4  ;;  %v1594_v18 = vshrl.u32 %v4104_v59, 16  ;;  %v4295_v62 = vld [vmem:[%s4955_s28 + $0x68] sm:$0x1] }
  0x9a   : > { %v1591_v17 = vrot.slane %v1589_v6, 5  ;;  %v1597_v19 = vshll.u32 %v4104_v59, 16  ;;  %824 = vrot.lane.b32.xlu1 %v3994_v9, %s4874_s5  ;;  %v1603_v22 = vshll.u32 %v4105_v2, 16  ;;  %v1607_v23 = vshrl.u32 %v4105_v2, 16  ;;  %v4296_v2 = vld [vmem:[%s4955_s28 + $0x6c] sm:$0xf] }
  0x9b   : > { %v1577_v21 = vrot.slane %v1576_v12, 4  ;;  %v1613_v24 = vshll.u32 %v4106_v7, 16  ;;  %v1586_v27 = vor.u32 %v1585_v16, %v1581_v13  ;;  %v1596_v28 = vrot.slane %v1594_v18, 4  ;;  %v4745_v16 = vld [vmem:[%s4955_s28 + $0x18] sm:$0xff]   ;;  %v4753_v18 = vld [vmem:[%s4955_s28 + $0x30] sm:$0xff]  }
  0x9c   : > { %v1599_v29 = vrot.slane %v1597_v19, 5  ;;  %v4201_v30 = vrot.slane %v4165_v8, 9  ;;  %v1605_v34 = vrot.slane %v1603_v22, 5  ;;  %v1609_v35 = vrot.slane %v1607_v23, 4  ;;  %v5352_v58 = vpop.permute.xlu1 %1136  ;;  %v4297_v8 = vld [vmem:[%s4955_s28 + $0x70] sm:$0xf] }
  0x9d   : > { %v1582_v33 = vsel %vm4998_vm5, %v1577_v21, %v1581_v13  ;;  %v1615_v36 = vrot.slane %v1613_v24, 5  ;;  %1324 = vrot.lane.b32.xlu0 %v4736_v11, %s4871_s29  ;;  %v1587_v37 = vrot.slane %v1586_v27, 4  ;;  %v2062_v39 = vrot.slane %v4166_v14, 5  ;;  %v4298_v13 = vld [vmem:[%s4955_s28 + $0x74] sm:$0x1]  ;;  %v4740_v14 = vld [vmem:[%s4955_s28] sm:$0xff]  }
  0x9e   : > { %v1600_v38 = vor.u32 %v1599_v29, %v1596_v28  ;;  %v2065_v40 = vrot.slane %v4167_v15, 5  ;;  %1148 = vrot.lane.b32.xlu1 %v4026_v10, %s4873_s4  ;;  %v1610_v43 = vor.u32 %v1609_v35, %v1605_v34  ;;  %v4202_v44 = vrot.slane %v4168_v20, 9  ;;  %v4741_v15 = vld [vmem:[%s4955_s28 + $0xc] sm:$0xff]   ;;  %v4754_v19 = vld [vmem:[%s4955_s28 + $0x3c] sm:$0xff]   ;;  %311 = vst.msk [vmem:[#allocation2] sm:$0xff] %vm310_vm6, %v4740_v14  ;;  %313 = vst.msk [vmem:[#allocation2 + $0x10] sm:$0xff] %vm310_vm6, %v4745_v16 }
  0x9f   : > { %v2069_v45 = vrot.slane %v4169_v25, 5  ;;  %v2072_v46 = vrot.slane %v4170_v31, 5  ;;  %v1592_v48 = vsel %vm4998_vm5, %v1587_v37, %v1591_v17  ;;  %v2063_v50 = vsel %vm4957_vm2, %v4201_v30, %v2062_v39  ;;  %v4747_v17 = vld [vmem:[%s4955_s28 + $0x24] sm:$0xff]   ;;  %v4357_v31 = vld [vmem:[%s4955_s28 + $0x60] sm:$0xe]  ;;  %312 = vst.msk [vmem:[#allocation2 + $0x8] sm:$0xff] %vm310_vm6, %v4741_v15 }
  0xa0   : > { %v1601_v49 = vrot.slane %v1600_v38, 4  ;;  %v2064_v51 = vrot.slane %v2062_v39, 4  ;;  %v4137_v52 = vcombine.low %v1582_v33, %v1592_v48  ;;  %v1611_v55 = vrot.slane %v1610_v43, 4  ;;  %v4759_v20 = vld [vmem:[%s4955_s28 + $0x48] sm:$0xff]   ;;  %v4738_v21 = vld [vmem:[%s4955_s28 + $0x60] sm:$0xff]   ;;  %v4760_v33 = vld [vmem:[%s4955_s28 + $0x54] sm:$0xff]   ;;  %v5386_v39 = vpop.permute.xlu1 %2180 }
  0xa1   : > { %v5350_v56 = vsel %vm4957_vm2, %v4202_v44, %v2069_v45  ;;  %v2071_v57 = vrot.slane %v2069_v45, 4  ;;  %v2614_v63 = vshrl.u32 %v4293_v41, 16  ;;  %v2617_v1 = vshll.u32 %v4293_v41, 16  ;;  %v4358_v38 = vld [vmem:[%s4955_s28 + $0x64] sm:$0xf]  ;;  %314 = vst.msk [vmem:[#allocation2 + $0x18] sm:$0xff] %vm310_vm6, %v4747_v17 }
  0xa2   : > { %v1606_v59 = vsel %vm4998_vm5, %v1601_v49, %v1605_v34  ;;  %v2066_v61 = vsel %vm4957_vm2, %v2064_v51, %v2065_v40  ;;  %v5360_v3 = vpop.permute.xlu0 %810  ;;  %1326 = vrot.lane.b32.xlu1 %v4737_v42, %s4871_s29  ;;  %1869 = vrot.lane.b32.xlu0 %v4137_v52, %s4875_s6  ;;  %v1616_v4 = vsel %vm4998_vm5, %v1611_v55, %v1615_v36  ;;  %v2623_v7 = vshll.u32 %v4294_v47, 16  ;;  %v4359_v44 = vld [vmem:[%s4955_s28 + $0x68] sm:$0x1]  ;;  %v351_v48 = vld [vmem:[%s4955_s28 + $0x60] sm:$0xf] }
  0xa3   : > { %v4217_v5 = vcombine.low %v2063_v50, %v2066_v61  ;;  %v2073_v6 = vsel %vm4957_vm2, %v2071_v57, %v2072_v46  ;;  %v4138_v9 = vcombine.low %v1606_v59, %v1616_v4  ;;  %v2616_v11 = vrot.slane %v2614_v63, 4  ;;  %v4739_v49 = vld [vmem:[%s4955_s28 + $0x6c] sm:$0xff]   ;;  %v352_v55 = vld [vmem:[%s4955_s28 + $0x64] sm:$0xf]  ;;  %315 = vst.msk [vmem:[#allocation2 + $0x20] sm:$0xff] %vm310_vm6, %v4753_v18  ;;  %316 = vst.msk [vmem:[#allocation2 + $0x28] sm:$0xff] %vm310_vm6, %v4754_v19 }
  0xa4   : > { %v4218_v10 = vcombine.low %v5350_v56, %v2073_v6  ;;  %v2619_v12 = vrot.slane %v2617_v1, 5  ;;  %v5379_v22 = vrot.slane %v2623_v7, 5  ;;  %v2627_v23 = vshrl.u32 %v4294_v47, 16  ;;  %317 = vst.msk [vmem:[#allocation2 + $0x30] sm:$0xff] %vm310_vm6, %v4759_v20  ;;  %318 = vst.msk [vmem:[#allocation2 + $0x38] sm:$0xff] %vm310_vm6, %v4760_v33 }
  0xa5   : > { %v2633_v24 = vshll.u32 %v4295_v62, 16  ;;  %v2638_v25 = vshrl.u32 %v4296_v2, 16  ;;  %v2641_v28 = vshll.u32 %v4296_v2, 16  ;;  %v2647_v29 = vshll.u32 %v4297_v8, 16  ;;  %859 = vst.msk [vmem:[#allocation2] sm:$0xff] %vm858_vm7, %v5360_v3 }
  0xa6   : > { %v2620_v27 = vor.u32 %v2619_v12, %v2616_v11  ;;  %v2651_v30 = vshrl.u32 %v4297_v8, 16  ;;  %1871 = vrot.lane.b32.xlu1 %v4138_v9, %s4875_s6  ;;  %2190 = vrot.lane.b32.xlu0 %v4217_v5, %s4872_s30  ;;  %v2629_v34 = vrot.slane %v2627_v23, 4  ;;  %v2657_v37 = vshll.u32 %v4298_v13, 16  ;;  %v353_v62 = vld [vmem:[%s4955_s28 + $0x68] sm:$0x1]  ;;  %1183 = vst.msk [vmem:[#allocation2] sm:$0xff] %vm1182_vm8, %v5332_v26 }
  0xa7   : > { %v2635_v35 = vrot.slane %v2633_v24, 5  ;;  %v2640_v36 = vrot.slane %v2638_v25, 4  ;;  %v2643_v41 = vrot.slane %v2641_v28, 5  ;;  %v2649_v42 = vrot.slane %v2647_v29, 5  ;;  %v813_v45 = vpop.permute.xlu0 %812  ;;  %v4360_v63 = vld [vmem:[%s4955_s28 + $0x6c] sm:$0xe] }
  0xa8   : > { %v2621_v40 = vrot.slane %v2620_v27, 4  ;;  %v2653_v43 = vrot.slane %v2651_v30, 4  ;;  %v2630_v46 = vor.u32 %v2629_v34, %v5379_v22  ;;  %v2659_v47 = vrot.slane %v2657_v37, 5  ;;  %860 = vst.msk [vmem:[#allocation2 + $0x8] sm:$0xff] %vm858_vm7, %v813_v45  ;;  %v4361_v6 = vld [vmem:[%s4955_s28 + $0x70] sm:$0xf] }
  0xa9   : > { %v2644_v51 = vor.u32 %v2643_v41, %v2640_v36  ;;  %v4393_v57 = vrot.slane %v4357_v31, 9  ;;  %v3106_v59 = vrot.slane %v4358_v38, 5  ;;  %v3109_v61 = vrot.slane %v4359_v44, 5  ;;  %1184 = vst.msk [vmem:[#allocation2 + $0x8] sm:$0xff] %vm1182_vm8, %v5352_v58  ;;  %v4362_v7 = vld [vmem:[%s4955_s28 + $0x74] sm:$0x1] }
  0xaa   : > { %v2626_v50 = vsel %vm4998_vm5, %v2621_v40, %v5379_v22  ;;  %v2654_v52 = vor.u32 %v2653_v43, %v2649_v42  ;;  %2192 = vrot.lane.b32.xlu1 %v4218_v10, %s4872_s30  ;;  %2368 = vrot.lane.b32.xlu0 %v4738_v21, %s4876_s7  ;;  %v2631_v56 = vrot.slane %v2630_v46, 4  ;;  %v571_v4 = vshrl.u32 %v351_v48, 16  ;;  %v354_v3 = vld [vmem:[%s4955_s28 + $0x6c] sm:$0xf]  ;;  %v355_v19 = vld [vmem:[%s4955_s28 + $0x70] sm:$0xf] }
  0xab   : > { %v2645_v1 = vrot.slane %v2644_v51, 4  ;;  %v574_v5 = vshll.u32 %v351_v48, 16  ;;  %v3107_v9 = vsel %vm4957_vm2, %v4393_v57, %v3106_v59  ;;  %v3108_v10 = vrot.slane %v3106_v59, 4  ;;  %v5422_v12 = vpop.permute.xlu1 %1859  ;;  %v356_v33 = vld [vmem:[%s4955_s28 + $0x74] sm:$0x1]  ;;  %1362 = vst.msk [vmem:[#allocation2 + $0x8] sm:$0xff] %vm1360_vm9, %v5309_v54 }
  0xac   : > { %v2655_v2 = vrot.slane %v2654_v52, 4  ;;  %v2636_v8 = vsel %vm4998_vm5, %v2631_v56, %v2635_v35  ;;  %v580_v11 = vshll.u32 %v352_v55, 16  ;;  %v573_v14 = vrot.slane %v571_v4, 4  ;;  %v899_v41 = vld [vmem:[%s4955_s28 + $0x60] sm:$0xe]  ;;  %1361 = vst.msk [vmem:[#allocation2] sm:$0xff] %vm1360_vm9, %v5314_v60 }
  0xad   : > { %v4329_v26 = vcombine.low %v2626_v50, %v2636_v8  ;;  %v2650_v13 = vsel %vm4998_vm5, %v2645_v1, %v2649_v42  ;;  %v3110_v16 = vsel %vm4957_vm2, %v3108_v10, %v3109_v61  ;;  %v576_v17 = vrot.slane %v574_v5, 5  ;;  %v900_v48 = vld [vmem:[%s4955_s28 + $0x64] sm:$0xf]  ;;  %v901_v52 = vld [vmem:[%s4955_s28 + $0x68] sm:$0x1]  ;;  %1907 = vst.msk [vmem:[#allocation2 + $0x8] sm:$0xff] %vm1905_vm10, %v5422_v12 }
  0xae   : > { %v2660_v58 = vsel %vm4998_vm5, %v2655_v2, %v2659_v47  ;;  %2370 = vrot.lane.b32.xlu1 %v4739_v49, %s4876_s7  ;;  %v582_v18 = vrot.slane %v580_v11, 5  ;;  %v4409_v21 = vcombine.low %v3107_v9, %v3110_v16  ;;  %v584_v22 = vshrl.u32 %v352_v55, 16  ;;  %v902_v61 = vld [vmem:[%s4955_s28 + $0x6c] sm:$0xe]  ;;  %v904_v4 = vld [vmem:[%s4955_s28 + $0x74] sm:$0x1] }
  0xaf   : > { %v4330_v15 = vcombine.low %v2650_v13, %v2660_v58  ;;  %v1858_v20 = vpop.permute.xlu0 %1857  ;;  %2913 = vrot.lane.b32.xlu0 %v4329_v26, %s4877_s8  ;;  %v590_v23 = vshll.u32 %v353_v62, 16  ;;  %v4394_v24 = vrot.slane %v4360_v63, 9  ;;  %v577_v25 = vor.u32 %v576_v17, %v573_v14  ;;  %v5440_v43 = vpop.permute.xlu1 %2358  ;;  %v903_v62 = vld [vmem:[%s4955_s28 + $0x70] sm:$0xf]  ;;  %v4107_v26 = vld [vmem:[%s4955_s28 + $0x6c] sm:$0xf] }
  0xb0   : > { %v3113_v27 = vrot.slane %v4361_v6, 5  ;;  %v3116_v28 = vrot.slane %v4362_v7, 5  ;;  %v595_v29 = vshrl.u32 %v354_v3, 16  ;;  %v586_v30 = vrot.slane %v584_v22, 4  ;;  %1906 = vst.msk [vmem:[#allocation2] sm:$0xff] %vm1905_vm10, %v1858_v20  ;;  %v4765_v17 = vld [vmem:[%s4955_s28 + $0x60] sm:$0xff]  }
  0xb1   : > { %v592_v31 = vrot.slane %v590_v23, 5  ;;  %v598_v34 = vshll.u32 %v354_v3, 16  ;;  %v604_v35 = vshll.u32 %v355_v19, 16  ;;  %v578_v36 = vrot.slane %v577_v25, 4  ;;  %v4108_v13 = vld [vmem:[%s4955_s28 + $0x70] sm:$0xf] }
  0xb2   : > { %2915 = vrot.lane.b32.xlu1 %v4330_v15, %s4877_s8  ;;  %v3114_v37 = vsel %vm4957_vm2, %v4394_v24, %v3113_v27  ;;  %v3115_v38 = vrot.slane %v3113_v27, 4  ;;  %v597_v40 = vrot.slane %v595_v29, 4  ;;  %v587_v44 = vor.u32 %v586_v30, %v582_v18  ;;  %v4109_v12 = vld [vmem:[%s4955_s28 + $0x74] sm:$0x1]  ;;  %2227 = vst.msk [vmem:[#allocation2] sm:$0xff] %vm2226_vm11, %v5335_v32  ;;  %2228 = vst.msk [vmem:[#allocation2 + $0x8] sm:$0xff] %vm2226_vm11, %v5386_v39 }
  0xb3   : > { %v5438_v42 = vpop.permute.xlu0 %2356  ;;  %3234 = vrot.lane.b32.xlu0 %v4409_v21, %s4878_s9  ;;  %v600_v45 = vrot.slane %v598_v34, 5  ;;  %v606_v46 = vrot.slane %v604_v35, 5  ;;  %v608_v47 = vshrl.u32 %v355_v19, 16  ;;  %v583_v49 = vsel %vm4998_vm5, %v578_v36, %v582_v18  ;;  %v4110_v19 = vld [vmem:[%s4955_s28 + $0x78] sm:$0xf]  ;;  %319 = vst.msk [vmem:[#allocation2 + $0x40] sm:$0xff] %vm310_vm6, %v4765_v17 }
  0xb4   : > { %v3117_v50 = vsel %vm4957_vm2, %v3115_v38, %v3116_v28  ;;  %v614_v51 = vshll.u32 %v356_v33, 16  ;;  %v588_v55 = vrot.slane %v587_v44, 4  ;;  %v4011_v1 = vrot.slane %v899_v41, 9  ;;  %v4111_v25 = vld [vmem:[%s4955_s28 + $0x7c] sm:$0xf]  ;;  %2405 = vst.msk [vmem:[#allocation2] sm:$0xff] %vm2404_vm12, %v5438_v42 }
  0xb5   : > { %v4410_v56 = vcombine.low %v3114_v37, %v3117_v50  ;;  %v601_v57 = vor.u32 %v600_v45, %v597_v40  ;;  %v610_v59 = vrot.slane %v608_v47, 4  ;;  %v1032_v2 = vrot.slane %v900_v48, 5  ;;  %2406 = vst.msk [vmem:[#allocation2 + $0x8] sm:$0xff] %vm2404_vm12, %v5440_v43  ;;  %v4766_v33 = vld [vmem:[%s4955_s28 + $0x6c] sm:$0xff]   ;;  %v4173_v50 = vld [vmem:[%s4955_s28 + $0x74] sm:$0x1] }
  0xb6   : > { %v616_v63 = vrot.slane %v614_v51, 5  ;;  %v593_v6 = vsel %vm4998_vm5, %v588_v55, %v592_v31  ;;  %v1035_v60 = vrot.slane %v901_v52, 5  ;;  %v4012_v10 = vrot.slane %v902_v61, 9  ;;  %v4112_v31 = vld [vmem:[%s4955_s28 + $0x80] sm:$0x1]  ;;  %v4742_v39 = vld [vmem:[%s4955_s28 + $0x6c] sm:$0xff]  }
  0xb7   : > { %v2902_v5 = vpop.permute.xlu0 %2901  ;;  %3236 = vrot.lane.b32.xlu0 %v4410_v56, %s4878_s9  ;;  %v602_v7 = vrot.slane %v601_v57, 4  ;;  %v611_v54 = vor.u32 %v610_v59, %v606_v46  ;;  %v3995_v3 = vcombine.low %v583_v49, %v593_v6  ;;  %v1033_v8 = vsel %vm4957_vm2, %v4011_v1, %v1032_v2  ;;  %v4171_v38 = vld [vmem:[%s4955_s28 + $0x6c] sm:$0xe]  ;;  %v4172_v44 = vld [vmem:[%s4955_s28 + $0x70] sm:$0xf]  ;;  %320 = vst.msk [vmem:[#allocation2 + $0x48] sm:$0xff] %vm310_vm6, %v4766_v33 }
  0xb8   : > { %v1034_v9 = vrot.slane %v1032_v2, 4  ;;  %v2904_v11 = vpop.permute.xlu1 %2903  ;;  %v1039_v15 = vrot.slane %v903_v62, 5  ;;  %v1042_v16 = vrot.slane %v904_v4, 5  ;;  %v1618_v28 = vshrl.u32 %v4107_v26, 16  ;;  %2950 = vst.msk [vmem:[#allocation2] sm:$0xff] %vm2949_vm13, %v2902_v5  ;;  %v4743_v59 = vld [vmem:[%s4955_s28 + $0x78] sm:$0xff]  }
  0xb9   : > { %v607_v58 = vsel %vm4998_vm5, %v602_v7, %v606_v46  ;;  %v612_v14 = vrot.slane %v611_v54, 4  ;;  %826 = vrot.lane.b32.xlu1 %v3995_v3, %s4874_s5  ;;  %v1621_v29 = vshll.u32 %v4107_v26, 16  ;;  %v1627_v30 = vshll.u32 %v4108_v13, 16  ;;  %2951 = vst.msk [vmem:[#allocation2 + $0x8] sm:$0xff] %vm2949_vm13, %v2904_v11  ;;  %v4174_v57 = vld [vmem:[%s4955_s28 + $0x78] sm:$0xe] }
  0xba   : > { %v1036_v18 = vsel %vm4957_vm2, %v1034_v9, %v1035_v60  ;;  %v1040_v23 = vsel %vm4957_vm2, %v4012_v10, %v1039_v15  ;;  %v1041_v24 = vrot.slane %v1039_v15, 4  ;;  %v1631_v34 = vshrl.u32 %v4108_v13, 16  ;;  %v4175_v1 = vld [vmem:[%s4955_s28 + $0x7c] sm:$0xf]  ;;  %v4176_v7 = vld [vmem:[%s4955_s28 + $0x80] sm:$0x1] }
  0xbb   : > { %v3223_v20 = vpop.permute.xlu0 %3222  ;;  %v617_v21 = vsel %vm4998_vm5, %v612_v14, %v616_v63  ;;  %v4027_v22 = vcombine.low %v1033_v8, %v1036_v18  ;;  %v1637_v35 = vshll.u32 %v4109_v12, 16  ;;  %v1642_v36 = vshrl.u32 %v4110_v19, 16  ;;  %v4750_v54 = vld [vmem:[%s6297_s1 + $0x10] ss:$0 sps:$4 sm:$0x33]  }
  0xbc   : > { %v3996_v27 = vcombine.low %v607_v58, %v617_v21  ;;  %v1043_v32 = vsel %vm4957_vm2, %v1041_v24, %v1042_v16  ;;  %v1620_v41 = vrot.slane %v1618_v28, 4  ;;  %v1623_v42 = vrot.slane %v1621_v29, 5  ;;  %3271 = vst.msk [vmem:[#allocation2] sm:$0xff] %vm3270_vm14, %v3223_v20  ;;  %v4299_v18 = vld [vmem:[%s4955_s28 + $0x78] sm:$0xf]  ;;  %4668 = vmatprep.subr.msk.bf16.mxu0 %vm3372_vm15, %v4750_v54  ;;  %4669 = vmatprep.subr.msk.bf16.mxu1 %vm3372_vm15, %v4750_v54 }
  0xbd   : > { %1150 = vrot.lane.b32.xlu0 %v4027_v22, %s4873_s4  ;;  %v4028_v40 = vcombine.low %v1040_v23, %v1043_v32  ;;  %v1629_v43 = vrot.slane %v1627_v30, 5  ;;  %v1633_v46 = vrot.slane %v1631_v34, 4  ;;  %v1639_v47 = vrot.slane %v1637_v35, 5  ;;  %v4300_v23 = vld [vmem:[%s4955_s28 + $0x7c] sm:$0xf] }
  0xbe   : > { %v815_v37 = vpop.permute.xlu1 %814  ;;  %828 = vrot.lane.b32.xlu1 %v3996_v27, %s4874_s5  ;;  %v1644_v48 = vrot.slane %v1642_v36, 4  ;;  %v1645_v49 = vshll.u32 %v4110_v19, 16  ;;  %v1624_v51 = vor.u32 %v1623_v42, %v1620_v41  ;;  %v1651_v52 = vshll.u32 %v4111_v25, 16  ;;  %v4301_v24 = vld [vmem:[%s4955_s28 + $0x80] sm:$0x1] }
  0xbf   : > { %861 = vst.msk [vmem:[#allocation2 + $0x10] sm:$0xff] %vm858_vm7, %v815_v37  ;;  %v3225_v45 = vpop.permute.xlu0 %3224  ;;  %v1655_v55 = vshrl.u32 %v4111_v25, 16  ;;  %v1661_v56 = vshll.u32 %v4112_v31, 16  ;;  %v1634_v61 = vor.u32 %v1633_v46, %v1629_v43  ;;  %v4203_v63 = vrot.slane %v4171_v38, 9  ;;  %v4302_v30 = vld [vmem:[%s4955_s28 + $0x84] sm:$0xf] }
  0xc0   : > { %v1647_v62 = vrot.slane %v1645_v49, 5  ;;  %v1625_v2 = vrot.slane %v1624_v51, 4  ;;  %v1653_v4 = vrot.slane %v1651_v52, 5  ;;  %3272 = vst.msk [vmem:[#allocation2 + $0x8] sm:$0xff] %vm3270_vm14, %v3225_v45  ;;  %v2076_v8 = vrot.slane %v4172_v44, 5  ;;  %v4748_v44 = vld [vmem:[%s4955_s28 + $0x78] sm:$0xff]  }
  0xc1   : > { %1328 = vrot.lane.b32.xlu0 %v4742_v39, %s4871_s29  ;;  %v1657_v5 = vrot.slane %v1655_v55, 4  ;;  %v1663_v6 = vrot.slane %v1661_v56, 5  ;;  %v1635_v60 = vrot.slane %v1634_v61, 4  ;;  %v2079_v9 = vrot.slane %v4173_v50, 5  ;;  %v4303_v31 = vld [vmem:[%s4955_s28 + $0x88] sm:$0xf] }
  0xc2   : > { %1152 = vrot.lane.b32.xlu1 %v4028_v40, %s4873_s4  ;;  %v1648_v3 = vor.u32 %v1647_v62, %v1644_v48  ;;  %v1630_v26 = vsel %vm4998_vm5, %v1625_v2, %v1629_v43  ;;  %v4204_v58 = vrot.slane %v4174_v57, 9  ;;  %v2083_v14 = vrot.slane %v4175_v1, 5  ;;  %v4304_v41 = vld [vmem:[%s4955_s28 + $0x8c] sm:$0x1]  ;;  %v4363_v48 = vld [vmem:[%s4955_s28 + $0x78] sm:$0xe] }
  0xc3   : > { %v1139_v11 = vpop.permute.xlu0 %1138  ;;  %v1658_v13 = vor.u32 %v1657_v5, %v1653_v4  ;;  %v1640_v15 = vsel %vm4998_vm5, %v1635_v60, %v1639_v47  ;;  %v2077_v12 = vsel %vm4957_vm2, %v4203_v63, %v2076_v8  ;;  %v2078_v17 = vrot.slane %v2076_v8, 4  ;;  %v3287_v37 = vld [vmem:[#allocation2] sm:$0xff]  ;;  %v4364_v56 = vld [vmem:[%s4955_s28 + $0x7c] sm:$0xf] }
  0xc4   : > { %v817_v10 = vpop.permute.xlu1 %816  ;;  %1185 = vst.msk [vmem:[#allocation2 + $0x10] sm:$0xff] %vm1182_vm8, %v1139_v11  ;;  %v1649_v16 = vrot.slane %v1648_v3, 4  ;;  %v4139_v19 = vcombine.low %v1630_v26, %v1640_v15  ;;  %v5525_v21 = vsel %vm4957_vm2, %v4204_v58, %v2083_v14  ;;  %v2085_v22 = vrot.slane %v2083_v14, 4  ;;  %4630 = vmatprep.mubr.msk.bf16.mxu0 %vm3323_vm0, %v3287_v37  ;;  %v4365_v63 = vld [vmem:[%s4955_s28 + $0x80] sm:$0x1] }
  0xc5   : > { %862 = vst.msk [vmem:[#allocation2 + $0x18] sm:$0xff] %vm858_vm7, %v817_v10  ;;  %v1659_v20 = vrot.slane %v1658_v13, 4  ;;  %v2080_v27 = vsel %vm4957_vm2, %v2078_v17, %v2079_v9  ;;  %v2086_v28 = vrot.slane %v4176_v7, 5  ;;  %v3374_v34 = vsel %vm3372_vm15, %v4750_v54, 0  ;;  %v357_v7 = vld [vmem:[%s4955_s28 + $0x78] sm:$0xf] }
  0xc6   : > { %1330 = vrot.lane.b32.xlu1 %v4743_v59, %s4871_s29  ;;  %v1654_v25 = vsel %vm4998_vm5, %v1649_v16, %v1653_v4  ;;  %1873 = vrot.lane.b32.xlu0 %v4139_v19, %s4875_s6  ;;  %v4219_v39 = vcombine.low %v2077_v12, %v2080_v27  ;;  %v2662_v38 = vshrl.u32 %v4299_v18, 16  ;;  %v2665_v40 = vshll.u32 %v4299_v18, 16  ;;  %v358_v9 = vld [vmem:[%s4955_s28 + $0x7c] sm:$0xf]  ;;  %v4749_v10 = vld [vmem:[%s4955_s28 + $0x84] sm:$0xff]  }
  0xc7   : > { %v1317_v33 = vpop.permute.xlu0 %1316  ;;  %v1664_v32 = vsel %vm4998_vm5, %v1659_v20, %v1663_v6  ;;  %v2087_v36 = vsel %vm4957_vm2, %v2085_v22, %v2086_v28  ;;  %4629 = vmatpush3.bf16.msra.mxu0 %v3374_v34  ;;  %v3288_v42 = vld [vmem:[#allocation2 + $0x8] sm:$0xff]  ;;  %v2671_v45 = vshll.u32 %v4300_v23, 16  ;;  %v2675_v46 = vshrl.u32 %v4300_v23, 16  ;;  %4667 = vmatpush3.bf16.msra.mxu1 %v3374_v34  ;;  %v359_v14 = vld [vmem:[%s4955_s28 + $0x80] sm:$0x1] }
  0xc8   : > { %v1141_v29 = vpop.permute.xlu1 %1140  ;;  %1363 = vst.msk [vmem:[#allocation2 + $0x10] sm:$0xff] %vm1360_vm9, %v1317_v33  ;;  %v4140_v35 = vcombine.low %v1654_v25, %v1664_v32  ;;  %v4220_v43 = vcombine.low %v5525_v21, %v2087_v36  ;;  %v2681_v47 = vshll.u32 %v4301_v24, 16  ;;  %v2664_v49 = vrot.slane %v2662_v38, 4  ;;  %v4366_v19 = vld [vmem:[%s4955_s28 + $0x84] sm:$0xe]  ;;  %v4769_v25 = vld [vmem:[%s4955_s28 + $0x78] sm:$0xff]  }
  0xc9   : > { %1186 = vst.msk [vmem:[#allocation2 + $0x18] sm:$0xff] %vm1182_vm8, %v1141_v29  ;;  %v2667_v50 = vrot.slane %v2665_v40, 5  ;;  %v2686_v51 = vshrl.u32 %v4302_v30, 16  ;;  %v2689_v52 = vshll.u32 %v4302_v30, 16  ;;  %v2673_v57 = vrot.slane %v2671_v45, 5 }
  0xca   : > { %1875 = vrot.lane.b32.xlu1 %v4140_v35, %s4875_s6  ;;  %2194 = vrot.lane.b32.xlu0 %v4219_v39, %s4872_s30  ;;  %v2677_v59 = vrot.slane %v2675_v46, 4  ;;  %v2683_v61 = vrot.slane %v2681_v47, 5  ;;  %v2695_v62 = vshll.u32 %v4303_v31, 16  ;;  %v2699_v6 = vshrl.u32 %v4303_v31, 16  ;;  %v4367_v31 = vld [vmem:[%s4955_s28 + $0x88] sm:$0xf] }
  0xcb   : > { %4631 = vmatmul.mubr.msk.bf16.vlgmr.msra.gmra.mrb[0].mxu0 %vm3323_vm0, %v3288_v42  ;;  %v2668_v2 = vor.u32 %v2667_v50, %v2664_v49  ;;  %v2688_v4 = vrot.slane %v2686_v51, 4  ;;  %v2691_v5 = vrot.slane %v2689_v52, 5  ;;  %v2705_v3 = vshll.u32 %v4304_v41, 16  ;;  %v4368_v35 = vld [vmem:[%s4955_s28 + $0x8c] sm:$0x1]  ;;  %321 = vst.msk [vmem:[#allocation2 + $0x50] sm:$0xff] %vm310_vm6, %v4769_v25 }
  0xcc   : > { %v1319_v55 = vpop.permute.xlu1 %1318  ;;  %v2678_v54 = vor.u32 %v2677_v59, %v2673_v57  ;;  %v2697_v60 = vrot.slane %v2695_v62, 5  ;;  %v4395_v8 = vrot.slane %v4363_v48, 9  ;;  %v2701_v13 = vrot.slane %v2699_v6, 4  ;;  %v360_v42 = vld [vmem:[%s4955_s28 + $0x84] sm:$0xf] }
  0xcd   : > { %1364 = vst.msk [vmem:[#allocation2 + $0x18] sm:$0xff] %vm1360_vm9, %v1319_v55  ;;  %v1862_v1 = vpop.permute.xlu0 %1861  ;;  %v2669_v11 = vrot.slane %v2668_v2, 4  ;;  %v2692_v26 = vor.u32 %v2691_v5, %v2688_v4  ;;  %v3120_v58 = vrot.slane %v4364_v56, 5  ;;  %v2707_v12 = vrot.slane %v2705_v3, 5  ;;  %v361_v48 = vld [vmem:[%s4955_s28 + $0x88] sm:$0xf] }
  0xce   : > { %1908 = vst.msk [vmem:[#allocation2 + $0x10] sm:$0xff] %vm1905_vm10, %v1862_v1  ;;  %2196 = vrot.lane.b32.xlu1 %v4220_v43, %s4872_s30  ;;  %2372 = vrot.lane.b32.xlu0 %v4748_v44, %s4876_s7  ;;  %v2679_v16 = vrot.slane %v2678_v54, 4  ;;  %v3123_v17 = vrot.slane %v4365_v63, 5  ;;  %v619_v18 = vshrl.u32 %v357_v7, 16  ;;  %v2702_v23 = vor.u32 %v2701_v13, %v2697_v60  ;;  %v905_v5 = vld [vmem:[%s4955_s28 + $0x78] sm:$0xe] }
  0xcf   : > { %v2674_v21 = vsel %vm4998_vm5, %v2669_v11, %v2673_v57  ;;  %v2693_v22 = vrot.slane %v2692_v26, 4  ;;  %v3121_v24 = vsel %vm4957_vm2, %v4395_v8, %v3120_v58  ;;  %v3122_v28 = vrot.slane %v3120_v58, 4  ;;  %v362_v57 = vld [vmem:[%s4955_s28 + $0x8c] sm:$0x1]  ;;  %v4770_v6 = vld [vmem:[%s4955_s28 + $0x84] sm:$0xff]  }
  0xd0   : > { %v1864_v15 = vpop.permute.xlu1 %1863  ;;  %v2684_v27 = vsel %vm4998_vm5, %v2679_v16, %v2683_v61  ;;  %v621_v29 = vrot.slane %v619_v18, 4  ;;  %v622_v30 = vshll.u32 %v357_v7, 16  ;;  %v2703_v39 = vrot.slane %v2702_v23, 4  ;;  %v906_v8 = vld [vmem:[%s4955_s28 + $0x7c] sm:$0xf]  ;;  %322 = vst.msk [vmem:[#allocation2 + $0x58] sm:$0xff] %vm310_vm6, %v4770_v6 }
  0xd1   : > { %1909 = vst.msk [vmem:[#allocation2 + $0x18] sm:$0xff] %vm1905_vm10, %v1864_v15  ;;  %v2183_v20 = vpop.permute.xlu0 %2182  ;;  %v4331_v33 = vcombine.low %v2674_v21, %v2684_v27  ;;  %v2698_v32 = vsel %vm4998_vm5, %v2693_v22, %v2697_v60  ;;  %v628_v34 = vshll.u32 %v358_v9, 16  ;;  %v3124_v37 = vsel %vm4957_vm2, %v3122_v28, %v3123_v17  ;;  %v907_v58 = vld [vmem:[%s4955_s28 + $0x80] sm:$0x1]  ;;  %v908_v17 = vld [vmem:[%s4955_s28 + $0x84] sm:$0xe] }
  0xd2   : > { %2229 = vst.msk [vmem:[#allocation2 + $0x10] sm:$0xff] %vm2226_vm11, %v2183_v20  ;;  %2374 = vrot.lane.b32.xlu1 %v4749_v10, %s4876_s7  ;;  %v624_v38 = vrot.slane %v622_v30, 5  ;;  %v632_v40 = vshrl.u32 %v358_v9, 16  ;;  %v638_v41 = vshll.u32 %v359_v14, 16  ;;  %v2708_v44 = vsel %vm4998_vm5, %v2703_v39, %v2707_v12  ;;  %v909_v18 = vld [vmem:[%s4955_s28 + $0x88] sm:$0xf] }
  0xd3   : > { %2917 = vrot.lane.b32.xlu0 %v4331_v33, %s4877_s8  ;;  %v4411_v45 = vcombine.low %v3121_v24, %v3124_v37  ;;  %v630_v46 = vrot.slane %v628_v34, 5  ;;  %v4396_v47 = vrot.slane %v4366_v19, 9  ;;  %v4332_v49 = vcombine.low %v2698_v32, %v2708_v44  ;;  %v910_v24 = vld [vmem:[%s4955_s28 + $0x8c] sm:$0x1]  ;;  %v4113_v25 = vld [vmem:[%s4955_s28 + $0x84] sm:$0xf] }
  0xd4   : > { %v2185_v36 = vpop.permute.xlu1 %2184  ;;  %v625_v50 = vor.u32 %v624_v38, %v621_v29  ;;  %v634_v51 = vrot.slane %v632_v40, 4  ;;  %v640_v52 = vrot.slane %v638_v41, 5  ;;  %v3127_v55 = vrot.slane %v4367_v31, 5  ;;  %v4114_v31 = vld [vmem:[%s4955_s28 + $0x88] sm:$0xf] }
  0xd5   : > { %2230 = vst.msk [vmem:[#allocation2 + $0x18] sm:$0xff] %vm2226_vm11, %v2185_v36  ;;  %v2361_v43 = vpop.permute.xlu0 %2360  ;;  %v3130_v56 = vrot.slane %v4368_v35, 5  ;;  %v643_v59 = vshrl.u32 %v360_v42, 16  ;;  %v646_v61 = vshll.u32 %v360_v42, 16  ;;  %v652_v2 = vshll.u32 %v361_v48, 16 }
  0xd6   : > { %2407 = vst.msk [vmem:[#allocation2 + $0x10] sm:$0xff] %vm2404_vm12, %v2361_v43  ;;  %2919 = vrot.lane.b32.xlu1 %v4332_v49, %s4877_s8  ;;  %v626_v63 = vrot.slane %v625_v50, 4  ;;  %v635_v1 = vor.u32 %v634_v51, %v630_v46  ;;  %v656_v4 = vshrl.u32 %v361_v48, 16  ;;  %v3128_v7 = vsel %vm4957_vm2, %v4396_v47, %v3127_v55  ;;  %v4115_v43 = vld [vmem:[%s4955_s28 + $0x8c] sm:$0x1] }
  0xd7   : > { %3238 = vrot.lane.b32.xlu0 %v4411_v45, %s4878_s9  ;;  %v3129_v54 = vrot.slane %v3127_v55, 4  ;;  %v645_v60 = vrot.slane %v643_v59, 4  ;;  %v648_v3 = vrot.slane %v646_v61, 5  ;;  %v654_v26 = vrot.slane %v652_v2, 5  ;;  %v4117_v51 = vld [vmem:[%s4955_s28 + $0x94] sm:$0xf] }
  0xd8   : > { %v2363_v62 = vpop.permute.xlu1 %2362  ;;  %v631_v10 = vsel %vm4998_vm5, %v626_v63, %v630_v46  ;;  %v636_v11 = vrot.slane %v635_v1, 4  ;;  %v658_v13 = vrot.slane %v656_v4, 4  ;;  %v662_v16 = vshll.u32 %v362_v57, 16  ;;  %v4116_v46 = vld [vmem:[%s4955_s28 + $0x90] sm:$0xf]  ;;  %v4751_v2 = vld [vmem:[%s4955_s28 + $0x84] sm:$0xff]  }
  0xd9   : > { %2408 = vst.msk [vmem:[#allocation2 + $0x18] sm:$0xff] %vm2404_vm12, %v2363_v62  ;;  %v2906_v9 = vpop.permute.xlu0 %2905  ;;  %v3131_v14 = vsel %vm4957_vm2, %v3129_v54, %v3130_v56  ;;  %v649_v15 = vor.u32 %v648_v3, %v645_v60  ;;  %v4013_v12 = vrot.slane %v905_v5, 9  ;;  %v1046_v23 = vrot.slane %v906_v8, 5  ;;  %v4177_v63 = vld [vmem:[%s4955_s28 + $0x84] sm:$0xe] }
  0xda   : > { %2952 = vst.msk [vmem:[#allocation2 + $0x10] sm:$0xff] %vm2949_vm13, %v2906_v9  ;;  %v641_v20 = vsel %vm4998_vm5, %v636_v11, %v640_v52  ;;  %v4412_v21 = vcombine.low %v3128_v7, %v3131_v14  ;;  %v659_v22 = vor.u32 %v658_v13, %v654_v26  ;;  %v664_v29 = vrot.slane %v662_v16, 5  ;;  %v4118_v52 = vld [vmem:[%s4955_s28 + $0x98] sm:$0x1]  ;;  %v4178_v7 = vld [vmem:[%s4955_s28 + $0x88] sm:$0xf] }
  0xdb   : > { %v3997_v27 = vcombine.low %v631_v10, %v641_v20  ;;  %v650_v28 = vrot.slane %v649_v15, 4  ;;  %v1049_v30 = vrot.slane %v907_v58, 5  ;;  %v1047_v39 = vsel %vm4957_vm2, %v4013_v12, %v1046_v23  ;;  %v4179_v9 = vld [vmem:[%s4955_s28 + $0x8c] sm:$0x1]  ;;  %v4180_v58 = vld [vmem:[%s4955_s28 + $0x90] sm:$0xe] }
  0xdc   : > { %v2908_v19 = vpop.permute.xlu1 %2907  ;;  %3240 = vrot.lane.b32.xlu0 %v4412_v21, %s4878_s9  ;;  %v660_v32 = vrot.slane %v659_v22, 4  ;;  %v1048_v34 = vrot.slane %v1046_v23, 4  ;;  %v4014_v35 = vrot.slane %v908_v17, 9  ;;  %v1053_v37 = vrot.slane %v909_v18, 5  ;;  %v4181_v14 = vld [vmem:[%s4955_s28 + $0x94] sm:$0xf] }
  0xdd   : > { %2953 = vst.msk [vmem:[#allocation2 + $0x18] sm:$0xff] %vm2949_vm13, %v2908_v19  ;;  %v3227_v33 = vpop.permute.xlu0 %3226  ;;  %830 = vrot.lane.b32.xlu1 %v3997_v27, %s4874_s5  ;;  %v655_v36 = vsel %vm4998_vm5, %v650_v28, %v654_v26  ;;  %v1056_v38 = vrot.slane %v910_v24, 5  ;;  %v1666_v40 = vshrl.u32 %v4113_v25, 16  ;;  %v1669_v44 = vshll.u32 %v4113_v25, 16  ;;  %v4182_v15 = vld [vmem:[%s4955_s28 + $0x98] sm:$0x1] }
  0xde   : > { %3273 = vst.msk [vmem:[#allocation2 + $0x10] sm:$0xff] %vm3270_vm14, %v3227_v33  ;;  %v665_v41 = vsel %vm4998_vm5, %v660_v32, %v664_v29  ;;  %v1050_v42 = vsel %vm4957_vm2, %v1048_v34, %v1049_v30  ;;  %v1675_v45 = vshll.u32 %v4114_v31, 16  ;;  %v1054_v49 = vsel %vm4957_vm2, %v4014_v35, %v1053_v37  ;;  %v4752_v20 = vld [vmem:[%s4955_s28 + $0x90] sm:$0xff]  }
  0xdf   : > { %v3998_v47 = vcombine.low %v655_v36, %v665_v41  ;;  %v4029_v48 = vcombine.low %v1047_v39, %v1050_v42  ;;  %v1055_v50 = vrot.slane %v1053_v37, 4  ;;  %v1668_v57 = vrot.slane %v1666_v40, 4  ;;  %v4305_v35 = vld [vmem:[%s4955_s28 + $0x90] sm:$0xf]  ;;  %v4306_v42 = vld [vmem:[%s4955_s28 + $0x94] sm:$0xf] }
  0xe0   : > { %v1671_v59 = vrot.slane %v1669_v44, 5  ;;  %v1677_v61 = vrot.slane %v1675_v45, 5  ;;  %v1679_v62 = vshrl.u32 %v4114_v31, 16  ;;  %v1685_v4 = vshll.u32 %v4115_v43, 16 }
  0xe1   : > { %v3229_v56 = vpop.permute.xlu0 %3228  ;;  %832 = vrot.lane.b32.xlu1 %v3998_v47, %s4874_s5  ;;  %1154 = vrot.lane.b32.xlu0 %v4029_v48, %s4873_s4  ;;  %v1057_v1 = vsel %vm4957_vm2, %v1055_v50, %v1056_v38  ;;  %v1690_v5 = vshrl.u32 %v4116_v46, 16  ;;  %v1693_v6 = vshll.u32 %v4116_v46, 16  ;;  %v1699_v8 = vshll.u32 %v4117_v51, 16  ;;  %v4307_v47 = vld [vmem:[%s4955_s28 + $0x98] sm:$0x1] }
  0xe2   : > { %v819_v55 = vpop.permute.xlu1 %818  ;;  %3274 = vst.msk [vmem:[#allocation2 + $0x18] sm:$0xff] %vm3270_vm14, %v3229_v56  ;;  %v4030_v54 = vcombine.low %v1054_v49, %v1057_v1  ;;  %v1672_v60 = vor.u32 %v1671_v59, %v1668_v57  ;;  %v1681_v3 = vrot.slane %v1679_v62, 4  ;;  %v1687_v10 = vrot.slane %v1685_v4, 5  ;;  %v4308_v56 = vld [vmem:[%s4955_s28 + $0x9c] sm:$0xf] }
  0xe3   : > { %863 = vst.msk [vmem:[#allocation2 + $0x20] sm:$0xff] %vm858_vm7, %v819_v55  ;;  %v1692_v11 = vrot.slane %v1690_v5, 4  ;;  %v1695_v26 = vrot.slane %v1693_v6, 5  ;;  %v1703_v13 = vshrl.u32 %v4117_v51, 16  ;;  %v1701_v18 = vrot.slane %v1699_v8, 5 }
  0xe4   : > { %v1673_v12 = vrot.slane %v1672_v60, 4  ;;  %v1682_v17 = vor.u32 %v1681_v3, %v1677_v61  ;;  %v1709_v19 = vshll.u32 %v4118_v52, 16  ;;  %v4205_v23 = vrot.slane %v4177_v63, 9  ;;  %v4309_v57 = vld [vmem:[%s4955_s28 + $0xa0] sm:$0xf] }
  0xe5   : > { %v3289_v16 = vld [vmem:[#allocation2 + $0x10] sm:$0xff]  ;;  %1156 = vrot.lane.b32.xlu1 %v4030_v54, %s4873_s4  ;;  %1332 = vrot.lane.b32.xlu0 %v4751_v2, %s4871_s29  ;;  %v1696_v21 = vor.u32 %v1695_v26, %v1692_v11  ;;  %v1705_v22 = vrot.slane %v1703_v13, 4  ;;  %v2090_v24 = vrot.slane %v4178_v7, 5  ;;  %v2093_v30 = vrot.slane %v4179_v9, 5  ;;  %v4310_v6 = vld [vmem:[%s4955_s28 + $0xa4] sm:$0x1] }
  0xe6   : > { %4634 = vmatprep.mubr.msk.bf16.mxu0 %vm3323_vm0, %v3289_v16  ;;  %v1678_v27 = vsel %vm4998_vm5, %v1673_v12, %v1677_v61  ;;  %v1683_v28 = vrot.slane %v1682_v17, 4  ;;  %v1711_v29 = vrot.slane %v1709_v19, 5  ;;  %v4206_v38 = vrot.slane %v4180_v58, 9  ;;  %v4755_v54 = vld [vmem:[%s4955_s28 + $0x90] sm:$0xff]   ;;  %v4371_v19 = vld [vmem:[%s4955_s28 + $0x98] sm:$0x1] }
  0xe7   : > { %v1143_v25 = vpop.permute.xlu0 %1142  ;;  %v1697_v33 = vrot.slane %v1696_v21, 4  ;;  %v1706_v32 = vor.u32 %v1705_v22, %v1701_v18  ;;  %v2091_v39 = vsel %vm4957_vm2, %v4205_v23, %v2090_v24  ;;  %v2092_v34 = vrot.slane %v2090_v24, 4  ;;  %v4369_v9 = vld [vmem:[%s4955_s28 + $0x90] sm:$0xe] }
  0xe8   : > { %v821_v31 = vpop.permute.xlu1 %820  ;;  %1187 = vst.msk [vmem:[#allocation2 + $0x20] sm:$0xff] %vm1182_vm8, %v1143_v25  ;;  %v1688_v37 = vsel %vm4998_vm5, %v1683_v28, %v1687_v10  ;;  %v2097_v40 = vrot.slane %v4181_v14, 5  ;;  %v2100_v41 = vrot.slane %v4182_v15, 5  ;;  %v2710_v55 = vshrl.u32 %v4305_v35, 16  ;;  %v4370_v14 = vld [vmem:[%s4955_s28 + $0x94] sm:$0xf] }
  0xe9   : > { %864 = vst.msk [vmem:[#allocation2 + $0x28] sm:$0xff] %vm858_vm7, %v821_v31  ;;  %v3290_v36 = vld [vmem:[#allocation2 + $0x18] sm:$0xff]  ;;  %1334 = vrot.lane.b32.xlu1 %v4752_v20, %s4871_s29  ;;  %v4141_v43 = vcombine.low %v1678_v27, %v1688_v37  ;;  %v1702_v44 = vsel %vm4998_vm5, %v1697_v33, %v1701_v18  ;;  %v1707_v45 = vrot.slane %v1706_v32, 4  ;;  %v2094_v46 = vsel %vm4957_vm2, %v2092_v34, %v2093_v30  ;;  %v363_v20 = vld [vmem:[%s4955_s28 + $0x90] sm:$0xf] }
  0xea   : > { %4635 = vmatmul.mubr.msk.bf16.gmra.mrb[4].mxu0 %vm3323_vm0, %v3290_v36  ;;  %v4221_v49 = vcombine.low %v2091_v39, %v2094_v46  ;;  %v2098_v50 = vsel %vm4957_vm2, %v4206_v38, %v2097_v40  ;;  %v2099_v51 = vrot.slane %v2097_v40, 4  ;;  %v2713_v61 = vshll.u32 %v4305_v35, 16  ;;  %v364_v25 = vld [vmem:[%s4955_s28 + $0x94] sm:$0xf]  ;;  %v365_v31 = vld [vmem:[%s4955_s28 + $0x98] sm:$0x1] }
  0xeb   : > { %v1321_v48 = vpop.permute.xlu0 %1320  ;;  %1877 = vrot.lane.b32.xlu0 %v4141_v43, %s4875_s6  ;;  %v1712_v59 = vsel %vm4998_vm5, %v1707_v45, %v1711_v29  ;;  %v2719_v62 = vshll.u32 %v4306_v42, 16  ;;  %v2723_v63 = vshrl.u32 %v4306_v42, 16  ;;  %v2712_v4 = vrot.slane %v2710_v55, 4  ;;  %v4756_v33 = vld [vmem:[%s4955_s28 + $0x9c] sm:$0xff]  }
  0xec   : > { %v1145_v52 = vpop.permute.xlu1 %1144  ;;  %1365 = vst.msk [vmem:[#allocation2 + $0x20] sm:$0xff] %vm1360_vm9, %v1321_v48  ;;  %v4142_v1 = vcombine.low %v1702_v44, %v1712_v59  ;;  %v2101_v2 = vsel %vm4957_vm2, %v2099_v51, %v2100_v41  ;;  %v2729_v5 = vshll.u32 %v4307_v47, 16  ;;  %v2715_v60 = vrot.slane %v2713_v61, 5  ;;  %v4372_v43 = vld [vmem:[%s4955_s28 + $0x9c] sm:$0xe]  ;;  %v4771_v44 = vld [vmem:[%s4955_s28 + $0x90] sm:$0xff]  }
  0xed   : > { %1188 = vst.msk [vmem:[#allocation2 + $0x28] sm:$0xff] %vm1182_vm8, %v1145_v52  ;;  %v4222_v7 = vcombine.low %v2098_v50, %v2101_v2  ;;  %v2721_v3 = vrot.slane %v2719_v62, 5  ;;  %v2725_v8 = vrot.slane %v2723_v63, 4  ;;  %v2734_v11 = vshrl.u32 %v4308_v56, 16  ;;  %v4373_v55 = vld [vmem:[%s4955_s28 + $0xa0] sm:$0xf] }
  0xee   : > { %1879 = vrot.lane.b32.xlu1 %v4142_v1, %s4875_s6  ;;  %v2731_v10 = vrot.slane %v2729_v5, 5  ;;  %v2737_v26 = vshll.u32 %v4308_v56, 16  ;;  %v2743_v13 = vshll.u32 %v4309_v57, 16  ;;  %v2716_v16 = vor.u32 %v2715_v60, %v2712_v4  ;;  %323 = vst.msk [vmem:[#allocation2 + $0x60] sm:$0xff] %vm310_vm6, %v4771_v44  ;;  %v4374_v62 = vld [vmem:[%s4955_s28 + $0xa4] sm:$0x1] }
  0xef   : > { %2198 = vrot.lane.b32.xlu0 %v4221_v49, %s4872_s30  ;;  %v2726_v12 = vor.u32 %v2725_v8, %v2721_v3  ;;  %v2747_v17 = vshrl.u32 %v4309_v57, 16  ;;  %v2753_v18 = vshll.u32 %v4310_v6, 16  ;;  %v2736_v21 = vrot.slane %v2734_v11, 4  ;;  %v366_v63 = vld [vmem:[%s4955_s28 + $0x9c] sm:$0xf] }
  0xf0   : > { %v1323_v58 = vpop.permute.xlu1 %1322  ;;  %v1866_v15 = vpop.permute.xlu0 %1865  ;;  %v2739_v22 = vrot.slane %v2737_v26, 5  ;;  %v2745_v23 = vrot.slane %v2743_v13, 5  ;;  %v4397_v24 = vrot.slane %v4369_v9, 9  ;;  %v2717_v27 = vrot.slane %v2716_v16, 4  ;;  %v4772_v60 = vld [vmem:[%s4955_s28 + $0x9c] sm:$0xff]  }
  0xf1   : > { %1366 = vst.msk [vmem:[#allocation2 + $0x28] sm:$0xff] %vm1360_vm9, %v1323_v58  ;;  %v2727_v28 = vrot.slane %v2726_v12, 4  ;;  %v2749_v29 = vrot.slane %v2747_v17, 4  ;;  %v2755_v30 = vrot.slane %v2753_v18, 5  ;;  %v3134_v39 = vrot.slane %v4370_v14, 5 }
  0xf2   : > { %1910 = vst.msk [vmem:[#allocation2 + $0x20] sm:$0xff] %vm1905_vm10, %v1866_v15  ;;  %2200 = vrot.lane.b32.xlu1 %v4222_v7, %s4872_s30  ;;  %v2740_v32 = vor.u32 %v2739_v22, %v2736_v21  ;;  %v3137_v34 = vrot.slane %v4371_v19, 5  ;;  %v667_v35 = vshrl.u32 %v363_v20, 16  ;;  %v2722_v38 = vsel %vm4998_vm5, %v2717_v27, %v2721_v3  ;;  %v368_v11 = vld [vmem:[%s4955_s28 + $0xa4] sm:$0x1] }
  0xf3   : > { %2376 = vrot.lane.b32.xlu0 %v4755_v54, %s4876_s7  ;;  %v2732_v40 = vsel %vm4998_vm5, %v2727_v28, %v2731_v10  ;;  %v2750_v41 = vor.u32 %v2749_v29, %v2745_v23  ;;  %v670_v42 = vshll.u32 %v363_v20, 16  ;;  %v3135_v47 = vsel %vm4957_vm2, %v4397_v24, %v3134_v39  ;;  %v367_v54 = vld [vmem:[%s4955_s28 + $0xa0] sm:$0xf]  ;;  %v911_v15 = vld [vmem:[%s4955_s28 + $0x90] sm:$0xe]  ;;  %324 = vst.msk [vmem:[#allocation2 + $0x68] sm:$0xff] %vm310_vm6, %v4772_v60 }
  0xf4   : > { %v1868_v36 = vpop.permute.xlu1 %1867  ;;  %v2187_v37 = vpop.permute.xlu0 %2186  ;;  %v4333_v45 = vcombine.low %v2722_v38, %v2732_v40  ;;  %v2741_v46 = vrot.slane %v2740_v32, 4  ;;  %v3136_v48 = vrot.slane %v3134_v39, 4  ;;  %v669_v50 = vrot.slane %v667_v35, 4  ;;  %v912_v19 = vld [vmem:[%s4955_s28 + $0x94] sm:$0xf] }
  0xf5   : > { %1911 = vst.msk [vmem:[#allocation2 + $0x28] sm:$0xff] %vm1905_vm10, %v1868_v36  ;;  %v2751_v49 = vrot.slane %v2750_v41, 4  ;;  %v672_v51 = vrot.slane %v670_v42, 5  ;;  %v676_v52 = vshll.u32 %v364_v25, 16  ;;  %v680_v59 = vshrl.u32 %v364_v25, 16 }
  0xf6   : > { %2231 = vst.msk [vmem:[#allocation2 + $0x20] sm:$0xff] %vm2226_vm11, %v2187_v37  ;;  %2378 = vrot.lane.b32.xlu1 %v4756_v33, %s4876_s7  ;;  %v2746_v56 = vsel %vm4998_vm5, %v2741_v46, %v2745_v23  ;;  %v3138_v57 = vsel %vm4957_vm2, %v3136_v48, %v3137_v34  ;;  %v686_v61 = vshll.u32 %v365_v31, 16  ;;  %v4398_v10 = vrot.slane %v4372_v43, 9  ;;  %v913_v31 = vld [vmem:[%s4955_s28 + $0x98] sm:$0x1] }
  0xf7   : > { %2921 = vrot.lane.b32.xlu0 %v4333_v45, %s4877_s8  ;;  %v2756_v4 = vsel %vm4998_vm5, %v2751_v49, %v2755_v30  ;;  %v4413_v5 = vcombine.low %v3135_v47, %v3138_v57  ;;  %v673_v6 = vor.u32 %v672_v51, %v669_v50  ;;  %v678_v7 = vrot.slane %v676_v52, 5  ;;  %v914_v35 = vld [vmem:[%s4955_s28 + $0x9c] sm:$0xe]  ;;  %v915_v41 = vld [vmem:[%s4955_s28 + $0xa0] sm:$0xf] }
  0xf8   : > { %v2189_v1 = vpop.permute.xlu1 %2188  ;;  %v2365_v2 = vpop.permute.xlu0 %2364  ;;  %v4334_v3 = vcombine.low %v2746_v56, %v2756_v4  ;;  %v682_v8 = vrot.slane %v680_v59, 4  ;;  %v688_v9 = vrot.slane %v686_v61, 5  ;;  %v3141_v13 = vrot.slane %v4373_v55, 5  ;;  %v916_v42 = vld [vmem:[%s4955_s28 + $0xa4] sm:$0x1] }
  0xf9   : > { %2232 = vst.msk [vmem:[#allocation2 + $0x28] sm:$0xff] %vm2226_vm11, %v2189_v1  ;;  %v674_v26 = vrot.slane %v673_v6, 4  ;;  %v3144_v58 = vrot.slane %v4374_v62, 5  ;;  %v691_v14 = vshrl.u32 %v366_v63, 16  ;;  %v694_v12 = vshll.u32 %v366_v63, 16 }
  0xfa   : > { %2409 = vst.msk [vmem:[#allocation2 + $0x20] sm:$0xff] %vm2404_vm12, %v2365_v2  ;;  %2923 = vrot.lane.b32.xlu1 %v4334_v3, %s4877_s8  ;;  %v683_v16 = vor.u32 %v682_v8, %v678_v7  ;;  %v700_v17 = vshll.u32 %v367_v54, 16  ;;  %v704_v18 = vshrl.u32 %v367_v54, 16  ;;  %v3142_v22 = vsel %vm4957_vm2, %v4398_v10, %v3141_v13  ;;  %v4119_v44 = vld [vmem:[%s4955_s28 + $0x9c] sm:$0xf] }
  0xfb   : > { %3242 = vrot.lane.b32.xlu0 %v4413_v5, %s4878_s9  ;;  %v679_v21 = vsel %vm4998_vm5, %v674_v26, %v678_v7  ;;  %v3143_v23 = vrot.slane %v3141_v13, 4  ;;  %v693_v24 = vrot.slane %v691_v14, 4  ;;  %v696_v28 = vrot.slane %v694_v12, 5  ;;  %v4120_v49 = vld [vmem:[%s4955_s28 + $0xa0] sm:$0xf] }
  0xfc   : > { %v2367_v20 = vpop.permute.xlu1 %2366  ;;  %v684_v27 = vrot.slane %v683_v16, 4  ;;  %v702_v29 = vrot.slane %v700_v17, 5  ;;  %v706_v30 = vrot.slane %v704_v18, 4  ;;  %v710_v32 = vshll.u32 %v368_v11, 16  ;;  %v4121_v4 = vld [vmem:[%s4955_s28 + $0xa4] sm:$0x1] }
  0xfd   : > { %2410 = vst.msk [vmem:[#allocation2 + $0x28] sm:$0xff] %vm2404_vm12, %v2367_v20  ;;  %v2910_v25 = vpop.permute.xlu0 %2909  ;;  %v3145_v33 = vsel %vm4957_vm2, %v3143_v23, %v3144_v58  ;;  %v4015_v39 = vrot.slane %v911_v15, 9  ;;  %v1060_v34 = vrot.slane %v912_v19, 5  ;;  %v697_v38 = vor.u32 %v696_v28, %v693_v24  ;;  %v4122_v6 = vld [vmem:[%s4955_s28 + $0xa8] sm:$0xf]  ;;  %v4757_v17 = vld [vmem:[%s4955_s28 + $0x9c] sm:$0xff]  }
  0xfe   : > { %2954 = vst.msk [vmem:[#allocation2 + $0x20] sm:$0xff] %vm2949_vm13, %v2910_v25  ;;  %v689_v36 = vsel %vm4998_vm5, %v684_v27, %v688_v9  ;;  %v4414_v37 = vcombine.low %v3142_v22, %v3145_v33  ;;  %v707_v40 = vor.u32 %v706_v30, %v702_v29  ;;  %v712_v46 = vrot.slane %v710_v32, 5  ;;  %v4123_v8 = vld [vmem:[%s4955_s28 + $0xac] sm:$0xf]  ;;  %v4124_v9 = vld [vmem:[%s4955_s28 + $0xb0] sm:$0x1] }
  0xff   : > { %v3999_v45 = vcombine.low %v679_v21, %v689_v36  ;;  %v1061_v47 = vsel %vm4957_vm2, %v4015_v39, %v1060_v34  ;;  %v1062_v48 = vrot.slane %v1060_v34, 4  ;;  %v698_v51 = vrot.slane %v697_v38, 4  ;;  %v4183_v15 = vld [vmem:[%s4955_s28 + $0x9c] sm:$0xe]  ;;  %v4184_v16 = vld [vmem:[%s4955_s28 + $0xa0] sm:$0xf] }
 0x100   : > { %v2912_v43 = vpop.permute.xlu1 %2911  ;;  %3244 = vrot.lane.b32.xlu0 %v4414_v37, %s4878_s9  ;;  %v708_v52 = vrot.slane %v707_v40, 4  ;;  %v1063_v55 = vrot.slane %v913_v31, 5  ;;  %v4016_v56 = vrot.slane %v914_v35, 9  ;;  %v1067_v57 = vrot.slane %v915_v41, 5  ;;  %v4185_v21 = vld [vmem:[%s4955_s28 + $0xa4] sm:$0x1] }
 0x101   : > { %2955 = vst.msk [vmem:[#allocation2 + $0x28] sm:$0xff] %vm2949_vm13, %v2912_v43  ;;  %v3231_v50 = vpop.permute.xlu0 %3230  ;;  %834 = vrot.lane.b32.xlu1 %v3999_v45, %s4874_s5  ;;  %v1070_v59 = vrot.slane %v916_v42, 5  ;;  %v1714_v61 = vshrl.u32 %v4119_v44, 16  ;;  %v1717_v62 = vshll.u32 %v4119_v44, 16  ;;  %v703_v63 = vsel %vm4998_vm5, %v698_v51, %v702_v29  ;;  %v4186_v31 = vld [vmem:[%s4955_s28 + $0xa8] sm:$0xe] }
 0x102   : > { %3275 = vst.msk [vmem:[#allocation2 + $0x20] sm:$0xff] %vm3270_vm14, %v3231_v50  ;;  %v713_v1 = vsel %vm4998_vm5, %v708_v52, %v712_v46  ;;  %v1064_v2 = vsel %vm4957_vm2, %v1062_v48, %v1063_v55  ;;  %v1723_v5 = vshll.u32 %v4120_v49, 16  ;;  %v1068_v60 = vsel %vm4957_vm2, %v4016_v56, %v1067_v57  ;;  %v4187_v33 = vld [vmem:[%s4955_s28 + $0xac] sm:$0xf]  ;;  %v4188_v43 = vld [vmem:[%s4955_s28 + $0xb0] sm:$0x1] }
 0x103   : > { %v4000_v7 = vcombine.low %v703_v63, %v713_v1  ;;  %v4031_v54 = vcombine.low %v1061_v47, %v1064_v2  ;;  %v1069_v3 = vrot.slane %v1067_v57, 4  ;;  %v1716_v26 = vrot.slane %v1714_v61, 4  ;;  %v4758_v37 = vld [vmem:[%s4955_s28 + $0xa8] sm:$0xff]  }
 0x104   : > { %v1719_v13 = vrot.slane %v1717_v62, 5  ;;  %v1725_v58 = vrot.slane %v1723_v5, 5  ;;  %v1727_v14 = vshrl.u32 %v4120_v49, 16  ;;  %v1733_v18 = vshll.u32 %v4121_v4, 16  ;;  %v4311_v56 = vld [vmem:[%s4955_s28 + $0xa8] sm:$0xf] }
 0x105   : > { %v3233_v11 = vpop.permute.xlu0 %3232  ;;  %836 = vrot.lane.b32.xlu1 %v4000_v7, %s4874_s5  ;;  %1158 = vrot.lane.b32.xlu0 %v4031_v54, %s4873_s4  ;;  %v1071_v12 = vsel %vm4957_vm2, %v1069_v3, %v1070_v59  ;;  %v1738_v19 = vshrl.u32 %v4122_v6, 16  ;;  %v1741_v20 = vshll.u32 %v4122_v6, 16  ;;  %v1747_v25 = vshll.u32 %v4123_v8, 16  ;;  %v4312_v1 = vld [vmem:[%s4955_s28 + $0xac] sm:$0xf] }
 0x106   : > { %v823_v10 = vpop.permute.xlu1 %822  ;;  %3276 = vst.msk [vmem:[#allocation2 + $0x28] sm:$0xff] %vm3270_vm14, %v3233_v11  ;;  %v4032_v22 = vcombine.low %v1068_v60, %v1071_v12  ;;  %v1720_v23 = vor.u32 %v1719_v13, %v1716_v26  ;;  %v1729_v24 = vrot.slane %v1727_v14, 4  ;;  %v1735_v27 = vrot.slane %v1733_v18, 5  ;;  %v4313_v7 = vld [vmem:[%s4955_s28 + $0xb0] sm:$0x1] }
 0x107   : > { %865 = vst.msk [vmem:[#allocation2 + $0x30] sm:$0xff] %vm858_vm7, %v823_v10  ;;  %v1740_v28 = vrot.slane %v1738_v19, 4  ;;  %v1743_v29 = vrot.slane %v1741_v20, 5  ;;  %v1751_v30 = vshrl.u32 %v4123_v8, 16  ;;  %v1749_v35 = vrot.slane %v1747_v25, 5 }
 0x108   : > { %v1721_v39 = vrot.slane %v1720_v23, 4  ;;  %v1730_v34 = vor.u32 %v1729_v24, %v1725_v58  ;;  %v1757_v36 = vshll.u32 %v4124_v9, 16  ;;  %v4207_v41 = vrot.slane %v4183_v15, 9  ;;  %v4314_v54 = vld [vmem:[%s4955_s28 + $0xb4] sm:$0xf] }
 0x109   : > { %v3291_v32 = vld [vmem:[#allocation2 + $0x20] sm:$0xff]  ;;  %1160 = vrot.lane.b32.xlu1 %v4032_v22, %s4873_s4  ;;  %1336 = vrot.lane.b32.xlu0 %v4757_v17, %s4871_s29  ;;  %v1744_v38 = vor.u32 %v1743_v29, %v1740_v28  ;;  %v1753_v40 = vrot.slane %v1751_v30, 4  ;;  %v2104_v42 = vrot.slane %v4184_v16, 5  ;;  %v2107_v48 = vrot.slane %v4185_v21, 5  ;;  %v4315_v15 = vld [vmem:[%s4955_s28 + $0xb8] sm:$0xf] }
 0x10a   : > { %4638 = vmatprep.mubr.msk.bf16.mxu0 %vm3323_vm0, %v3291_v32  ;;  %v1726_v45 = vsel %vm4998_vm5, %v1721_v39, %v1725_v58  ;;  %v1731_v46 = vrot.slane %v1730_v34, 4  ;;  %v1759_v47 = vrot.slane %v1757_v36, 5  ;;  %v4208_v61 = vrot.slane %v4186_v31, 9  ;;  %v4316_v19 = vld [vmem:[%s4955_s28 + $0xbc] sm:$0x1]  ;;  %v4761_v22 = vld [vmem:[%s4955_s28 + $0xa8] sm:$0xff]  }
 0x10b   : > { %v1147_v44 = vpop.permute.xlu0 %1146  ;;  %v1745_v50 = vrot.slane %v1744_v38, 4  ;;  %v1754_v51 = vor.u32 %v1753_v40, %v1749_v35  ;;  %v2105_v52 = vsel %vm4957_vm2, %v4207_v41, %v2104_v42  ;;  %v2106_v55 = vrot.slane %v2104_v42, 4  ;;  %v4375_v20 = vld [vmem:[%s4955_s28 + $0xa8] sm:$0xe]  ;;  %v4377_v32 = vld [vmem:[%s4955_s28 + $0xb0] sm:$0x1] }
 0x10c   : > { %v825_v49 = vpop.permute.xlu1 %824  ;;  %1189 = vst.msk [vmem:[#allocation2 + $0x30] sm:$0xff] %vm1182_vm8, %v1147_v44  ;;  %v1736_v59 = vsel %vm4998_vm5, %v1731_v46, %v1735_v27  ;;  %v2111_v62 = vrot.slane %v4187_v33, 5  ;;  %v2114_v63 = vrot.slane %v4188_v43, 5  ;;  %v2758_v11 = vshrl.u32 %v4311_v56, 16  ;;  %v4376_v27 = vld [vmem:[%s4955_s28 + $0xac] sm:$0xf] }
 0x10d   : > { %866 = vst.msk [vmem:[#allocation2 + $0x38] sm:$0xff] %vm858_vm7, %v825_v49  ;;  %v3292_v57 = vld [vmem:[#allocation2 + $0x28] sm:$0xff]  ;;  %1338 = vrot.lane.b32.xlu1 %v4758_v37, %s4871_s29  ;;  %v4143_v2 = vcombine.low %v1726_v45, %v1736_v59  ;;  %v1750_v4 = vsel %vm4998_vm5, %v1745_v50, %v1749_v35  ;;  %v1755_v5 = vrot.slane %v1754_v51, 4  ;;  %v2108_v6 = vsel %vm4957_vm2, %v2106_v55, %v2107_v48  ;;  %v4762_v40 = vld [vmem:[%s4955_s28 + $0xb4] sm:$0xff]   ;;  %v371_v50 = vld [vmem:[%s4955_s28 + $0xb0] sm:$0x1] }
 0x10e   : > { %4639 = vmatmul.mubr.msk.bf16.gmra.mrb[8].mxu0 %vm3323_vm0, %v3292_v57  ;;  %v4223_v3 = vcombine.low %v2105_v52, %v2108_v6  ;;  %v2112_v8 = vsel %vm4957_vm2, %v4208_v61, %v2111_v62  ;;  %v2113_v9 = vrot.slane %v2111_v62, 4  ;;  %v2761_v13 = vshll.u32 %v4311_v56, 16  ;;  %v369_v38 = vld [vmem:[%s4955_s28 + $0xa8] sm:$0xf]  ;;  %v370_v45 = vld [vmem:[%s4955_s28 + $0xac] sm:$0xf] }
 0x10f   : > { %v1325_v60 = vpop.permute.xlu0 %1324  ;;  %1881 = vrot.lane.b32.xlu0 %v4143_v2, %s4875_s6  ;;  %v1760_v26 = vsel %vm4998_vm5, %v1755_v5, %v1759_v47  ;;  %v2767_v58 = vshll.u32 %v4312_v1, 16  ;;  %v2771_v14 = vshrl.u32 %v4312_v1, 16  ;;  %v2760_v17 = vrot.slane %v2758_v11, 4  ;;  %v4773_v61 = vld [vmem:[%s4955_s28 + $0xa8] sm:$0xff]  }
 0x110   : > { %v1149_v10 = vpop.permute.xlu1 %1148  ;;  %1367 = vst.msk [vmem:[#allocation2 + $0x30] sm:$0xff] %vm1360_vm9, %v1325_v60  ;;  %v4144_v16 = vcombine.low %v1750_v4, %v1760_v26  ;;  %v2115_v12 = vsel %vm4957_vm2, %v2113_v9, %v2114_v63  ;;  %v2777_v18 = vshll.u32 %v4313_v7, 16  ;;  %v2763_v23 = vrot.slane %v2761_v13, 5 }
 0x111   : > { %1190 = vst.msk [vmem:[#allocation2 + $0x38] sm:$0xff] %vm1182_vm8, %v1149_v10  ;;  %v4224_v21 = vcombine.low %v2112_v8, %v2115_v12  ;;  %v2769_v24 = vrot.slane %v2767_v58, 5  ;;  %v2773_v25 = vrot.slane %v2771_v14, 4  ;;  %v2782_v29 = vshrl.u32 %v4314_v54, 16  ;;  %v4379_v10 = vld [vmem:[%s4955_s28 + $0xb8] sm:$0xf] }
 0x112   : > { %1883 = vrot.lane.b32.xlu1 %v4144_v16, %s4875_s6  ;;  %v2779_v28 = vrot.slane %v2777_v18, 5  ;;  %v2785_v30 = vshll.u32 %v4314_v54, 16  ;;  %v2791_v31 = vshll.u32 %v4315_v15, 16  ;;  %v2764_v34 = vor.u32 %v2763_v23, %v2760_v17  ;;  %v4378_v54 = vld [vmem:[%s4955_s28 + $0xb4] sm:$0xe]  ;;  %325 = vst.msk [vmem:[#allocation2 + $0x70] sm:$0xff] %vm310_vm6, %v4773_v61 }
 0x113   : > { %2202 = vrot.lane.b32.xlu0 %v4223_v3, %s4872_s30  ;;  %v2774_v35 = vor.u32 %v2773_v25, %v2769_v24  ;;  %v2795_v36 = vshrl.u32 %v4315_v15, 16  ;;  %v2801_v37 = vshll.u32 %v4316_v19, 16  ;;  %v2784_v41 = vrot.slane %v2782_v29, 4  ;;  %v4380_v14 = vld [vmem:[%s4955_s28 + $0xbc] sm:$0x1] }
 0x114   : > { %v1327_v33 = vpop.permute.xlu1 %1326  ;;  %v1870_v39 = vpop.permute.xlu0 %1869  ;;  %v2787_v42 = vrot.slane %v2785_v30, 5  ;;  %v2793_v43 = vrot.slane %v2791_v31, 5  ;;  %v4399_v44 = vrot.slane %v4375_v20, 9  ;;  %v2765_v46 = vrot.slane %v2764_v34, 4  ;;  %v372_v15 = vld [vmem:[%s4955_s28 + $0xb4] sm:$0xf] }
 0x115   : > { %1368 = vst.msk [vmem:[#allocation2 + $0x38] sm:$0xff] %vm1360_vm9, %v1327_v33  ;;  %v2775_v47 = vrot.slane %v2774_v35, 4  ;;  %v2797_v48 = vrot.slane %v2795_v36, 4  ;;  %v2803_v49 = vrot.slane %v2801_v37, 5  ;;  %v3148_v52 = vrot.slane %v4376_v27, 5 }
 0x116   : > { %1912 = vst.msk [vmem:[#allocation2 + $0x30] sm:$0xff] %vm1905_vm10, %v1870_v39  ;;  %2204 = vrot.lane.b32.xlu1 %v4224_v21, %s4872_s30  ;;  %v2788_v51 = vor.u32 %v2787_v42, %v2784_v41  ;;  %v3151_v55 = vrot.slane %v4377_v32, 5  ;;  %v715_v56 = vshrl.u32 %v369_v38, 16  ;;  %v2770_v62 = vsel %vm4998_vm5, %v2765_v46, %v2769_v24  ;;  %v373_v21 = vld [vmem:[%s4955_s28 + $0xb8] sm:$0xf] }
 0x117   : > { %2380 = vrot.lane.b32.xlu0 %v4761_v22, %s4876_s7  ;;  %v2780_v63 = vsel %vm4998_vm5, %v2775_v47, %v2779_v28  ;;  %v2798_v1 = vor.u32 %v2797_v48, %v2793_v43  ;;  %v718_v2 = vshll.u32 %v369_v38, 16  ;;  %v3149_v6 = vsel %vm4957_vm2, %v4399_v44, %v3148_v52  ;;  %v4774_v22 = vld [vmem:[%s4955_s28 + $0xb4] sm:$0xff]   ;;  %v374_v28 = vld [vmem:[%s4955_s28 + $0xbc] sm:$0x1]  ;;  %v917_v32 = vld [vmem:[%s4955_s28 + $0xa8] sm:$0xe] }
 0x118   : > { %v1872_v57 = vpop.permute.xlu1 %1871  ;;  %v2191_v59 = vpop.permute.xlu0 %2190  ;;  %v4335_v4 = vcombine.low %v2770_v62, %v2780_v63  ;;  %v2789_v5 = vrot.slane %v2788_v51, 4  ;;  %v3150_v7 = vrot.slane %v3148_v52, 4  ;;  %v717_v3 = vrot.slane %v715_v56, 4  ;;  %326 = vst.msk [vmem:[#allocation2 + $0x78] sm:$0xff] %vm310_vm6, %v4774_v22  ;;  %v918_v37 = vld [vmem:[%s4955_s28 + $0xac] sm:$0xf] }
 0x119   : > { %1913 = vst.msk [vmem:[#allocation2 + $0x38] sm:$0xff] %vm1905_vm10, %v1872_v57  ;;  %v2799_v60 = vrot.slane %v2798_v1, 4  ;;  %v720_v8 = vrot.slane %v718_v2, 5  ;;  %v724_v9 = vshll.u32 %v370_v45, 16  ;;  %v728_v13 = vshrl.u32 %v370_v45, 16 }
 0x11a   : > { %2233 = vst.msk [vmem:[#allocation2 + $0x30] sm:$0xff] %vm2226_vm11, %v2191_v59  ;;  %2382 = vrot.lane.b32.xlu1 %v4762_v40, %s4876_s7  ;;  %v2794_v11 = vsel %vm4998_vm5, %v2789_v5, %v2793_v43  ;;  %v3152_v26 = vsel %vm4957_vm2, %v3150_v7, %v3151_v55  ;;  %v734_v58 = vshll.u32 %v371_v50, 16  ;;  %v4400_v27 = vrot.slane %v4378_v54, 9  ;;  %v919_v44 = vld [vmem:[%s4955_s28 + $0xb0] sm:$0x1] }
 0x11b   : > { %2925 = vrot.lane.b32.xlu0 %v4335_v4, %s4877_s8  ;;  %v2804_v17 = vsel %vm4998_vm5, %v2799_v60, %v2803_v49  ;;  %v4415_v18 = vcombine.low %v3149_v6, %v3152_v26  ;;  %v721_v19 = vor.u32 %v720_v8, %v717_v3  ;;  %v726_v20 = vrot.slane %v724_v9, 5  ;;  %v920_v45 = vld [vmem:[%s4955_s28 + $0xb4] sm:$0xe]  ;;  %v921_v51 = vld [vmem:[%s4955_s28 + $0xb8] sm:$0xf] }
 0x11c   : > { %v2193_v16 = vpop.permute.xlu1 %2192  ;;  %v2369_v12 = vpop.permute.xlu0 %2368  ;;  %v4336_v23 = vcombine.low %v2794_v11, %v2804_v17  ;;  %v730_v24 = vrot.slane %v728_v13, 4  ;;  %v736_v25 = vrot.slane %v734_v58, 5  ;;  %v3155_v30 = vrot.slane %v4379_v10, 5  ;;  %v922_v52 = vld [vmem:[%s4955_s28 + $0xbc] sm:$0x1] }
 0x11d   : > { %2234 = vst.msk [vmem:[#allocation2 + $0x38] sm:$0xff] %vm2226_vm11, %v2193_v16  ;;  %v722_v29 = vrot.slane %v721_v19, 4  ;;  %v3158_v31 = vrot.slane %v4380_v14, 5  ;;  %v739_v33 = vshrl.u32 %v372_v15, 16  ;;  %v742_v34 = vshll.u32 %v372_v15, 16 }
 0x11e   : > { %2411 = vst.msk [vmem:[#allocation2 + $0x30] sm:$0xff] %vm2404_vm12, %v2369_v12  ;;  %2927 = vrot.lane.b32.xlu1 %v4336_v23, %s4877_s8  ;;  %v731_v39 = vor.u32 %v730_v24, %v726_v20  ;;  %v748_v35 = vshll.u32 %v373_v21, 16  ;;  %v752_v36 = vshrl.u32 %v373_v21, 16  ;;  %v3156_v41 = vsel %vm4957_vm2, %v4400_v27, %v3155_v30  ;;  %v4125_v55 = vld [vmem:[%s4955_s28 + $0xb4] sm:$0xf] }
 0x11f   : > { %3246 = vrot.lane.b32.xlu0 %v4415_v18, %s4878_s9  ;;  %v727_v40 = vsel %vm4998_vm5, %v722_v29, %v726_v20  ;;  %v3157_v42 = vrot.slane %v3155_v30, 4  ;;  %v741_v43 = vrot.slane %v739_v33, 4  ;;  %v744_v48 = vrot.slane %v742_v34, 5  ;;  %v4126_v62 = vld [vmem:[%s4955_s28 + $0xb8] sm:$0xf] }
 0x120   : > { %v2371_v38 = vpop.permute.xlu1 %2370  ;;  %v732_v47 = vrot.slane %v731_v39, 4  ;;  %v750_v49 = vrot.slane %v748_v35, 5  ;;  %v754_v50 = vrot.slane %v752_v36, 4  ;;  %v758_v57 = vshll.u32 %v374_v28, 16  ;;  %v4127_v26 = vld [vmem:[%s4955_s28 + $0xbc] sm:$0x1] }
 0x121   : > { %2412 = vst.msk [vmem:[#allocation2 + $0x38] sm:$0xff] %vm2404_vm12, %v2371_v38  ;;  %v2914_v46 = vpop.permute.xlu0 %2913  ;;  %v3159_v56 = vsel %vm4957_vm2, %v3157_v42, %v3158_v31  ;;  %v4017_v59 = vrot.slane %v917_v32, 9  ;;  %v1074_v61 = vrot.slane %v918_v37, 5  ;;  %v745_v2 = vor.u32 %v744_v48, %v741_v43  ;;  %v4128_v13 = vld [vmem:[%s4955_s28 + $0xc0] sm:$0xf]  ;;  %v4763_v32 = vld [vmem:[%s4955_s28 + $0xb4] sm:$0xff]  }
 0x122   : > { %2956 = vst.msk [vmem:[#allocation2 + $0x30] sm:$0xff] %vm2949_vm13, %v2914_v46  ;;  %v737_v63 = vsel %vm4998_vm5, %v732_v47, %v736_v25  ;;  %v4416_v1 = vcombine.low %v3156_v41, %v3159_v56  ;;  %v755_v4 = vor.u32 %v754_v50, %v750_v49  ;;  %v760_v7 = vrot.slane %v758_v57, 5  ;;  %v4129_v24 = vld [vmem:[%s4955_s28 + $0xc4] sm:$0xf]  ;;  %v4130_v31 = vld [vmem:[%s4955_s28 + $0xc8] sm:$0x1] }
 0x123   : > { %v4001_v6 = vcombine.low %v727_v40, %v737_v63  ;;  %v1075_v54 = vsel %vm4957_vm2, %v4017_v59, %v1074_v61  ;;  %v1076_v60 = vrot.slane %v1074_v61, 4  ;;  %v746_v8 = vrot.slane %v745_v2, 4  ;;  %v4189_v36 = vld [vmem:[%s4955_s28 + $0xb4] sm:$0xe]  ;;  %v4190_v43 = vld [vmem:[%s4955_s28 + $0xb8] sm:$0xf] }
 0x124   : > { %v2916_v5 = vpop.permute.xlu1 %2915  ;;  %3248 = vrot.lane.b32.xlu0 %v4416_v1, %s4878_s9  ;;  %v756_v9 = vrot.slane %v755_v4, 4  ;;  %v1077_v10 = vrot.slane %v919_v44, 5  ;;  %v4018_v11 = vrot.slane %v920_v45, 9  ;;  %v1081_v58 = vrot.slane %v921_v51, 5  ;;  %v4191_v44 = vld [vmem:[%s4955_s28 + $0xbc] sm:$0x1] }
 0x125   : > { %2957 = vst.msk [vmem:[#allocation2 + $0x38] sm:$0xff] %vm2949_vm13, %v2916_v5  ;;  %v3235_v3 = vpop.permute.xlu0 %3234  ;;  %838 = vrot.lane.b32.xlu1 %v4001_v6, %s4874_s5  ;;  %v1084_v14 = vrot.slane %v922_v52, 5  ;;  %v1762_v15 = vshrl.u32 %v4125_v55, 16  ;;  %v1765_v16 = vshll.u32 %v4125_v55, 16  ;;  %v751_v12 = vsel %vm4998_vm5, %v746_v8, %v750_v49  ;;  %v4192_v49 = vld [vmem:[%s4955_s28 + $0xc0] sm:$0xe] }
 0x126   : > { %3277 = vst.msk [vmem:[#allocation2 + $0x30] sm:$0xff] %vm3270_vm14, %v3235_v3  ;;  %v761_v17 = vsel %vm4998_vm5, %v756_v9, %v760_v7  ;;  %v1078_v18 = vsel %vm4957_vm2, %v1076_v60, %v1077_v10  ;;  %v1771_v19 = vshll.u32 %v4126_v62, 16  ;;  %v1082_v22 = vsel %vm4957_vm2, %v4018_v11, %v1081_v58  ;;  %v4193_v57 = vld [vmem:[%s4955_s28 + $0xc4] sm:$0xf]  ;;  %v4194_v2 = vld [vmem:[%s4955_s28 + $0xc8] sm:$0x1] }
 0x127   : > { %v4002_v20 = vcombine.low %v751_v12, %v761_v17  ;;  %v4033_v21 = vcombine.low %v1075_v54, %v1078_v18  ;;  %v1083_v23 = vrot.slane %v1081_v58, 4  ;;  %v1764_v27 = vrot.slane %v1762_v15, 4  ;;  %v4764_v59 = vld [vmem:[%s4955_s28 + $0xc0] sm:$0xff]  }
 0x128   : > { %v1767_v28 = vrot.slane %v1765_v16, 5  ;;  %v1773_v29 = vrot.slane %v1771_v19, 5  ;;  %v1775_v30 = vshrl.u32 %v4126_v62, 16  ;;  %v1781_v39 = vshll.u32 %v4127_v26, 16  ;;  %v4317_v11 = vld [vmem:[%s4955_s28 + $0xc0] sm:$0xf] }
 0x129   : > { %v3237_v25 = vpop.permute.xlu0 %3236  ;;  %840 = vrot.lane.b32.xlu1 %v4002_v20, %s4874_s5  ;;  %1162 = vrot.lane.b32.xlu0 %v4033_v21, %s4873_s4  ;;  %v1085_v33 = vsel %vm4957_vm2, %v1083_v23, %v1084_v14  ;;  %v1786_v34 = vshrl.u32 %v4128_v13, 16  ;;  %v1789_v35 = vshll.u32 %v4128_v13, 16  ;;  %v1795_v41 = vshll.u32 %v4129_v24, 16  ;;  %v4318_v16 = vld [vmem:[%s4955_s28 + $0xc4] sm:$0xf] }
 0x12a   : > { %3278 = vst.msk [vmem:[#allocation2 + $0x38] sm:$0xff] %vm3270_vm14, %v3237_v25  ;;  %v4034_v37 = vcombine.low %v1082_v22, %v1085_v33  ;;  %v1768_v38 = vor.u32 %v1767_v28, %v1764_v27  ;;  %v1777_v40 = vrot.slane %v1775_v30, 4  ;;  %v1783_v45 = vrot.slane %v1781_v39, 5  ;;  %v4319_v20 = vld [vmem:[%s4955_s28 + $0xc8] sm:$0x1] }
 0x12b   : > { %v827_v42 = vpop.permute.xlu1 %826  ;;  %v1788_v46 = vrot.slane %v1786_v34, 4  ;;  %v1791_v47 = vrot.slane %v1789_v35, 5  ;;  %v1799_v48 = vshrl.u32 %v4129_v24, 16  ;;  %v1797_v55 = vrot.slane %v1795_v41, 5  ;;  %v4320_v28 = vld [vmem:[%s4955_s28 + $0xcc] sm:$0xf] }
 0x12c   : > { %867 = vst.msk [vmem:[#allocation2 + $0x40] sm:$0xff] %vm858_vm7, %v827_v42  ;;  %v1769_v51 = vrot.slane %v1768_v38, 4  ;;  %v1778_v52 = vor.u32 %v1777_v40, %v1773_v29  ;;  %v1805_v56 = vshll.u32 %v4130_v31, 16  ;;  %v4209_v63 = vrot.slane %v4189_v36, 9  ;;  %v4767_v40 = vld [vmem:[%s4955_s28 + $0xc0] sm:$0xff]  }
 0x12d   : > { %v3293_v50 = vld [vmem:[#allocation2 + $0x30] sm:$0xff]  ;;  %1164 = vrot.lane.b32.xlu1 %v4034_v37, %s4873_s4  ;;  %1340 = vrot.lane.b32.xlu0 %v4763_v32, %s4871_s29  ;;  %v1792_v61 = vor.u32 %v1791_v47, %v1788_v46  ;;  %v1801_v62 = vrot.slane %v1799_v48, 4  ;;  %v2118_v1 = vrot.slane %v4190_v43, 5  ;;  %v2121_v54 = vrot.slane %v4191_v44, 5  ;;  %v4381_v44 = vld [vmem:[%s4955_s28 + $0xc0] sm:$0xe] }
 0x12e   : > { %4642 = vmatprep.mubr.msk.bf16.mxu0 %vm3323_vm0, %v3293_v50  ;;  %v1774_v5 = vsel %vm4998_vm5, %v1769_v51, %v1773_v29  ;;  %v1779_v6 = vrot.slane %v1778_v52, 4  ;;  %v1807_v7 = vrot.slane %v1805_v56, 5  ;;  %v4210_v58 = vrot.slane %v4192_v49, 9  ;;  %v4321_v32 = vld [vmem:[%s4955_s28 + $0xd0] sm:$0xf] }
 0x12f   : > { %v1151_v4 = vpop.permute.xlu0 %1150  ;;  %v1793_v3 = vrot.slane %v1792_v61, 4  ;;  %v1802_v8 = vor.u32 %v1801_v62, %v1797_v55  ;;  %v2119_v9 = vsel %vm4957_vm2, %v4209_v63, %v2118_v1  ;;  %v2120_v10 = vrot.slane %v2118_v1, 4  ;;  %v4322_v37 = vld [vmem:[%s4955_s28 + $0xd4] sm:$0x1]  ;;  %v4382_v50 = vld [vmem:[%s4955_s28 + $0xc4] sm:$0xf] }
 0x130   : > { %v829_v60 = vpop.permute.xlu1 %828  ;;  %1191 = vst.msk [vmem:[#allocation2 + $0x40] sm:$0xff] %vm1182_vm8, %v1151_v4  ;;  %v1784_v13 = vsel %vm4998_vm5, %v1779_v6, %v1783_v45  ;;  %v2125_v14 = vrot.slane %v4193_v57, 5  ;;  %v2128_v15 = vrot.slane %v4194_v2, 5  ;;  %v2806_v27 = vshrl.u32 %v4317_v11, 16  ;;  %v4383_v57 = vld [vmem:[%s4955_s28 + $0xc8] sm:$0x1] }
 0x131   : > { %868 = vst.msk [vmem:[#allocation2 + $0x48] sm:$0xff] %vm858_vm7, %v829_v60  ;;  %v3294_v26 = vld [vmem:[#allocation2 + $0x38] sm:$0xff]  ;;  %1342 = vrot.lane.b32.xlu1 %v4764_v59, %s4871_s29  ;;  %v4145_v12 = vcombine.low %v1774_v5, %v1784_v13  ;;  %v1798_v17 = vsel %vm4998_vm5, %v1793_v3, %v1797_v55  ;;  %v1803_v18 = vrot.slane %v1802_v8, 4  ;;  %v2122_v19 = vsel %vm4957_vm2, %v2120_v10, %v2121_v54  ;;  %v4384_v59 = vld [vmem:[%s4955_s28 + $0xcc] sm:$0xe]  ;;  %s3857_s29 = sshll.u32 %s6032_s27, 4  ;;  %s6180_s29 = int_to_ptr.vmem [resolvable:$true] %s3857_s29 }
 0x132   : > { %4643 = vmatmul.mubr.msk.bf16.gmra.mrb[12].mxu0 %vm3323_vm0, %v3294_v26  ;;  %v4225_v22 = vcombine.low %v2119_v9, %v2122_v19  ;;  %v2126_v23 = vsel %vm4957_vm2, %v4210_v58, %v2125_v14  ;;  %v2127_v24 = vrot.slane %v2125_v14, 4  ;;  %v2809_v30 = vshll.u32 %v4317_v11, 16  ;;  %v4385_v2 = vld [vmem:[%s4955_s28 + $0xd0] sm:$0xf]  ;;  %v4386_v10 = vld [vmem:[%s4955_s28 + $0xd4] sm:$0x1] }
 0x133   : > { %v1329_v21 = vpop.permute.xlu0 %1328  ;;  %1885 = vrot.lane.b32.xlu0 %v4145_v12, %s4875_s6  ;;  %v1808_v29 = vsel %vm4998_vm5, %v1803_v18, %v1807_v7  ;;  %v2815_v31 = vshll.u32 %v4318_v16, 16  ;;  %v2819_v33 = vshrl.u32 %v4318_v16, 16  ;;  %v2808_v35 = vrot.slane %v2806_v27, 4  ;;  %v4768_v60 = vld [vmem:[%s4955_s28 + $0xcc] sm:$0xff]   ;;  %s4509_s28 = sshll.u32 %s4923_s16, 11 }
 0x134   : > { %v1153_v25 = vpop.permute.xlu1 %1152  ;;  %1369 = vst.msk [vmem:[#allocation2 + $0x40] sm:$0xff] %vm1360_vm9, %v1329_v21  ;;  %v4146_v39 = vcombine.low %v1798_v17, %v1808_v29  ;;  %v2129_v34 = vsel %vm4957_vm2, %v2127_v24, %v2128_v15  ;;  %v2825_v36 = vshll.u32 %v4319_v20, 16  ;;  %v2811_v41 = vrot.slane %v2809_v30, 5 }
 0x135   : > { %1192 = vst.msk [vmem:[#allocation2 + $0x48] sm:$0xff] %vm1182_vm8, %v1153_v25  ;;  %v4226_v38 = vcombine.low %v2126_v23, %v2129_v34  ;;  %v2817_v42 = vrot.slane %v2815_v31, 5  ;;  %v2821_v43 = vrot.slane %v2819_v33, 4  ;;  %v2830_v46 = vshrl.u32 %v4320_v28, 16 }
 0x136   : > { %1887 = vrot.lane.b32.xlu1 %v4146_v39, %s4875_s6  ;;  %v2827_v45 = vrot.slane %v2825_v36, 5  ;;  %v2833_v47 = vshll.u32 %v4320_v28, 16  ;;  %v2839_v48 = vshll.u32 %v4321_v32, 16  ;;  %v2812_v51 = vor.u32 %v2811_v41, %v2808_v35  ;;  %s6175_s6 = scalar_lea.hbm %s6298_s2, %s4509_s28 }
 0x137   : > { %2206 = vrot.lane.b32.xlu0 %v4225_v22, %s4872_s30  ;;  %v2822_v52 = vor.u32 %v2821_v43, %v2817_v42  ;;  %v2843_v55 = vshrl.u32 %v4321_v32, 16  ;;  %v2849_v56 = vshll.u32 %v4322_v37, 16  ;;  %v2832_v61 = vrot.slane %v2830_v46, 4 }
 0x138   : > { %v1331_v49 = vpop.permute.xlu1 %1330  ;;  %v2835_v62 = vrot.slane %v2833_v47, 5  ;;  %v2841_v63 = vrot.slane %v2839_v48, 5  ;;  %v4401_v1 = vrot.slane %v4381_v44, 9  ;;  %v1874_v4 = vpop.permute.xlu0 %1873  ;;  %v2813_v5 = vrot.slane %v2812_v51, 4 }
 0x139   : > { %1370 = vst.msk [vmem:[#allocation2 + $0x48] sm:$0xff] %vm1360_vm9, %v1331_v49  ;;  %v2823_v6 = vrot.slane %v2822_v52, 4  ;;  %v2845_v7 = vrot.slane %v2843_v55, 4  ;;  %v2851_v54 = vrot.slane %v2849_v56, 5  ;;  %v3162_v8 = vrot.slane %v4382_v50, 5 }
 0x13a   : > { %1914 = vst.msk [vmem:[#allocation2 + $0x40] sm:$0xff] %vm1905_vm10, %v1874_v4  ;;  %2208 = vrot.lane.b32.xlu1 %v4226_v38, %s4872_s30  ;;  %v2836_v3 = vor.u32 %v2835_v62, %v2832_v61  ;;  %v3165_v9 = vrot.slane %v4383_v57, 5  ;;  %v4402_v11 = vrot.slane %v4384_v59, 9  ;;  %v2818_v26 = vsel %vm4998_vm5, %v2813_v5, %v2817_v42 }
 0x13b   : > { %2384 = vrot.lane.b32.xlu0 %v4767_v40, %s4876_s7  ;;  %v2828_v13 = vsel %vm4998_vm5, %v2823_v6, %v2827_v45  ;;  %v2846_v58 = vor.u32 %v2845_v7, %v2841_v63  ;;  %v3169_v14 = vrot.slane %v4385_v2, 5  ;;  %v3163_v17 = vsel %vm4957_vm2, %v4401_v1, %v3162_v8 }
 0x13c   : > { %v1876_v15 = vpop.permute.xlu1 %1875  ;;  %v4337_v16 = vcombine.low %v2818_v26, %v2828_v13  ;;  %v2837_v12 = vrot.slane %v2836_v3, 4  ;;  %v3164_v18 = vrot.slane %v3162_v8, 4  ;;  %v2195_v19 = vpop.permute.xlu0 %2194  ;;  %v3172_v22 = vrot.slane %v4386_v10, 5 }
 0x13d   : > { %1915 = vst.msk [vmem:[#allocation2 + $0x48] sm:$0xff] %vm1905_vm10, %v1876_v15  ;;  %v2847_v20 = vrot.slane %v2846_v58, 4  ;;  %v3171_v21 = vrot.slane %v3169_v14, 4  ;;  %v3170_v28 = vsel %vm4957_vm2, %v4402_v11, %v3169_v14 }
 0x13e   : > { %2235 = vst.msk [vmem:[#allocation2 + $0x40] sm:$0xff] %vm2226_vm11, %v2195_v19  ;;  %2386 = vrot.lane.b32.xlu1 %v4768_v60, %s4876_s7  ;;  %v2842_v23 = vsel %vm4998_vm5, %v2837_v12, %v2841_v63  ;;  %v3166_v24 = vsel %vm4957_vm2, %v3164_v18, %v3165_v9  ;;  %s3839_s7 = scalar_lea.sflag [#allocation4], %s6010_s25 }
 0x13f   : > { %2929 = vrot.lane.b32.xlu0 %v4337_v16, %s4877_s8  ;;  %v2852_v25 = vsel %vm4998_vm5, %v2847_v20, %v2851_v54  ;;  %v4417_v27 = vcombine.low %v3163_v17, %v3166_v24  ;;  %v3173_v29 = vsel %vm4957_vm2, %v3171_v21, %v3172_v22 }
 0x140   : > { %v2197_v30 = vpop.permute.xlu1 %2196  ;;  %v4338_v31 = vcombine.low %v2842_v23, %v2852_v25  ;;  %v2373_v33 = vpop.permute.xlu0 %2372  ;;  %v4418_v32 = vcombine.low %v3170_v28, %v3173_v29 }
 0x141   : > { %2236 = vst.msk [vmem:[#allocation2 + $0x48] sm:$0xff] %vm2226_vm11, %v2197_v30 }
 0x142   : > { %2413 = vst.msk [vmem:[#allocation2 + $0x40] sm:$0xff] %vm2404_vm12, %v2373_v33  ;;  %2931 = vrot.lane.b32.xlu1 %v4338_v31, %s4877_s8  ;;  %s4775_s8 = scalar_lea.vmem %s6180_s29, 2048 }
 0x143   : > { %3250 = vrot.lane.b32.xlu0 %v4417_v27, %s4878_s9  ;;  %p4776_p11 = scmp.ne.s32.totalorder %s6180_s29, %s4775_s8 }
 0x144   : > { %v2375_v53 = vpop.permute.xlu1 %2374 }
 0x145   : > { %2414 = vst.msk [vmem:[#allocation2 + $0x48] sm:$0xff] %vm2404_vm12, %v2375_v53  ;;  %v2918_v39 = vpop.permute.xlu0 %2917  ;;  %p4777_p12 = pnand %p4776_p11, %p4940_p5 }
 0x146   : > { %3252 = vrot.lane.b32.xlu1 %v4418_v32, %s4878_s9  ;;  %2958 = vst.msk [vmem:[#allocation2 + $0x40] sm:$0xff] %vm2949_vm13, %v2918_v39  ;;  %s4879_s9 = smov [#allocation3]  }
 0x147   : > { %p4778_p13 = pneg %p4777_p12  ;;  %s4779_s10 = sshll.u32 %s4879_s9, 4  ;;  %s4780_s10 = int_to_ptr.vmem [resolvable:$false] %s4779_s10 }
 0x148   : > { %v2920_v0 = vpop.permute.xlu1 %2919  ;;  %s4781_s11 = scalar_lea.vmem %s4780_s10, 4096  ;;  %p4782_p0 = scmp.lt.s32.totalorder %s6180_s29, %s4780_s10 }
 0x149   : > { %2959 = vst.msk [vmem:[#allocation2 + $0x48] sm:$0xff] %vm2949_vm13, %v2920_v0  ;;  %v3239_v34 = vpop.permute.xlu0 %3238  ;;  %p4783_p1 = scmp.lt.s32.totalorder %s4781_s11, %s4775_s8 }
 0x14a   : > { %3279 = vst.msk [vmem:[#allocation2 + $0x40] sm:$0xff] %vm3270_vm14, %v3239_v34 }
 0x14b   : > { %p4784_p2 = por %p4783_p1, %p4782_p0 }
 0x14d   : > { %p4785_p3 = pnand %p4784_p2, %p4778_p13 }
 0x14e   : > { %v3241_v35 = vpop.permute.xlu0 %3240 }
 0x14f   : > { %v831_v36 = vpop.permute.xlu1 %830  ;;  %3280 = vst.msk [vmem:[#allocation2 + $0x48] sm:$0xff] %vm3270_vm14, %v3241_v35 }
 0x150   : > { %869 = vst.msk [vmem:[#allocation2 + $0x50] sm:$0xff] %vm858_vm7, %v831_v36 }
 0x151   : > { %v3295_v37 = vld [vmem:[#allocation2 + $0x40] sm:$0xff] }
 0x152   : > { %4646 = vmatprep.mubr.msk.bf16.mxu1 %vm3323_vm0, %v3295_v37 }
 0x153   : > { %v833_v38 = vpop.permute.xlu1 %832  ;;  %v1155_v40 = vpop.permute.xlu0 %1154 }
 0x154   : > { %870 = vst.msk [vmem:[#allocation2 + $0x58] sm:$0xff] %vm858_vm7, %v833_v38 }
 0x155   : > { %1193 = vst.msk [vmem:[#allocation2 + $0x50] sm:$0xff] %vm1182_vm8, %v1155_v40 }
 0x156   : > { %v3296_v41 = vld [vmem:[#allocation2 + $0x48] sm:$0xff] }
 0x157   : > { %v1157_v42 = vpop.permute.xlu1 %1156  ;;  %v1333_v43 = vpop.permute.xlu0 %1332  ;;  %4647 = vmatmul.mubr.msk.bf16.vlgmr.msra.gmra.mrb[0].mxu1 %vm3323_vm0, %v3296_v41 }
 0x158   : > { %1194 = vst.msk [vmem:[#allocation2 + $0x58] sm:$0xff] %vm1182_vm8, %v1157_v42 }
 0x159   : > { %1371 = vst.msk [vmem:[#allocation2 + $0x50] sm:$0xff] %vm1360_vm9, %v1333_v43 }
 0x15b   : > { %v1335_v44 = vpop.permute.xlu1 %1334 }
 0x15c   : > { %1372 = vst.msk [vmem:[#allocation2 + $0x58] sm:$0xff] %vm1360_vm9, %v1335_v44 }
 0x15d   : > { %v1878_v45 = vpop.permute.xlu0 %1877 }
 0x15e   : > { %1916 = vst.msk [vmem:[#allocation2 + $0x50] sm:$0xff] %vm1905_vm10, %v1878_v45 }
 0x160   : > { %v1880_v46 = vpop.permute.xlu1 %1879 }
 0x161   : > { %1917 = vst.msk [vmem:[#allocation2 + $0x58] sm:$0xff] %vm1905_vm10, %v1880_v46  ;;  %v2199_v47 = vpop.permute.xlu0 %2198 }
 0x162   : > { %2237 = vst.msk [vmem:[#allocation2 + $0x50] sm:$0xff] %vm2226_vm11, %v2199_v47 }
 0x164   : > { %v2201_v48 = vpop.permute.xlu1 %2200 }
 0x165   : > { %2238 = vst.msk [vmem:[#allocation2 + $0x58] sm:$0xff] %vm2226_vm11, %v2201_v48  ;;  %v2377_v49 = vpop.permute.xlu0 %2376 }
 0x166   : > { %2415 = vst.msk [vmem:[#allocation2 + $0x50] sm:$0xff] %vm2404_vm12, %v2377_v49 }
 0x168   : > { %v2379_v50 = vpop.permute.xlu1 %2378 }
 0x169   : > { %2416 = vst.msk [vmem:[#allocation2 + $0x58] sm:$0xff] %vm2404_vm12, %v2379_v50  ;;  %v2922_v51 = vpop.permute.xlu0 %2921 }
 0x16a   : > { %2960 = vst.msk [vmem:[#allocation2 + $0x50] sm:$0xff] %vm2949_vm13, %v2922_v51 }
 0x16c   : > { %v2924_v52 = vpop.permute.xlu1 %2923 }
 0x16d   : > { %2961 = vst.msk [vmem:[#allocation2 + $0x58] sm:$0xff] %vm2949_vm13, %v2924_v52  ;;  %v3243_v55 = vpop.permute.xlu0 %3242 }
 0x16e   : > { %3281 = vst.msk [vmem:[#allocation2 + $0x50] sm:$0xff] %vm3270_vm14, %v3243_v55 }
 0x172   : > { %v3245_v56 = vpop.permute.xlu0 %3244 }
 0x173   : > { %v835_v57 = vpop.permute.xlu1 %834  ;;  %3282 = vst.msk [vmem:[#allocation2 + $0x58] sm:$0xff] %vm3270_vm14, %v3245_v56 }
 0x174   : > { %871 = vst.msk [vmem:[#allocation2 + $0x60] sm:$0xff] %vm858_vm7, %v835_v57 }
 0x175   : > { %v3297_v59 = vld [vmem:[#allocation2 + $0x50] sm:$0xff] }
 0x176   : > { %4650 = vmatprep.mubr.msk.bf16.mxu1 %vm3323_vm0, %v3297_v59 }
 0x177   : > { %v837_v61 = vpop.permute.xlu1 %836  ;;  %v1159_v62 = vpop.permute.xlu0 %1158 }
 0x178   : > { %872 = vst.msk [vmem:[#allocation2 + $0x68] sm:$0xff] %vm858_vm7, %v837_v61 }
 0x179   : > { %1195 = vst.msk [vmem:[#allocation2 + $0x60] sm:$0xff] %vm1182_vm8, %v1159_v62 }
 0x17a   : > { %v3298_v63 = vld [vmem:[#allocation2 + $0x58] sm:$0xff] }
 0x17b   : > { %v1161_v1 = vpop.permute.xlu1 %1160  ;;  %v1337_v2 = vpop.permute.xlu0 %1336  ;;  %4651 = vmatmul.mubr.msk.bf16.gmra.mrb[4].mxu1 %vm3323_vm0, %v3298_v63 }
 0x17c   : > { %1196 = vst.msk [vmem:[#allocation2 + $0x68] sm:$0xff] %vm1182_vm8, %v1161_v1 }
 0x17d   : > { %1373 = vst.msk [vmem:[#allocation2 + $0x60] sm:$0xff] %vm1360_vm9, %v1337_v2 }
 0x17f   : > { %v1339_v4 = vpop.permute.xlu1 %1338 }
 0x180   : > { %1374 = vst.msk [vmem:[#allocation2 + $0x68] sm:$0xff] %vm1360_vm9, %v1339_v4 }
 0x181   : > { %v1882_v5 = vpop.permute.xlu0 %1881 }
 0x182   : > { %1918 = vst.msk [vmem:[#allocation2 + $0x60] sm:$0xff] %vm1905_vm10, %v1882_v5 }
 0x184   : > { %v1884_v6 = vpop.permute.xlu1 %1883 }
 0x185   : > { %1919 = vst.msk [vmem:[#allocation2 + $0x68] sm:$0xff] %vm1905_vm10, %v1884_v6  ;;  %v2203_v7 = vpop.permute.xlu0 %2202 }
 0x186   : > { %2239 = vst.msk [vmem:[#allocation2 + $0x60] sm:$0xff] %vm2226_vm11, %v2203_v7 }
 0x188   : > { %v2205_v54 = vpop.permute.xlu1 %2204 }
 0x189   : > { %2240 = vst.msk [vmem:[#allocation2 + $0x68] sm:$0xff] %vm2226_vm11, %v2205_v54  ;;  %v2381_v60 = vpop.permute.xlu0 %2380 }
 0x18a   : > { %2417 = vst.msk [vmem:[#allocation2 + $0x60] sm:$0xff] %vm2404_vm12, %v2381_v60 }
 0x18c   : > { %v2383_v3 = vpop.permute.xlu1 %2382 }
 0x18d   : > { %2418 = vst.msk [vmem:[#allocation2 + $0x68] sm:$0xff] %vm2404_vm12, %v2383_v3  ;;  %v2926_v8 = vpop.permute.xlu0 %2925 }
 0x18e   : > { %2962 = vst.msk [vmem:[#allocation2 + $0x60] sm:$0xff] %vm2949_vm13, %v2926_v8 }
 0x190   : > { %v2928_v9 = vpop.permute.xlu1 %2927 }
 0x191   : > { %2963 = vst.msk [vmem:[#allocation2 + $0x68] sm:$0xff] %vm2949_vm13, %v2928_v9  ;;  %v3247_v10 = vpop.permute.xlu0 %3246 }
 0x192   : > { %3283 = vst.msk [vmem:[#allocation2 + $0x60] sm:$0xff] %vm3270_vm14, %v3247_v10 }
 0x196   : > { %v3249_v11 = vpop.permute.xlu0 %3248 }
 0x197   : > { %v839_v26 = vpop.permute.xlu1 %838  ;;  %3284 = vst.msk [vmem:[#allocation2 + $0x68] sm:$0xff] %vm3270_vm14, %v3249_v11 }
 0x198   : > { %873 = vst.msk [vmem:[#allocation2 + $0x70] sm:$0xff] %vm858_vm7, %v839_v26 }
 0x199   : > { %v3299_v13 = vld [vmem:[#allocation2 + $0x60] sm:$0xff] }
 0x19a   : > { %4654 = vmatprep.mubr.msk.bf16.mxu1 %vm3323_vm0, %v3299_v13 }
 0x19b   : > { %v841_v58 = vpop.permute.xlu1 %840  ;;  %v1163_v14 = vpop.permute.xlu0 %1162 }
 0x19c   : > { %874 = vst.msk [vmem:[#allocation2 + $0x78] sm:$0xff] %vm858_vm7, %v841_v58 }
 0x19d   : > { %1197 = vst.msk [vmem:[#allocation2 + $0x70] sm:$0xff] %vm1182_vm8, %v1163_v14 }
 0x19e   : > { %v6014_v15 = vpop.f32.mrb[0].mxu0  ;;  %v3300_v16 = vld [vmem:[#allocation2 + $0x68] sm:$0xff] }
 0x19f   : > { %v6017_v12 = vpop.f32.mrb[1].mxu0  ;;  %v1165_v17 = vpop.permute.xlu1 %1164  ;;  %4655 = vmatmul.mubr.msk.bf16.gmra.mrb[8].mxu1 %vm3323_vm0, %v3300_v16 }
 0x1a0   : > { %v1341_v18 = vpop.permute.xlu0 %1340  ;;  %1198 = vst.msk [vmem:[#allocation2 + $0x78] sm:$0xff] %vm1182_vm8, %v1165_v17  ;;  %v6022_v19 = vpop.f32.mrb[2].mxu0 }
 0x1a1   : > { %1375 = vst.msk [vmem:[#allocation2 + $0x70] sm:$0xff] %vm1360_vm9, %v1341_v18  ;;  %v4518_v20 = vpack.c.bf16 %v6022_v19, %v6014_v15  ;;  %v6026_v21 = vpop.f32.mrb[3].mxu0 }
 0x1a2   : > { %v3537_v22 = vadd.f32 %v6026_v21, %v6017_v12  ;;  %v4513_v23 = vpack.c.bf16 %v6026_v21, %v6017_v12 }
 0x1a3   : > { %v1343_v24 = vpop.permute.xlu1 %1342  ;;  %4590 = vst [vmem:[%s6032_s27 + $0x8] sm:$0xff] %v4518_v20  }
 0x1a4   : > { %1376 = vst.msk [vmem:[#allocation2 + $0x78] sm:$0xff] %vm1360_vm9, %v1343_v24  ;;  %v3538_v25 = vadd.f32 %v6014_v15, %v3537_v22  ;;  %4514 = vst [vmem:[%s6032_s27] sm:$0xff] %v4513_v23  }
 0x1a5   : > { %v1886_v27 = vpop.permute.xlu0 %1885 }
 0x1a6   : > { %1920 = vst.msk [vmem:[#allocation2 + $0x70] sm:$0xff] %vm1905_vm10, %v1886_v27  ;;  %v3539_v28 = vadd.f32 %v6022_v19, %v3538_v25 }
 0x1a8   : > { %v1888_v29 = vpop.permute.xlu1 %1887 }
 0x1a9   : > { %1921 = vst.msk [vmem:[#allocation2 + $0x78] sm:$0xff] %vm1905_vm10, %v1888_v29  ;;  %v2207_v30 = vpop.permute.xlu0 %2206 }
 0x1aa   : > { %2241 = vst.msk [vmem:[#allocation2 + $0x70] sm:$0xff] %vm2226_vm11, %v2207_v30 }
 0x1ac   : > { %v2209_v31 = vpop.permute.xlu1 %2208 }
 0x1ad   : > { %2242 = vst.msk [vmem:[#allocation2 + $0x78] sm:$0xff] %vm2226_vm11, %v2209_v31  ;;  %v2385_v33 = vpop.permute.xlu0 %2384 }
 0x1ae   : > { %2419 = vst.msk [vmem:[#allocation2 + $0x70] sm:$0xff] %vm2404_vm12, %v2385_v33 }
 0x1b0   : > { %v2387_v32 = vpop.permute.xlu1 %2386 }
 0x1b1   : > { %2420 = vst.msk [vmem:[#allocation2 + $0x78] sm:$0xff] %vm2404_vm12, %v2387_v32  ;;  %v2930_v53 = vpop.permute.xlu0 %2929 }
 0x1b2   : > { %2964 = vst.msk [vmem:[#allocation2 + $0x70] sm:$0xff] %vm2949_vm13, %v2930_v53 }
 0x1b4   : > { %v2932_v39 = vpop.permute.xlu1 %2931 }
 0x1b5   : > { %2965 = vst.msk [vmem:[#allocation2 + $0x78] sm:$0xff] %vm2949_vm13, %v2932_v39  ;;  %v3251_v0 = vpop.permute.xlu0 %3250 }
 0x1b6   : > { %3285 = vst.msk [vmem:[#allocation2 + $0x70] sm:$0xff] %vm3270_vm14, %v3251_v0 }
 0x1b8   : > { %v3253_v34 = vpop.permute.xlu1 %3252 }
 0x1b9   : > { %3286 = vst.msk [vmem:[#allocation2 + $0x78] sm:$0xff] %vm3270_vm14, %v3253_v34 }
 0x1bd   : > { %v6049_v35 = vpop.f32.mrb[4].mxu0  ;;  %v3301_v37 = vld [vmem:[#allocation2 + $0x70] sm:$0xff] }
 0x1be   : > { %v6051_v36 = vpop.f32.mrb[5].mxu0  ;;  %4658 = vmatprep.mubr.msk.bf16.mxu1 %vm3323_vm0, %v3301_v37 }
 0x1bf   : > { %v3540_v38 = vadd.f32 %v3539_v28, %v6051_v36  ;;  %v6054_v40 = vpop.f32.mrb[6].mxu0 }
 0x1c0   : > { %v4528_v41 = vpack.c.bf16 %v6054_v40, %v6049_v35  ;;  %v6059_v42 = vpop.f32.mrb[7].mxu0  ;;  %v3302_v45 = vld [vmem:[#allocation2 + $0x78] sm:$0xff] }
 0x1c1   : > { %v3541_v43 = vadd.f32 %v3540_v38, %v6059_v42  ;;  %v4523_v44 = vpack.c.bf16 %v6059_v42, %v6051_v36  ;;  %4659 = vmatmul.mubr.msk.bf16.gmra.mrb[12].mxu1 %vm3323_vm0, %v3302_v45 }
 0x1c2   : > { %4592 = vst [vmem:[%s6032_s27 + $0x18] sm:$0xff] %v4528_v41  }
 0x1c3   : > { %v3542_v46 = vadd.f32 %v6049_v35, %v3541_v43  ;;  %4591 = vst [vmem:[%s6032_s27 + $0x10] sm:$0xff] %v4523_v44  }
 0x1c5   : > { %v3543_v47 = vadd.f32 %v6054_v40, %v3542_v46 }
 0x1e1   : > { %v6069_v48 = vpop.f32.mrb[8].mxu0 }
 0x1e2   : > { %v6071_v49 = vpop.f32.mrb[9].mxu0 }
 0x1e3   : > { %v3544_v50 = vadd.f32 %v3543_v47, %v6071_v49  ;;  %v6074_v51 = vpop.f32.mrb[10].mxu0 }
 0x1e4   : > { %v4538_v52 = vpack.c.bf16 %v6074_v51, %v6069_v48  ;;  %v6078_v55 = vpop.f32.mrb[11].mxu0 }
 0x1e5   : > { %v3545_v56 = vadd.f32 %v3544_v50, %v6078_v55  ;;  %v4533_v57 = vpack.c.bf16 %v6078_v55, %v6071_v49 }
 0x1e6   : > { %4594 = vst [vmem:[%s6032_s27 + $0x28] sm:$0xff] %v4538_v52  }
 0x1e7   : > { %v3546_v59 = vadd.f32 %v6069_v48, %v3545_v56  ;;  %4593 = vst [vmem:[%s6032_s27 + $0x20] sm:$0xff] %v4533_v57  }
 0x1e9   : > { %v3547_v61 = vadd.f32 %v6074_v51, %v3546_v59 }
 0x205   : > { %v6087_v62 = vpop.f32.mrb[12].mxu0 }
 0x206   : > { %v6089_v63 = vpop.f32.mrb[13].mxu0 }
 0x207   : > { %v3548_v1 = vadd.f32 %v3547_v61, %v6089_v63  ;;  %v6092_v2 = vpop.f32.mrb[14].mxu0 }
 0x208   : > { %v4548_v4 = vpack.c.bf16 %v6092_v2, %v6087_v62  ;;  %v6096_v5 = vpop.f32.mrb[15].mxu0 }
 0x209   : > { %v3549_v6 = vadd.f32 %v3548_v1, %v6096_v5  ;;  %v4543_v7 = vpack.c.bf16 %v6096_v5, %v6089_v63 }
 0x20a   : > { %4596 = vst [vmem:[%s6032_s27 + $0x38] sm:$0xff] %v4548_v4  }
 0x20b   : > { %v3550_v54 = vadd.f32 %v6087_v62, %v3549_v6  ;;  %4595 = vst [vmem:[%s6032_s27 + $0x30] sm:$0xff] %v4543_v7  }
 0x20d   : > { %v3551_v60 = vadd.f32 %v6092_v2, %v3550_v54 }
 0x22a   : > { %v6105_v3 = vpop.f32.mrb[0].mxu1 }
 0x22b   : > { %v6107_v8 = vpop.f32.mrb[1].mxu1 }
 0x22c   : > { %v3552_v9 = vadd.f32 %v3551_v60, %v6107_v8  ;;  %v6110_v10 = vpop.f32.mrb[2].mxu1 }
 0x22d   : > { %v4558_v11 = vpack.c.bf16 %v6110_v10, %v6105_v3  ;;  %v6114_v26 = vpop.f32.mrb[3].mxu1 }
 0x22e   : > { %v3553_v13 = vadd.f32 %v3552_v9, %v6114_v26  ;;  %v4553_v58 = vpack.c.bf16 %v6114_v26, %v6107_v8 }
 0x22f   : > { %4598 = vst [vmem:[%s6032_s27 + $0x48] sm:$0xff] %v4558_v11  }
 0x230   : > { %v3554_v14 = vadd.f32 %v6105_v3, %v3553_v13  ;;  %4597 = vst [vmem:[%s6032_s27 + $0x40] sm:$0xff] %v4553_v58  }
 0x232   : > { %v3555_v16 = vadd.f32 %v6110_v10, %v3554_v14 }
 0x24e   : > { %v6123_v17 = vpop.f32.mrb[4].mxu1 }
 0x24f   : > { %v6125_v18 = vpop.f32.mrb[5].mxu1 }
 0x250   : > { %v3556_v20 = vadd.f32 %v3555_v16, %v6125_v18  ;;  %v6128_v22 = vpop.f32.mrb[6].mxu1 }
 0x251   : > { %v4568_v23 = vpack.c.bf16 %v6128_v22, %v6123_v17  ;;  %v6132_v24 = vpop.f32.mrb[7].mxu1 }
 0x252   : > { %v3557_v25 = vadd.f32 %v3556_v20, %v6132_v24  ;;  %v4563_v27 = vpack.c.bf16 %v6132_v24, %v6125_v18 }
 0x253   : > { %4600 = vst [vmem:[%s6032_s27 + $0x58] sm:$0xff] %v4568_v23  }
 0x254   : > { %v3558_v28 = vadd.f32 %v6123_v17, %v3557_v25  ;;  %4599 = vst [vmem:[%s6032_s27 + $0x50] sm:$0xff] %v4563_v27  }
 0x256   : > { %v3559_v29 = vadd.f32 %v6128_v22, %v3558_v28 }
 0x272   : > { %v6141_v30 = vpop.f32.mrb[8].mxu1 }
 0x273   : > { %v6143_v31 = vpop.f32.mrb[9].mxu1 }
 0x274   : > { %v3560_v33 = vadd.f32 %v3559_v29, %v6143_v31  ;;  %v6146_v32 = vpop.f32.mrb[10].mxu1 }
 0x275   : > { %v4578_v53 = vpack.c.bf16 %v6146_v32, %v6141_v30  ;;  %v6150_v39 = vpop.f32.mrb[11].mxu1 }
 0x276   : > { %v3561_v0 = vadd.f32 %v3560_v33, %v6150_v39  ;;  %v4573_v34 = vpack.c.bf16 %v6150_v39, %v6143_v31 }
 0x277   : > { %4602 = vst [vmem:[%s6032_s27 + $0x68] sm:$0xff] %v4578_v53  }
 0x278   : > { %v3562_v37 = vadd.f32 %v6141_v30, %v3561_v0  ;;  %4601 = vst [vmem:[%s6032_s27 + $0x60] sm:$0xff] %v4573_v34  }
 0x27a   : > { %v3563_v38 = vadd.f32 %v6146_v32, %v3562_v37 }
 0x294   : > { %v6159_v41 = vpop.f32.mrb[12].mxu1 }
 0x295   : > { %v6162_v43 = vpop.f32.mrb[13].mxu1 }
 0x296   : > { %v3564_v44 = vadd.f32 %v3563_v38, %v6162_v43  ;;  %v6166_v45 = vpop.f32.mrb[14].mxu1 }
 0x297   : > { %v4588_v46 = vpack.c.bf16 %v6166_v45, %v6159_v41  ;;  %v6170_v47 = vpop.f32.mrb[15].mxu1 }
 0x298   : > { %v3565_v50 = vadd.f32 %v3564_v44, %v6170_v47  ;;  %v4583_v52 = vpack.c.bf16 %v6170_v47, %v6162_v43 }
 0x299   : > { %4604 = vst [vmem:[%s6032_s27 + $0x78] sm:$0xff] %v4588_v46  }
 0x29a   : > { %v3566_v56 = vadd.f32 %v6159_v41, %v3565_v50  ;;  %4603 = vst [vmem:[%s6032_s27 + $0x70] sm:$0xff] %v4583_v52  }
 0x29b   : > { %4788 = shalt.err (!%p4785_p3)
}
 0x29c   : > { %s4789_s17 = scalar_lea.hbm %s6175_s6, 2048  ;;  %s4793_s24 = scalar_lea.hbm %s6298_s2, 4096 }
 0x29d   : > { %p4790_p4 = scmp.ne.s32.totalorder %s6175_s6, %s4789_s17  ;;  %p4794_p9 = scmp.lt.u32.totalorder %s6175_s6, %s6298_s2 }
 0x29e   : > { %p4795_p10 = scmp.lt.u32.totalorder %s4793_s24, %s4789_s17  ;;  %p4797_p12 = scmp.lt.u32.totalorder %s4789_s17, %s6175_s6 }
 0x29f   : > { %p4791_p7 = pnand %p4790_p4, %p4940_p5 }
 0x2a0   : > { %p4796_p11 = por %p4795_p10, %p4794_p9 }
 0x2a1   : > { %p4792_p8 = pneg %p4791_p7 }
 0x2a2   : > { %p4798_p13 = por %p4797_p12, %p4796_p11 }
 0x2a4   : > { %p4799_p0 = pnand %p4798_p13, %p4792_p8 }
 0x2a6   : > { %4802 = shalt.err (!%p4799_p0)
}
 0x2a7   : > { %s4880_s28 = smov 64   ;;  %v3567_v57 = vadd.f32 %v6166_v45, %v3566_v56  ;;  %s3969_s30 = sshll.u32 %s6010_s25, 3 }
 0x2a8   : > { %4671 = dma.vmem_to_hbm [thread:$0]  (%p4940_p5), %s6180_s29, 2048, %s6175_s6, %s3839_s7, %s4880_s28, %s4880_s28, %s4874_s5  }
 0x2a9   : > { %v3568_v59 = vrot.slane %v3567_v57, 4  ;;  %s6212_s4 = scalar_lea.vmem [#allocation5], %s3969_s30  ;;  %s4474_s5 = sshll.u32 %s4923_s16, 7 }
 0x2aa   : > { %s3873_s29 = sshll.u32 %s6212_s4, 4  ;;  %s6252_s8 = scalar_lea.hbm %s6299_s3, %s4474_s5  ;;  %s6254_s29 = int_to_ptr.vmem [resolvable:$true] %s3873_s29 }
 0x2ab   : > { %v3569_v61 = vadd.f32 %v3568_v59, %v3567_v57  ;;  %s3844_s9 = scalar_lea.sflag [#allocation6], %s6010_s25  ;;  %s4803_s10 = scalar_lea.vmem %s6254_s29, 128 }
 0x2ac   : > { %p4804_p1 = scmp.ne.s32.totalorder %s6254_s29, %s4803_s10  ;;  %s4881_s16 = smov [#allocation5]  }
 0x2ad   : > { %v3570_v1 = vrot.slane %v3569_v61, 2  ;;  %s4807_s11 = sshll.u32 %s4881_s16, 4  ;;  %s4808_s11 = int_to_ptr.vmem [resolvable:$false] %s4807_s11 }
 0x2ae   : > { %p4805_p2 = pnand %p4804_p1, %p4940_p5  ;;  %s4809_s17 = scalar_lea.vmem %s4808_s11, 256 }
 0x2af   : > { %v3571_v4 = vadd.f32 %v3570_v1, %v3569_v61  ;;  %p4810_p4 = scmp.lt.s32.totalorder %s6254_s29, %s4808_s11  ;;  %p4811_p7 = scmp.lt.s32.totalorder %s4809_s17, %s4803_s10 }
 0x2b0   : > { %p4806_p3 = pneg %p4805_p2 }
 0x2b1   : > { %v3572_v6 = vrot.slane %v3571_v4, 1  ;;  %p4812_p8 = por %p4811_p7, %p4810_p4 }
 0x2b3   : > { %v3573_v7 = vadd.f32 %v3572_v6, %v3571_v4  ;;  %p4813_p9 = pnand %p4812_p8, %p4806_p3 }
 0x2b5   : > { %v3574_v54 = vmul.f32 0.00390625, %v3573_v7  ;;  %3676 = vst [vmem:[%s6212_s4] sm:$0x1] %v3573_v7 }
 0x2b7   : > { %v3575_v60 = vsub.f32 %v6017_v12, %v3574_v54  ;;  %v3576_v9 = vsub.f32 %v6026_v21, %v3574_v54  ;;  %v3577_v11 = vsub.f32 %v6014_v15, %v3574_v54  ;;  %v3578_v13 = vsub.f32 %v6022_v19, %v3574_v54 }
 0x2b8   : > { %v3579_v58 = vsub.f32 %v6051_v36, %v3574_v54  ;;  %v3580_v14 = vsub.f32 %v6059_v42, %v3574_v54  ;;  %v3581_v16 = vsub.f32 %v6049_v35, %v3574_v54  ;;  %v3582_v20 = vsub.f32 %v6054_v40, %v3574_v54 }
 0x2b9   : > { %v3583_v23 = vsub.f32 %v6071_v49, %v3574_v54  ;;  %v3584_v25 = vsub.f32 %v6078_v55, %v3574_v54  ;;  %v3585_v12 = vsub.f32 %v6069_v48, %v3574_v54  ;;  %v3586_v21 = vsub.f32 %v6074_v51, %v3574_v54 }
 0x2ba   : > { %v3587_v15 = vsub.f32 %v6089_v63, %v3574_v54  ;;  %v3588_v19 = vsub.f32 %v6096_v5, %v3574_v54  ;;  %v3589_v36 = vsub.f32 %v6087_v62, %v3574_v54  ;;  %v3590_v42 = vsub.f32 %v6092_v2, %v3574_v54 }
 0x2bb   : > { %v3591_v35 = vsub.f32 %v6107_v8, %v3574_v54  ;;  %v3592_v40 = vsub.f32 %v6114_v26, %v3574_v54  ;;  %v3593_v49 = vsub.f32 %v6105_v3, %v3574_v54  ;;  %v3594_v55 = vsub.f32 %v6110_v10, %v3574_v54 }
 0x2bc   : > { %v3595_v48 = vsub.f32 %v6125_v18, %v3574_v54  ;;  %v3596_v51 = vsub.f32 %v6132_v24, %v3574_v54  ;;  %v3597_v63 = vsub.f32 %v6123_v17, %v3574_v54  ;;  %v3598_v5 = vsub.f32 %v6128_v22, %v3574_v54 }
 0x2bd   : > { %v3599_v62 = vsub.f32 %v6143_v31, %v3574_v54  ;;  %v3600_v2 = vsub.f32 %v6150_v39, %v3574_v54  ;;  %v3601_v8 = vsub.f32 %v6141_v30, %v3574_v54  ;;  %v3602_v26 = vsub.f32 %v6146_v32, %v3574_v54 }
 0x2be   : > { %v3603_v3 = vsub.f32 %v6162_v43, %v3574_v54  ;;  %v3604_v10 = vsub.f32 %v6170_v47, %v3574_v54  ;;  %v3605_v18 = vsub.f32 %v6159_v41, %v3574_v54  ;;  %v3606_v24 = vsub.f32 %v6166_v45, %v3574_v54 }
 0x2bf   : > { %v3607_v27 = vmul.f32 %v3575_v60, %v3575_v60  ;;  %v3608_v17 = vmul.f32 %v3576_v9, %v3576_v9  ;;  %v3609_v28 = vmul.f32 %v3577_v11, %v3577_v11  ;;  %v3610_v29 = vmul.f32 %v3578_v13, %v3578_v13 }
 0x2c0   : > { %v3611_v33 = vmul.f32 %v3579_v58, %v3579_v58  ;;  %v3612_v39 = vmul.f32 %v3580_v14, %v3580_v14  ;;  %v3613_v0 = vmul.f32 %v3581_v16, %v3581_v16  ;;  %v3614_v34 = vmul.f32 %v3582_v20, %v3582_v20 }
 0x2c1   : > { %v3639_v22 = vadd.f32 %v3608_v17, %v3607_v27  ;;  %v3615_v38 = vmul.f32 %v3583_v23, %v3583_v23  ;;  %v3616_v44 = vmul.f32 %v3584_v25, %v3584_v25  ;;  %v3617_v46 = vmul.f32 %v3585_v12, %v3585_v12 }
 0x2c2   : > { %v3618_v47 = vmul.f32 %v3586_v21, %v3586_v21  ;;  %v3619_v52 = vmul.f32 %v3587_v15, %v3587_v15  ;;  %v3620_v57 = vmul.f32 %v3588_v19, %v3588_v19  ;;  %v3621_v61 = vmul.f32 %v3589_v36, %v3589_v36 }
 0x2c3   : > { %v3640_v31 = vadd.f32 %v3639_v22, %v3609_v28  ;;  %v3622_v4 = vmul.f32 %v3590_v42, %v3590_v42  ;;  %v3623_v7 = vmul.f32 %v3591_v35, %v3591_v35  ;;  %v3624_v60 = vmul.f32 %v3592_v40, %v3592_v40 }
 0x2c4   : > { %v3625_v11 = vmul.f32 %v3593_v49, %v3593_v49  ;;  %v3626_v58 = vmul.f32 %v3594_v55, %v3594_v55  ;;  %v3627_v16 = vmul.f32 %v3595_v48, %v3595_v48  ;;  %v3628_v23 = vmul.f32 %v3596_v51, %v3596_v51 }
 0x2c5   : > { %v3641_v53 = vadd.f32 %v3640_v31, %v3610_v29  ;;  %v3629_v12 = vmul.f32 %v3597_v63, %v3597_v63  ;;  %v3630_v15 = vmul.f32 %v3598_v5, %v3598_v5  ;;  %v3631_v36 = vmul.f32 %v3599_v62, %v3599_v62 }
 0x2c6   : > { %v3632_v42 = vmul.f32 %v3600_v2, %v3600_v2  ;;  %v3633_v35 = vmul.f32 %v3601_v8, %v3601_v8  ;;  %v3634_v40 = vmul.f32 %v3602_v26, %v3602_v26  ;;  %v3635_v55 = vmul.f32 %v3603_v3, %v3603_v3 }
 0x2c7   : > { %v3642_v30 = vadd.f32 %v3641_v53, %v3611_v33  ;;  %v3636_v48 = vmul.f32 %v3604_v10, %v3604_v10  ;;  %v3637_v51 = vmul.f32 %v3605_v18, %v3605_v18  ;;  %v3638_v5 = vmul.f32 %v3606_v24, %v3606_v24 }
 0x2c9   : > { %v3643_v32 = vadd.f32 %v3642_v30, %v3612_v39 }
 0x2cb   : > { %v3644_v37 = vadd.f32 %v3643_v32, %v3613_v0 }
 0x2cd   : > { %v3645_v43 = vadd.f32 %v3644_v37, %v3614_v34 }
 0x2cf   : > { %v3646_v41 = vadd.f32 %v3645_v43, %v3615_v38 }
 0x2d1   : > { %v3647_v45 = vadd.f32 %v3646_v41, %v3616_v44 }
 0x2d3   : > { %v3648_v50 = vadd.f32 %v3647_v45, %v3617_v46 }
 0x2d5   : > { %v3649_v56 = vadd.f32 %v3648_v50, %v3618_v47 }
 0x2d7   : > { %v3650_v59 = vadd.f32 %v3649_v56, %v3619_v52 }
 0x2d9   : > { %v3651_v1 = vadd.f32 %v3650_v59, %v3620_v57 }
 0x2db   : > { %v3652_v6 = vadd.f32 %v3651_v1, %v3621_v61 }
 0x2dd   : > { %v3653_v54 = vadd.f32 %v3652_v6, %v3622_v4 }
 0x2df   : > { %v3654_v9 = vadd.f32 %v3653_v54, %v3623_v7 }
 0x2e1   : > { %v3655_v13 = vadd.f32 %v3654_v9, %v3624_v60 }
 0x2e3   : > { %v3656_v14 = vadd.f32 %v3655_v13, %v3625_v11 }
 0x2e5   : > { %v3657_v20 = vadd.f32 %v3656_v14, %v3626_v58 }
 0x2e7   : > { %v3658_v25 = vadd.f32 %v3657_v20, %v3627_v16 }
 0x2e9   : > { %v3659_v21 = vadd.f32 %v3658_v25, %v3628_v23 }
 0x2eb   : > { %v3660_v19 = vadd.f32 %v3659_v21, %v3629_v12 }
 0x2ed   : > { %v3661_v27 = vadd.f32 %v3660_v19, %v3630_v15 }
 0x2ef   : > { %v3662_v17 = vadd.f32 %v3661_v27, %v3631_v36 }
 0x2f1   : > { %v3663_v28 = vadd.f32 %v3662_v17, %v3632_v42 }
 0x2f3   : > { %v3664_v49 = vadd.f32 %v3663_v28, %v3633_v35 }
 0x2f5   : > { %v3665_v22 = vadd.f32 %v3664_v49, %v3634_v40 }
 0x2f7   : > { %v3666_v29 = vadd.f32 %v3665_v22, %v3635_v55 }
 0x2f9   : > { %v3667_v63 = vadd.f32 %v3666_v29, %v3636_v48 }
 0x2fb   : > { %v3668_v31 = vadd.f32 %v3667_v63, %v3637_v51 }
 0x2fd   : > { %v3669_v62 = vadd.f32 %v3668_v31, %v3638_v5 }
 0x2ff   : > { %v3670_v2 = vrot.slane %v3669_v62, 4 }
 0x301   : > { %v3671_v33 = vadd.f32 %v3670_v2, %v3669_v62 }
 0x303   : > { %v3672_v8 = vrot.slane %v3671_v33, 2 }
 0x305   : > { %v3673_v53 = vadd.f32 %v3672_v8, %v3671_v33 }
 0x307   : > { %v3674_v26 = vrot.slane %v3673_v53, 1 }
 0x309   : > { %v3675_v39 = vadd.f32 %v3674_v26, %v3673_v53 }
 0x30b   : > { %3677 = vst [vmem:[%s6212_s4 + $0x1] sm:$0x1] %v3675_v39 }
 0x30c   : > { %4816 = shalt.err (!%p4813_p9)
}
 0x30d   : > { %s4817_s25 = scalar_lea.hbm %s6252_s8, 128  ;;  %s4821_s24 = scalar_lea.hbm %s6299_s3, 256 }
 0x30e   : > { %p4818_p10 = scmp.ne.s32.totalorder %s6252_s8, %s4817_s25  ;;  %p4822_p13 = scmp.lt.u32.totalorder %s6252_s8, %s6299_s3 }
 0x30f   : > { %p4823_p0 = scmp.lt.u32.totalorder %s4821_s24, %s4817_s25  ;;  %p4825_p2 = scmp.lt.u32.totalorder %s4817_s25, %s6252_s8 }
 0x310   : > { %p4819_p11 = pnand %p4818_p10, %p4940_p5 }
 0x311   : > { %p4824_p1 = por %p4823_p0, %p4822_p13 }
 0x312   : > { %p4820_p12 = pneg %p4819_p11 }
 0x313   : > { %p4826_p3 = por %p4825_p2, %p4824_p1 }
 0x315   : > { %p4827_p4 = pnand %p4826_p3, %p4820_p12 }
 0x317   : > { %4830 = shalt.err (!%p4827_p4)
}
 0x318   : > { %4672 = dma.vmem_to_hbm [thread:$0]  (%p4940_p5), %s6254_s29, 128, %s6252_s8, %s3844_s9  }
 0x319 PF: > { %p4682_p7 = scmp.ge.s32.totalorder %s4869_s15, 2  ;;  %s3885_s28 = sand.u32 1, %s4857_s12  }
 0x31a   : > { %s3886_s30 = scalar_lea.sflag [#allocation4], %s3885_s28 }
 0x31b   : > { %p4676_p8 = pnand %p4682_p7, %p4944_p6 }
 0x31d   : > { %4848 = dma.done.wait (!%p4676_p8), %s3886_s30, 2048  }
 0x31e   : > { %4850 = vsyncadd (!%p4676_p8), %s3886_s30, 4294965248  ;;  %s3895_s4 = scalar_lea.sflag [#allocation6], %s3885_s28 }
 0x31f   : > { %4852 = dma.done.wait (!%p4676_p8), %s3895_s4, 128  }
 0x320   : > { %4854 = vsyncadd (!%p4676_p8), %s3895_s4, 4294967168  ;;  %p17_p5 = scmp.ge.s32.totalorder %s4927_s18, 4   ;;  %s6306_s12 = smov %s4861_s13 }
 0x321   : > { %s6307_s13 = smov %s4865_s14  ;;  %s6308_s14 = smov %s4938_s21 }
 0x322   : > { %s6309_s15 = smov %s4927_s18  ;;  %19 = sbr.rel (!%p17_p5) target bundleno = 5 (0x5), region = 82 }
 0x329   :  { %3900 = vsyncpa [#allocation4], 1 }
 0x32a   :  { %3902 = vsyncpa [#allocation4 + $0x1], 1 }
 0x32b   :  { %3903 = vsyncpa [#allocation6], 1 }
 0x32c   :  { %3905 = vsyncpa [#allocation6 + $0x1], 1 }

</bundles_post_ra>
